<compile_context>
chip_gen: v7x
topology: tpu7x:2x2x1
jax: 0.10.0
libtpu: 0.0.40
codegen_flags: <defaults>
</compile_context>

<pallas_src>
import math

import jax
import jax.numpy as jnp
from jax.experimental import pallas as pl
from jax.experimental.pallas import tpu as pltpu


# ----------------------- shared helpers (kernel + reference) -----------------
def _layernorm(x, gamma, beta, eps=1e-12):
    u = jnp.mean(x, axis=-1, keepdims=True)
    s = jnp.mean(jnp.square(x - u), axis=-1, keepdims=True)
    return gamma * ((x - u) * jax.lax.rsqrt(s + eps)) + beta


def _gelu(x):
    return x * 0.5 * (1.0 + jax.lax.erf(x / jnp.float32(math.sqrt(2.0))))


# ----------------------------- Pallas kernel ---------------------------------
def block_kernel(x_ref, mrow_ref, mcol_ref, pa_ref,
                 wqkv_ref, bqkv_ref, wmp_ref, wmh_ref, bm_ref,
                 wproj_ref, bproj_ref, g1_ref, be1_ref,
                 w1_ref, b1_ref, w2_ref, b2_ref, g2_ref, be2_ref,
                 out_ref):
    f32 = jnp.float32
    _, S, D = x_ref.shape                   # one batch row per grid step
    H = pa_ref.shape[0]
    Wd = D // H
    inv_sqrt_wd = f32(1.0 / math.sqrt(Wd))

    def mm(a, b):      # 2-D matmul: bf16 operands, f32 accumulation (MXU)
        return jax.lax.dot_general(
            a.astype(jnp.bfloat16), b.astype(jnp.bfloat16),
            dimension_numbers=(((1,), (0,)), ((), ())),
            preferred_element_type=f32)

    def mm_nt(a, b):   # a @ b.T without materializing the transpose
        return jax.lax.dot_general(
            a.astype(jnp.bfloat16), b.astype(jnp.bfloat16),
            dimension_numbers=(((1,), (1,)), ((), ())),
            preferred_element_type=f32)

    x2 = x_ref[0]                            # (S, D)  bf16
    mrow = mrow_ref[0]                       # (1, S)  f32 {0,1}
    mcol = mcol_ref[0]                       # (S, 1)  f32 {0,1}
    key_bias = -10000.0 * (1.0 - mrow)       # built once, shared by all heads

    # ---- fused Q|K|V|Vpos projection: one fat (S,D)x(D,4D) MXU GEMM ----
    # (no H-way broadcast of the activation; head slices are lane slices)
    qkv = mm(x2, wqkv_ref[...]) + bqkv_ref[...]          # (S, 4D) f32

    wm_p = wmp_ref[...]                      # (D, D) bf16, row-block per head
    wm_h = wmh_ref[...]                      # (D, D) bf16

    # ---- per-head attention + merge, head reduction fused into f32 acc ----
    merged = jnp.zeros((S, D), dtype=f32)
    for h in range(H):                       # static unroll (H is small)
        q_h = qkv[:, 0 * D + h * Wd: 0 * D + (h + 1) * Wd]    # (S, Wd)
        k_h = qkv[:, 1 * D + h * Wd: 1 * D + (h + 1) * Wd]
        v_h = qkv[:, 2 * D + h * Wd: 2 * D + (h + 1) * Wd]
        vp_h = qkv[:, 3 * D + h * Wd: 3 * D + (h + 1) * Wd]

        # multi-headed self attention (only one (S,S) block live at a time)
        sc = mm_nt(q_h, k_h) * inv_sqrt_wd + key_bias          # (S, S) f32
        sc = sc - jnp.max(sc, axis=-1, keepdims=True)
        e = jnp.exp(sc)
        att = e * pl.reciprocal(jnp.sum(e, axis=-1, keepdims=True), approx=True)
        h_sa = mm(att, v_h)                                     # (S, Wd) f32

        # positional attention: masked_fill(~(m_i & m_j), 0) folded into
        # row-masking of v_pos before the matmul and of the output after
        # (exact, since the mask is {0,1}); the (S,S) keep matrix never built.
        p_pos = mm(pa_ref[h], vp_h * mcol) * mcol               # (S, Wd) f32

        # merge(concat([p, h])): accumulate per-head contributions directly
        # into the (S, D) f32 result (no (H, S, D) intermediate, no head-sum).
        merged = merged + mm(p_pos, wm_p[h * Wd:(h + 1) * Wd, :])
        merged = merged + mm(h_sa, wm_h[h * Wd:(h + 1) * Wd, :])

    # ---- residual + LayerNorm + FFN ----
    proj = mm(merged + bm_ref[...], wproj_ref[...]) + bproj_ref[...]
    h1 = _layernorm(x2.astype(f32) + proj, g1_ref[...], be1_ref[...])
    ff = _gelu(mm(h1, w1_ref[...]) + b1_ref[...])
    ff = mm(ff, w2_ref[...]) + b2_ref[...]
    out = _layernorm(h1 + ff, g2_ref[...], be2_ref[...])
    out_ref[0] = out.astype(out_ref.dtype)                      # bf16 store


# ----------------------------- wrapper ---------------------------------------
def _pack_params(params, compute_dtype=jnp.bfloat16):
    """Host-side weight packing (free, plain JAX)."""
    cdt = lambda n: params[n].astype(compute_dtype)
    f32 = lambda n: params[n].astype(jnp.float32)
    # fused projection weight, column blocks [q | k | v | vp]; at real sizes
    # (D multiple of 128) every block lands on a 128-lane boundary.
    wqkv = jnp.concatenate([cdt("wq"), cdt("wk"), cdt("wv"), cdt("wvp")], axis=1)
    bqkv = jnp.concatenate([f32("bq"), f32("bk"), f32("bv"), f32("bvp")], axis=1)
    return [wqkv, bqkv, cdt("wm_p"), cdt("wm_h"), f32("bm"),
            cdt("wproj"), f32("bproj"), f32("g1"), f32("be1"),
            cdt("w1"), f32("b1"), cdt("w2"), f32("b2"), f32("g2"), f32("be2")]


def transformer_block(x, mask, pos_att, params, n_heads,
                      out_dtype=jnp.bfloat16,
                      vmem_limit_bytes=48 * 1024 * 1024):
    B, S, D = x.shape
    assert D % n_heads == 0

    x_bf = x.astype(jnp.bfloat16)
    pa_bf = pos_att.astype(jnp.bfloat16)
    mrow = mask.reshape(B, 1, S).astype(jnp.float32)
    mcol = mask.reshape(B, S, 1).astype(jnp.float32)
    plist = _pack_params(params)

    def const_spec(arr, single_buffer):
        nd = arr.ndim
        idx = lambda i, _nd=nd: (0,) * _nd
        if single_buffer:
            # resident constants: don't pay for a second pipeline buffer
            return pl.BlockSpec(arr.shape, idx, pipeline_mode=pl.Buffered(1))
        return pl.BlockSpec(arr.shape, idx)

    def build(single_buffer_consts):
        in_specs = [
            pl.BlockSpec((1, S, D), lambda i: (i, 0, 0)),   # x (one batch row)
            pl.BlockSpec((1, 1, S), lambda i: (i, 0, 0)),   # mask, row form
            pl.BlockSpec((1, S, 1), lambda i: (i, 0, 0)),   # mask, col form
            const_spec(pa_bf, single_buffer_consts),        # pos_att (resident)
        ] + [const_spec(p, single_buffer_consts) for p in plist]
        out_specs = pl.BlockSpec((1, S, D), lambda i: (i, 0, 0))
        return pl.pallas_call(
            block_kernel,
            out_shape=jax.ShapeDtypeStruct((B, S, D), out_dtype),
            grid=(B,),                        # >=2 steps: pipelining + v7x 2-TC
            in_specs=in_specs,
            out_specs=out_specs,
            compiler_params=pltpu.CompilerParams(
                dimension_semantics=("parallel",),
                vmem_limit_bytes=vmem_limit_bytes),
        )

    args = (x_bf, mrow, mcol, pa_bf, *plist)
    try:
        return build(True)(*args)
    except Exception:
        # pipeline_mode=pl.Buffered(1) not supported by this jax version:
        # fall back to default (double-buffered) resident constants.
        return build(False)(*args)


# ----------------------------- pure-JAX reference ----------------------------
def reference_block(x, mask, pos_att, P, n_heads):
    """PyTorch-faithful form (per-head split, masked_fill on the scores)."""
    f32, bf16 = jnp.float32, jnp.bfloat16
    B, S, D = x.shape
    H = n_heads
    Wd = D // H
    xf = x.astype(f32)
    m = mask.astype(f32)

    def mm(a, w):     # same rounding as the kernel: bf16 operands, f32 accum
        return jnp.dot(a.astype(bf16), w.astype(bf16), preferred_element_type=f32)

    def bmm(eq, a, b):
        return jnp.einsum(eq, a.astype(bf16), b.astype(bf16),
                          preferred_element_type=f32)

    def split_heads(t):   # (B,S,D) -> (B,H,S,Wd)
        return t.reshape(B, S, H, Wd).transpose(0, 2, 1, 3)

    def merge_heads(t):   # (B,H,S,Wd) -> (B,S,D)
        return t.transpose(0, 2, 1, 3).reshape(B, S, D)

    # PosAttention
    vp = split_heads(mm(xf, P["wvp"]) + P["bvp"])
    keep = (jnp.einsum("bi,bj->bij", m, m) > 0.0)[:, None]        # (B,1,S,S)
    sc_p = jnp.where(keep, pos_att.astype(f32)[None], 0.0)        # (B,H,S,S)
    p = merge_heads(bmm("bhst,bhtw->bhsw", sc_p, vp))

    # MultiHeadedSelfAttention
    q = split_heads(mm(xf, P["wq"]) + P["bq"])
    k = split_heads(mm(xf, P["wk"]) + P["bk"])
    v = split_heads(mm(xf, P["wv"]) + P["bv"])
    sc = bmm("bhsw,bhtw->bhst", q, k) * (1.0 / math.sqrt(Wd))
    sc = sc - 10000.0 * (1.0 - m)[:, None, None, :]
    att = jax.nn.softmax(sc, axis=-1)
    h = merge_heads(bmm("bhst,bhtw->bhsw", att, v))

    merged = mm(p, P["wm_p"]) + mm(h, P["wm_h"]) + P["bm"]
    h1 = _layernorm(xf + mm(merged, P["wproj"]) + P["bproj"], P["g1"], P["be1"])
    ff = mm(_gelu(mm(h1, P["w1"]) + P["b1"]), P["w2"]) + P["b2"]
    return _layernorm(h1 + ff, P["g2"], P["be2"])


# ----------------------------- main -------------------------------------------
if __name__ == "__main__":
    B, S, D, H, FF = 2, 8, 32, 4, 64

    key = jax.random.PRNGKey(0)
    ks = jax.random.split(key, 24)

    def w(k, shape):      # bf16 weight matrices (MXU-native operands)
        return (0.02 * jax.random.normal(k, shape, dtype=jnp.float32)).astype(jnp.bfloat16)

    def b(k, shape):      # f32 biases / LayerNorm params
        return 0.02 * jax.random.normal(k, shape, dtype=jnp.float32)

    params = {
        "wvp": w(ks[0], (D, D)),  "bvp": b(ks[1], (1, D)),
        "wq":  w(ks[2], (D, D)),  "bq":  b(ks[3], (1, D)),
        "wk":  w(ks[4], (D, D)),  "bk":  b(ks[5], (1, D)),
        "wv":  w(ks[6], (D, D)),  "bv":  b(ks[7], (1, D)),
        # merge: Linear(2D -> D) split into its p-half and h-half (x @ W form)
        "wm_p": w(ks[8], (D, D)),
        "wm_h": w(ks[9], (D, D)),
        "bm":   b(ks[10], (1, D)),
        "wproj": w(ks[11], (D, D)), "bproj": b(ks[12], (1, D)),
        "g1":  1.0 + 0.1 * jax.random.normal(ks[13], (1, D), dtype=jnp.float32),
        "be1": b(ks[14], (1, D)),
        "w1":  w(ks[15], (D, FF)), "b1": b(ks[16], (1, FF)),
        "w2":  w(ks[17], (FF, D)), "b2": b(ks[18], (1, D)),
        "g2":  1.0 + 0.1 * jax.random.normal(ks[19], (1, D), dtype=jnp.float32),
        "be2": b(ks[20], (1, D)),
    }

    x = jax.random.normal(ks[21], (B, S, D), dtype=jnp.float32).astype(jnp.bfloat16)
    # positional attention weights (broadcast over batch), row-stochastic
    pos_att = jax.nn.softmax(
        jax.random.normal(ks[22], (H, S, S), dtype=jnp.float32), axis=-1
    ).astype(jnp.bfloat16)
    # padding mask: batch 0 fully valid, batch 1 has last 3 positions masked
    mask = jnp.array([[1, 1, 1, 1, 1, 1, 1, 1],
                      [1, 1, 1, 1, 1, 0, 0, 0]], dtype=jnp.float32)

    out = transformer_block(x, mask, pos_att, params, n_heads=H)
    out = jax.block_until_ready(out)

    ref = reference_block(x, mask, pos_att, params, n_heads=H)
    assert out.shape == (B, S, D)
    out_f32 = out.astype(jnp.float32)
    err = float(jnp.max(jnp.abs(out_f32 - ref)))
    # tolerance covers the bf16 output cast, the EUP approx-reciprocal softmax
    # denominator, and bf16-operand / f32-accumulation rounding on both sides.
    assert jnp.allclose(out_f32, ref, atol=3e-2, rtol=3e-2), f"max abs err = {err}"

    print("KERNEL_OK")
</pallas_src>

<mosaic_0001>
module attributes {stable_mosaic.version = 11 : i64} {
  func.func @block_kernel(%arg0: i32, %arg1: memref<1x8x32xbf16, #tpu.memory_space<vmem>>, %arg2: memref<1x1x8xf32, #tpu.memory_space<vmem>>, %arg3: memref<1x8x1xf32, #tpu.memory_space<vmem>>, %arg4: memref<4x8x8xbf16, #tpu.memory_space<vmem>>, %arg5: memref<32x128xbf16, #tpu.memory_space<vmem>>, %arg6: memref<1x128xf32, #tpu.memory_space<vmem>>, %arg7: memref<32x32xbf16, #tpu.memory_space<vmem>>, %arg8: memref<32x32xbf16, #tpu.memory_space<vmem>>, %arg9: memref<1x32xf32, #tpu.memory_space<vmem>>, %arg10: memref<32x32xbf16, #tpu.memory_space<vmem>>, %arg11: memref<1x32xf32, #tpu.memory_space<vmem>>, %arg12: memref<1x32xf32, #tpu.memory_space<vmem>>, %arg13: memref<1x32xf32, #tpu.memory_space<vmem>>, %arg14: memref<32x64xbf16, #tpu.memory_space<vmem>>, %arg15: memref<1x64xf32, #tpu.memory_space<vmem>>, %arg16: memref<64x32xbf16, #tpu.memory_space<vmem>>, %arg17: memref<1x32xf32, #tpu.memory_space<vmem>>, %arg18: memref<1x32xf32, #tpu.memory_space<vmem>>, %arg19: memref<1x32xf32, #tpu.memory_space<vmem>>, %arg20: memref<1x8x32xbf16, #tpu.memory_space<vmem>>) attributes {dimension_semantics = [#tpu.dimension_semantics<parallel>], iteration_bounds = array<i64: 2>, scalar_prefetch = 0 : i64, scratch_operands = 0 : i64, tpu.core_type = #tpu.core_type<tc>, window_params = [{transform_indices = @transform_0, window_bounds = array<i64: 1, 8, 32>}, {transform_indices = @transform_1, window_bounds = array<i64: 1, 1, 8>}, {transform_indices = @transform_2, window_bounds = array<i64: 1, 8, 1>}, {pipeline_mode = #tpu.pipeline_mode<synchronous>, transform_indices = @transform_3, window_bounds = array<i64: 4, 8, 8>}, {pipeline_mode = #tpu.pipeline_mode<synchronous>, transform_indices = @transform_4, window_bounds = array<i64: 32, 128>}, {pipeline_mode = #tpu.pipeline_mode<synchronous>, transform_indices = @transform_5, window_bounds = array<i64: 1, 128>}, {pipeline_mode = #tpu.pipeline_mode<synchronous>, transform_indices = @transform_6, window_bounds = array<i64: 32, 32>}, {pipeline_mode = #tpu.pipeline_mode<synchronous>, transform_indices = @transform_7, window_bounds = array<i64: 32, 32>}, {pipeline_mode = #tpu.pipeline_mode<synchronous>, transform_indices = @transform_8, window_bounds = array<i64: 1, 32>}, {pipeline_mode = #tpu.pipeline_mode<synchronous>, transform_indices = @transform_9, window_bounds = array<i64: 32, 32>}, {pipeline_mode = #tpu.pipeline_mode<synchronous>, transform_indices = @transform_10, window_bounds = array<i64: 1, 32>}, {pipeline_mode = #tpu.pipeline_mode<synchronous>, transform_indices = @transform_11, window_bounds = array<i64: 1, 32>}, {pipeline_mode = #tpu.pipeline_mode<synchronous>, transform_indices = @transform_12, window_bounds = array<i64: 1, 32>}, {pipeline_mode = #tpu.pipeline_mode<synchronous>, transform_indices = @transform_13, window_bounds = array<i64: 32, 64>}, {pipeline_mode = #tpu.pipeline_mode<synchronous>, transform_indices = @transform_14, window_bounds = array<i64: 1, 64>}, {pipeline_mode = #tpu.pipeline_mode<synchronous>, transform_indices = @transform_15, window_bounds = array<i64: 64, 32>}, {pipeline_mode = #tpu.pipeline_mode<synchronous>, transform_indices = @transform_16, window_bounds = array<i64: 1, 32>}, {pipeline_mode = #tpu.pipeline_mode<synchronous>, transform_indices = @transform_17, window_bounds = array<i64: 1, 32>}, {pipeline_mode = #tpu.pipeline_mode<synchronous>, transform_indices = @transform_18, window_bounds = array<i64: 1, 32>}, {transform_indices = @transform_19, window_bounds = array<i64: 1, 8, 32>}]} {
    %c0 = arith.constant 0 : index
    %c0_0 = arith.constant 0 : index
    %c0_1 = arith.constant 0 : index
    %0 = vector.load %arg1[%c0, %c0_0, %c0_1] : memref<1x8x32xbf16, #tpu.memory_space<vmem>>, vector<1x8x32xbf16>
    %1 = vector.shape_cast %0 : vector<1x8x32xbf16> to vector<8x32xbf16>
    %c0_2 = arith.constant 0 : index
    %c0_3 = arith.constant 0 : index
    %c0_4 = arith.constant 0 : index
    %2 = vector.load %arg2[%c0_2, %c0_3, %c0_4] : memref<1x1x8xf32, #tpu.memory_space<vmem>>, vector<1x1x8xf32>
    %3 = vector.shape_cast %2 : vector<1x1x8xf32> to vector<1x8xf32>
    %c0_5 = arith.constant 0 : index
    %c0_6 = arith.constant 0 : index
    %c0_7 = arith.constant 0 : index
    %4 = vector.load %arg3[%c0_5, %c0_6, %c0_7] : memref<1x8x1xf32, #tpu.memory_space<vmem>>, vector<1x8x1xf32>
    %5 = vector.shape_cast %4 : vector<1x8x1xf32> to vector<8x1xf32>
    %cst = arith.constant 1.000000e+00 : f32
    %6 = vector.broadcast %cst : f32 to vector<1x8xf32>
    %7 = arith.subf %6, %3 : vector<1x8xf32>
    %cst_8 = arith.constant -1.000000e+04 : f32
    %8 = vector.broadcast %cst_8 : f32 to vector<1x8xf32>
    %9 = arith.mulf %8, %7 : vector<1x8xf32>
    %c0_9 = arith.constant 0 : index
    %c0_10 = arith.constant 0 : index
    %10 = vector.load %arg5[%c0_9, %c0_10] : memref<32x128xbf16, #tpu.memory_space<vmem>>, vector<32x128xbf16>
    %cst_11 = arith.constant dense<0.000000e+00> : vector<8x128xf32>
    %11 = tpu.matmul %1, %10, %cst_11 {dimension_numbers = #tpu.dot_dimension_numbers<[1], [0], [0], [1], [0, 0, 1, 1], [], []>} : vector<8x32xbf16>, vector<32x128xbf16>, vector<8x128xf32> -> vector<8x128xf32>
    %c0_12 = arith.constant 0 : index
    %c0_13 = arith.constant 0 : index
    %12 = vector.load %arg6[%c0_12, %c0_13] : memref<1x128xf32, #tpu.memory_space<vmem>>, vector<1x128xf32>
    %13 = vector.broadcast %12 : vector<1x128xf32> to vector<8x128xf32>
    %14 = arith.addf %11, %13 : vector<8x128xf32>
    %c0_14 = arith.constant 0 : index
    %c0_15 = arith.constant 0 : index
    %15 = vector.load %arg7[%c0_14, %c0_15] : memref<32x32xbf16, #tpu.memory_space<vmem>>, vector<32x32xbf16>
    %c0_16 = arith.constant 0 : index
    %c0_17 = arith.constant 0 : index
    %16 = vector.load %arg8[%c0_16, %c0_17] : memref<32x32xbf16, #tpu.memory_space<vmem>>, vector<32x32xbf16>
    %cst_18 = arith.constant 0.000000e+00 : f32
    %17 = vector.broadcast %cst_18 : f32 to vector<8x32xf32>
    %18 = vector.extract_strided_slice %14 {offsets = [0, 0], sizes = [8, 8], strides = [1, 1]} : vector<8x128xf32> to vector<8x8xf32>
    %19 = vector.extract_strided_slice %14 {offsets = [0, 32], sizes = [8, 8], strides = [1, 1]} : vector<8x128xf32> to vector<8x8xf32>
    %20 = vector.extract_strided_slice %14 {offsets = [0, 64], sizes = [8, 8], strides = [1, 1]} : vector<8x128xf32> to vector<8x8xf32>
    %21 = vector.extract_strided_slice %14 {offsets = [0, 96], sizes = [8, 8], strides = [1, 1]} : vector<8x128xf32> to vector<8x8xf32>
    %22 = arith.truncf %18 : vector<8x8xf32> to vector<8x8xbf16>
    %23 = arith.truncf %19 : vector<8x8xf32> to vector<8x8xbf16>
    %cst_19 = arith.constant dense<0.000000e+00> : vector<8x8xf32>
    %24 = tpu.matmul %22, %23, %cst_19 {dimension_numbers = #tpu.dot_dimension_numbers<[1], [1], [0], [0], [0, 0, 1, 0], [], []>} : vector<8x8xbf16>, vector<8x8xbf16>, vector<8x8xf32> -> vector<8x8xf32>
    %cst_20 = arith.constant 0.353553385 : f32
    %25 = vector.broadcast %cst_20 : f32 to vector<8x8xf32>
    %26 = arith.mulf %24, %25 : vector<8x8xf32>
    %27 = vector.broadcast %9 : vector<1x8xf32> to vector<8x8xf32>
    %28 = arith.addf %26, %27 : vector<8x8xf32>
    %cst_21 = arith.constant dense<0xFF800000> : vector<8xf32>
    %29 = vector.multi_reduction <maximumf>, %28, %cst_21 [1] : vector<8x8xf32> to vector<8xf32>
    %30 = vector.shape_cast %29 : vector<8xf32> to vector<8x1xf32>
    %31 = vector.broadcast %30 : vector<8x1xf32> to vector<8x8xf32>
    %32 = arith.subf %28, %31 : vector<8x8xf32>
    %33 = math.exp %32 : vector<8x8xf32>
    %cst_22 = arith.constant dense<0.000000e+00> : vector<8xf32>
    %34 = vector.multi_reduction <add>, %33, %cst_22 [1] : vector<8x8xf32> to vector<8xf32>
    %35 = vector.shape_cast %34 : vector<8xf32> to vector<8x1xf32>
    %36 = tpu.reciprocal %35 {approx = true} : vector<8x1xf32> -> vector<8x1xf32>
    %37 = vector.broadcast %36 : vector<8x1xf32> to vector<8x8xf32>
    %38 = arith.mulf %33, %37 : vector<8x8xf32>
    %39 = arith.truncf %38 : vector<8x8xf32> to vector<8x8xbf16>
    %40 = arith.truncf %20 : vector<8x8xf32> to vector<8x8xbf16>
    %cst_23 = arith.constant dense<0.000000e+00> : vector<8x8xf32>
    %41 = tpu.matmul %39, %40, %cst_23 {dimension_numbers = #tpu.dot_dimension_numbers<[1], [0], [0], [1], [0, 0, 1, 1], [], []>} : vector<8x8xbf16>, vector<8x8xbf16>, vector<8x8xf32> -> vector<8x8xf32>
    %c0_24 = arith.constant 0 : index
    %c0_25 = arith.constant 0 : index
    %c0_26 = arith.constant 0 : index
    %42 = vector.load %arg4[%c0_24, %c0_25, %c0_26] : memref<4x8x8xbf16, #tpu.memory_space<vmem>>, vector<1x8x8xbf16>
    %43 = vector.shape_cast %42 : vector<1x8x8xbf16> to vector<8x8xbf16>
    %44 = vector.broadcast %5 : vector<8x1xf32> to vector<8x8xf32>
    %45 = arith.mulf %21, %44 : vector<8x8xf32>
    %46 = arith.truncf %45 : vector<8x8xf32> to vector<8x8xbf16>
    %cst_27 = arith.constant dense<0.000000e+00> : vector<8x8xf32>
    %47 = tpu.matmul %43, %46, %cst_27 {dimension_numbers = #tpu.dot_dimension_numbers<[1], [0], [0], [1], [0, 0, 1, 1], [], []>} : vector<8x8xbf16>, vector<8x8xbf16>, vector<8x8xf32> -> vector<8x8xf32>
    %48 = vector.broadcast %5 : vector<8x1xf32> to vector<8x8xf32>
    %49 = arith.mulf %47, %48 : vector<8x8xf32>
    %50 = vector.extract_strided_slice %15 {offsets = [0, 0], sizes = [8, 32], strides = [1, 1]} : vector<32x32xbf16> to vector<8x32xbf16>
    %51 = arith.truncf %49 : vector<8x8xf32> to vector<8x8xbf16>
    %cst_28 = arith.constant dense<0.000000e+00> : vector<8x32xf32>
    %52 = tpu.matmul %51, %50, %cst_28 {dimension_numbers = #tpu.dot_dimension_numbers<[1], [0], [0], [1], [0, 0, 1, 1], [], []>} : vector<8x8xbf16>, vector<8x32xbf16>, vector<8x32xf32> -> vector<8x32xf32>
    %53 = arith.addf %17, %52 : vector<8x32xf32>
    %54 = vector.extract_strided_slice %16 {offsets = [0, 0], sizes = [8, 32], strides = [1, 1]} : vector<32x32xbf16> to vector<8x32xbf16>
    %55 = arith.truncf %41 : vector<8x8xf32> to vector<8x8xbf16>
    %cst_29 = arith.constant dense<0.000000e+00> : vector<8x32xf32>
    %56 = tpu.matmul %55, %54, %cst_29 {dimension_numbers = #tpu.dot_dimension_numbers<[1], [0], [0], [1], [0, 0, 1, 1], [], []>} : vector<8x8xbf16>, vector<8x32xbf16>, vector<8x32xf32> -> vector<8x32xf32>
    %57 = arith.addf %53, %56 : vector<8x32xf32>
    %58 = vector.extract_strided_slice %14 {offsets = [0, 8], sizes = [8, 8], strides = [1, 1]} : vector<8x128xf32> to vector<8x8xf32>
    %59 = vector.extract_strided_slice %14 {offsets = [0, 40], sizes = [8, 8], strides = [1, 1]} : vector<8x128xf32> to vector<8x8xf32>
    %60 = vector.extract_strided_slice %14 {offsets = [0, 72], sizes = [8, 8], strides = [1, 1]} : vector<8x128xf32> to vector<8x8xf32>
    %61 = vector.extract_strided_slice %14 {offsets = [0, 104], sizes = [8, 8], strides = [1, 1]} : vector<8x128xf32> to vector<8x8xf32>
    %62 = arith.truncf %58 : vector<8x8xf32> to vector<8x8xbf16>
    %63 = arith.truncf %59 : vector<8x8xf32> to vector<8x8xbf16>
    %cst_30 = arith.constant dense<0.000000e+00> : vector<8x8xf32>
    %64 = tpu.matmul %62, %63, %cst_30 {dimension_numbers = #tpu.dot_dimension_numbers<[1], [1], [0], [0], [0, 0, 1, 0], [], []>} : vector<8x8xbf16>, vector<8x8xbf16>, vector<8x8xf32> -> vector<8x8xf32>
    %cst_31 = arith.constant 0.353553385 : f32
    %65 = vector.broadcast %cst_31 : f32 to vector<8x8xf32>
    %66 = arith.mulf %64, %65 : vector<8x8xf32>
    %67 = vector.broadcast %9 : vector<1x8xf32> to vector<8x8xf32>
    %68 = arith.addf %66, %67 : vector<8x8xf32>
    %cst_32 = arith.constant dense<0xFF800000> : vector<8xf32>
    %69 = vector.multi_reduction <maximumf>, %68, %cst_32 [1] : vector<8x8xf32> to vector<8xf32>
    %70 = vector.shape_cast %69 : vector<8xf32> to vector<8x1xf32>
    %71 = vector.broadcast %70 : vector<8x1xf32> to vector<8x8xf32>
    %72 = arith.subf %68, %71 : vector<8x8xf32>
    %73 = math.exp %72 : vector<8x8xf32>
    %cst_33 = arith.constant dense<0.000000e+00> : vector<8xf32>
    %74 = vector.multi_reduction <add>, %73, %cst_33 [1] : vector<8x8xf32> to vector<8xf32>
    %75 = vector.shape_cast %74 : vector<8xf32> to vector<8x1xf32>
    %76 = tpu.reciprocal %75 {approx = true} : vector<8x1xf32> -> vector<8x1xf32>
    %77 = vector.broadcast %76 : vector<8x1xf32> to vector<8x8xf32>
    %78 = arith.mulf %73, %77 : vector<8x8xf32>
    %79 = arith.truncf %78 : vector<8x8xf32> to vector<8x8xbf16>
    %80 = arith.truncf %60 : vector<8x8xf32> to vector<8x8xbf16>
    %cst_34 = arith.constant dense<0.000000e+00> : vector<8x8xf32>
    %81 = tpu.matmul %79, %80, %cst_34 {dimension_numbers = #tpu.dot_dimension_numbers<[1], [0], [0], [1], [0, 0, 1, 1], [], []>} : vector<8x8xbf16>, vector<8x8xbf16>, vector<8x8xf32> -> vector<8x8xf32>
    %c1 = arith.constant 1 : index
    %c0_35 = arith.constant 0 : index
    %c0_36 = arith.constant 0 : index
    %82 = vector.load %arg4[%c1, %c0_35, %c0_36] : memref<4x8x8xbf16, #tpu.memory_space<vmem>>, vector<1x8x8xbf16>
    %83 = vector.shape_cast %82 : vector<1x8x8xbf16> to vector<8x8xbf16>
    %84 = vector.broadcast %5 : vector<8x1xf32> to vector<8x8xf32>
    %85 = arith.mulf %61, %84 : vector<8x8xf32>
    %86 = arith.truncf %85 : vector<8x8xf32> to vector<8x8xbf16>
    %cst_37 = arith.constant dense<0.000000e+00> : vector<8x8xf32>
    %87 = tpu.matmul %83, %86, %cst_37 {dimension_numbers = #tpu.dot_dimension_numbers<[1], [0], [0], [1], [0, 0, 1, 1], [], []>} : vector<8x8xbf16>, vector<8x8xbf16>, vector<8x8xf32> -> vector<8x8xf32>
    %88 = vector.broadcast %5 : vector<8x1xf32> to vector<8x8xf32>
    %89 = arith.mulf %87, %88 : vector<8x8xf32>
    %90 = vector.extract_strided_slice %15 {offsets = [8, 0], sizes = [8, 32], strides = [1, 1]} : vector<32x32xbf16> to vector<8x32xbf16>
    %91 = arith.truncf %89 : vector<8x8xf32> to vector<8x8xbf16>
    %cst_38 = arith.constant dense<0.000000e+00> : vector<8x32xf32>
    %92 = tpu.matmul %91, %90, %cst_38 {dimension_numbers = #tpu.dot_dimension_numbers<[1], [0], [0], [1], [0, 0, 1, 1], [], []>} : vector<8x8xbf16>, vector<8x32xbf16>, vector<8x32xf32> -> vector<8x32xf32>
    %93 = arith.addf %57, %92 : vector<8x32xf32>
    %94 = vector.extract_strided_slice %16 {offsets = [8, 0], sizes = [8, 32], strides = [1, 1]} : vector<32x32xbf16> to vector<8x32xbf16>
    %95 = arith.truncf %81 : vector<8x8xf32> to vector<8x8xbf16>
    %cst_39 = arith.constant dense<0.000000e+00> : vector<8x32xf32>
    %96 = tpu.matmul %95, %94, %cst_39 {dimension_numbers = #tpu.dot_dimension_numbers<[1], [0], [0], [1], [0, 0, 1, 1], [], []>} : vector<8x8xbf16>, vector<8x32xbf16>, vector<8x32xf32> -> vector<8x32xf32>
    %97 = arith.addf %93, %96 : vector<8x32xf32>
    %98 = vector.extract_strided_slice %14 {offsets = [0, 16], sizes = [8, 8], strides = [1, 1]} : vector<8x128xf32> to vector<8x8xf32>
    %99 = vector.extract_strided_slice %14 {offsets = [0, 48], sizes = [8, 8], strides = [1, 1]} : vector<8x128xf32> to vector<8x8xf32>
    %100 = vector.extract_strided_slice %14 {offsets = [0, 80], sizes = [8, 8], strides = [1, 1]} : vector<8x128xf32> to vector<8x8xf32>
    %101 = vector.extract_strided_slice %14 {offsets = [0, 112], sizes = [8, 8], strides = [1, 1]} : vector<8x128xf32> to vector<8x8xf32>
    %102 = arith.truncf %98 : vector<8x8xf32> to vector<8x8xbf16>
    %103 = arith.truncf %99 : vector<8x8xf32> to vector<8x8xbf16>
    %cst_40 = arith.constant dense<0.000000e+00> : vector<8x8xf32>
    %104 = tpu.matmul %102, %103, %cst_40 {dimension_numbers = #tpu.dot_dimension_numbers<[1], [1], [0], [0], [0, 0, 1, 0], [], []>} : vector<8x8xbf16>, vector<8x8xbf16>, vector<8x8xf32> -> vector<8x8xf32>
    %cst_41 = arith.constant 0.353553385 : f32
    %105 = vector.broadcast %cst_41 : f32 to vector<8x8xf32>
    %106 = arith.mulf %104, %105 : vector<8x8xf32>
    %107 = vector.broadcast %9 : vector<1x8xf32> to vector<8x8xf32>
    %108 = arith.addf %106, %107 : vector<8x8xf32>
    %cst_42 = arith.constant dense<0xFF800000> : vector<8xf32>
    %109 = vector.multi_reduction <maximumf>, %108, %cst_42 [1] : vector<8x8xf32> to vector<8xf32>
    %110 = vector.shape_cast %109 : vector<8xf32> to vector<8x1xf32>
    %111 = vector.broadcast %110 : vector<8x1xf32> to vector<8x8xf32>
    %112 = arith.subf %108, %111 : vector<8x8xf32>
    %113 = math.exp %112 : vector<8x8xf32>
    %cst_43 = arith.constant dense<0.000000e+00> : vector<8xf32>
    %114 = vector.multi_reduction <add>, %113, %cst_43 [1] : vector<8x8xf32> to vector<8xf32>
    %115 = vector.shape_cast %114 : vector<8xf32> to vector<8x1xf32>
    %116 = tpu.reciprocal %115 {approx = true} : vector<8x1xf32> -> vector<8x1xf32>
    %117 = vector.broadcast %116 : vector<8x1xf32> to vector<8x8xf32>
    %118 = arith.mulf %113, %117 : vector<8x8xf32>
    %119 = arith.truncf %118 : vector<8x8xf32> to vector<8x8xbf16>
    %120 = arith.truncf %100 : vector<8x8xf32> to vector<8x8xbf16>
    %cst_44 = arith.constant dense<0.000000e+00> : vector<8x8xf32>
    %121 = tpu.matmul %119, %120, %cst_44 {dimension_numbers = #tpu.dot_dimension_numbers<[1], [0], [0], [1], [0, 0, 1, 1], [], []>} : vector<8x8xbf16>, vector<8x8xbf16>, vector<8x8xf32> -> vector<8x8xf32>
    %c2 = arith.constant 2 : index
    %c0_45 = arith.constant 0 : index
    %c0_46 = arith.constant 0 : index
    %122 = vector.load %arg4[%c2, %c0_45, %c0_46] : memref<4x8x8xbf16, #tpu.memory_space<vmem>>, vector<1x8x8xbf16>
    %123 = vector.shape_cast %122 : vector<1x8x8xbf16> to vector<8x8xbf16>
    %124 = vector.broadcast %5 : vector<8x1xf32> to vector<8x8xf32>
    %125 = arith.mulf %101, %124 : vector<8x8xf32>
    %126 = arith.truncf %125 : vector<8x8xf32> to vector<8x8xbf16>
    %cst_47 = arith.constant dense<0.000000e+00> : vector<8x8xf32>
    %127 = tpu.matmul %123, %126, %cst_47 {dimension_numbers = #tpu.dot_dimension_numbers<[1], [0], [0], [1], [0, 0, 1, 1], [], []>} : vector<8x8xbf16>, vector<8x8xbf16>, vector<8x8xf32> -> vector<8x8xf32>
    %128 = vector.broadcast %5 : vector<8x1xf32> to vector<8x8xf32>
    %129 = arith.mulf %127, %128 : vector<8x8xf32>
    %130 = vector.extract_strided_slice %15 {offsets = [16, 0], sizes = [8, 32], strides = [1, 1]} : vector<32x32xbf16> to vector<8x32xbf16>
    %131 = arith.truncf %129 : vector<8x8xf32> to vector<8x8xbf16>
    %cst_48 = arith.constant dense<0.000000e+00> : vector<8x32xf32>
    %132 = tpu.matmul %131, %130, %cst_48 {dimension_numbers = #tpu.dot_dimension_numbers<[1], [0], [0], [1], [0, 0, 1, 1], [], []>} : vector<8x8xbf16>, vector<8x32xbf16>, vector<8x32xf32> -> vector<8x32xf32>
    %133 = arith.addf %97, %132 : vector<8x32xf32>
    %134 = vector.extract_strided_slice %16 {offsets = [16, 0], sizes = [8, 32], strides = [1, 1]} : vector<32x32xbf16> to vector<8x32xbf16>
    %135 = arith.truncf %121 : vector<8x8xf32> to vector<8x8xbf16>
    %cst_49 = arith.constant dense<0.000000e+00> : vector<8x32xf32>
    %136 = tpu.matmul %135, %134, %cst_49 {dimension_numbers = #tpu.dot_dimension_numbers<[1], [0], [0], [1], [0, 0, 1, 1], [], []>} : vector<8x8xbf16>, vector<8x32xbf16>, vector<8x32xf32> -> vector<8x32xf32>
    %137 = arith.addf %133, %136 : vector<8x32xf32>
    %138 = vector.extract_strided_slice %14 {offsets = [0, 24], sizes = [8, 8], strides = [1, 1]} : vector<8x128xf32> to vector<8x8xf32>
    %139 = vector.extract_strided_slice %14 {offsets = [0, 56], sizes = [8, 8], strides = [1, 1]} : vector<8x128xf32> to vector<8x8xf32>
    %140 = vector.extract_strided_slice %14 {offsets = [0, 88], sizes = [8, 8], strides = [1, 1]} : vector<8x128xf32> to vector<8x8xf32>
    %141 = vector.extract_strided_slice %14 {offsets = [0, 120], sizes = [8, 8], strides = [1, 1]} : vector<8x128xf32> to vector<8x8xf32>
    %142 = arith.truncf %138 : vector<8x8xf32> to vector<8x8xbf16>
    %143 = arith.truncf %139 : vector<8x8xf32> to vector<8x8xbf16>
    %cst_50 = arith.constant dense<0.000000e+00> : vector<8x8xf32>
    %144 = tpu.matmul %142, %143, %cst_50 {dimension_numbers = #tpu.dot_dimension_numbers<[1], [1], [0], [0], [0, 0, 1, 0], [], []>} : vector<8x8xbf16>, vector<8x8xbf16>, vector<8x8xf32> -> vector<8x8xf32>
    %cst_51 = arith.constant 0.353553385 : f32
    %145 = vector.broadcast %cst_51 : f32 to vector<8x8xf32>
    %146 = arith.mulf %144, %145 : vector<8x8xf32>
    %147 = vector.broadcast %9 : vector<1x8xf32> to vector<8x8xf32>
    %148 = arith.addf %146, %147 : vector<8x8xf32>
    %cst_52 = arith.constant dense<0xFF800000> : vector<8xf32>
    %149 = vector.multi_reduction <maximumf>, %148, %cst_52 [1] : vector<8x8xf32> to vector<8xf32>
    %150 = vector.shape_cast %149 : vector<8xf32> to vector<8x1xf32>
    %151 = vector.broadcast %150 : vector<8x1xf32> to vector<8x8xf32>
    %152 = arith.subf %148, %151 : vector<8x8xf32>
    %153 = math.exp %152 : vector<8x8xf32>
    %cst_53 = arith.constant dense<0.000000e+00> : vector<8xf32>
    %154 = vector.multi_reduction <add>, %153, %cst_53 [1] : vector<8x8xf32> to vector<8xf32>
    %155 = vector.shape_cast %154 : vector<8xf32> to vector<8x1xf32>
    %156 = tpu.reciprocal %155 {approx = true} : vector<8x1xf32> -> vector<8x1xf32>
    %157 = vector.broadcast %156 : vector<8x1xf32> to vector<8x8xf32>
    %158 = arith.mulf %153, %157 : vector<8x8xf32>
    %159 = arith.truncf %158 : vector<8x8xf32> to vector<8x8xbf16>
    %160 = arith.truncf %140 : vector<8x8xf32> to vector<8x8xbf16>
    %cst_54 = arith.constant dense<0.000000e+00> : vector<8x8xf32>
    %161 = tpu.matmul %159, %160, %cst_54 {dimension_numbers = #tpu.dot_dimension_numbers<[1], [0], [0], [1], [0, 0, 1, 1], [], []>} : vector<8x8xbf16>, vector<8x8xbf16>, vector<8x8xf32> -> vector<8x8xf32>
    %c3 = arith.constant 3 : index
    %c0_55 = arith.constant 0 : index
    %c0_56 = arith.constant 0 : index
    %162 = vector.load %arg4[%c3, %c0_55, %c0_56] : memref<4x8x8xbf16, #tpu.memory_space<vmem>>, vector<1x8x8xbf16>
    %163 = vector.shape_cast %162 : vector<1x8x8xbf16> to vector<8x8xbf16>
    %164 = vector.broadcast %5 : vector<8x1xf32> to vector<8x8xf32>
    %165 = arith.mulf %141, %164 : vector<8x8xf32>
    %166 = arith.truncf %165 : vector<8x8xf32> to vector<8x8xbf16>
    %cst_57 = arith.constant dense<0.000000e+00> : vector<8x8xf32>
    %167 = tpu.matmul %163, %166, %cst_57 {dimension_numbers = #tpu.dot_dimension_numbers<[1], [0], [0], [1], [0, 0, 1, 1], [], []>} : vector<8x8xbf16>, vector<8x8xbf16>, vector<8x8xf32> -> vector<8x8xf32>
    %168 = vector.broadcast %5 : vector<8x1xf32> to vector<8x8xf32>
    %169 = arith.mulf %167, %168 : vector<8x8xf32>
    %170 = vector.extract_strided_slice %15 {offsets = [24, 0], sizes = [8, 32], strides = [1, 1]} : vector<32x32xbf16> to vector<8x32xbf16>
    %171 = arith.truncf %169 : vector<8x8xf32> to vector<8x8xbf16>
    %cst_58 = arith.constant dense<0.000000e+00> : vector<8x32xf32>
    %172 = tpu.matmul %171, %170, %cst_58 {dimension_numbers = #tpu.dot_dimension_numbers<[1], [0], [0], [1], [0, 0, 1, 1], [], []>} : vector<8x8xbf16>, vector<8x32xbf16>, vector<8x32xf32> -> vector<8x32xf32>
    %173 = arith.addf %137, %172 : vector<8x32xf32>
    %174 = vector.extract_strided_slice %16 {offsets = [24, 0], sizes = [8, 32], strides = [1, 1]} : vector<32x32xbf16> to vector<8x32xbf16>
    %175 = arith.truncf %161 : vector<8x8xf32> to vector<8x8xbf16>
    %cst_59 = arith.constant dense<0.000000e+00> : vector<8x32xf32>
    %176 = tpu.matmul %175, %174, %cst_59 {dimension_numbers = #tpu.dot_dimension_numbers<[1], [0], [0], [1], [0, 0, 1, 1], [], []>} : vector<8x8xbf16>, vector<8x32xbf16>, vector<8x32xf32> -> vector<8x32xf32>
    %177 = arith.addf %173, %176 : vector<8x32xf32>
    %c0_60 = arith.constant 0 : index
    %c0_61 = arith.constant 0 : index
    %178 = vector.load %arg9[%c0_60, %c0_61] : memref<1x32xf32, #tpu.memory_space<vmem>>, vector<1x32xf32>
    %179 = vector.broadcast %178 : vector<1x32xf32> to vector<8x32xf32>
    %180 = arith.addf %177, %179 : vector<8x32xf32>
    %c0_62 = arith.constant 0 : index
    %c0_63 = arith.constant 0 : index
    %181 = vector.load %arg10[%c0_62, %c0_63] : memref<32x32xbf16, #tpu.memory_space<vmem>>, vector<32x32xbf16>
    %182 = arith.truncf %180 : vector<8x32xf32> to vector<8x32xbf16>
    %cst_64 = arith.constant dense<0.000000e+00> : vector<8x32xf32>
    %183 = tpu.matmul %182, %181, %cst_64 {dimension_numbers = #tpu.dot_dimension_numbers<[1], [0], [0], [1], [0, 0, 1, 1], [], []>} : vector<8x32xbf16>, vector<32x32xbf16>, vector<8x32xf32> -> vector<8x32xf32>
    %c0_65 = arith.constant 0 : index
    %c0_66 = arith.constant 0 : index
    %184 = vector.load %arg11[%c0_65, %c0_66] : memref<1x32xf32, #tpu.memory_space<vmem>>, vector<1x32xf32>
    %185 = vector.broadcast %184 : vector<1x32xf32> to vector<8x32xf32>
    %186 = arith.addf %183, %185 : vector<8x32xf32>
    %187 = arith.extf %1 : vector<8x32xbf16> to vector<8x32xf32>
    %188 = arith.addf %187, %186 : vector<8x32xf32>
    %c0_67 = arith.constant 0 : index
    %c0_68 = arith.constant 0 : index
    %189 = vector.load %arg12[%c0_67, %c0_68] : memref<1x32xf32, #tpu.memory_space<vmem>>, vector<1x32xf32>
    %c0_69 = arith.constant 0 : index
    %c0_70 = arith.constant 0 : index
    %190 = vector.load %arg13[%c0_69, %c0_70] : memref<1x32xf32, #tpu.memory_space<vmem>>, vector<1x32xf32>
    %cst_71 = arith.constant dense<0.000000e+00> : vector<8xf32>
    %191 = vector.multi_reduction <add>, %188, %cst_71 [1] : vector<8x32xf32> to vector<8xf32>
    %192 = vector.shape_cast %191 : vector<8xf32> to vector<8x1xf32>
    %cst_72 = arith.constant 3.200000e+01 : f32
    %193 = vector.broadcast %cst_72 : f32 to vector<8x1xf32>
    %194 = arith.divf %192, %193 : vector<8x1xf32>
    %195 = vector.broadcast %194 : vector<8x1xf32> to vector<8x32xf32>
    %196 = arith.subf %188, %195 : vector<8x32xf32>
    %197 = arith.mulf %196, %196 : vector<8x32xf32>
    %cst_73 = arith.constant dense<0.000000e+00> : vector<8xf32>
    %198 = vector.multi_reduction <add>, %197, %cst_73 [1] : vector<8x32xf32> to vector<8xf32>
    %199 = vector.shape_cast %198 : vector<8xf32> to vector<8x1xf32>
    %cst_74 = arith.constant 3.200000e+01 : f32
    %200 = vector.broadcast %cst_74 : f32 to vector<8x1xf32>
    %201 = arith.divf %199, %200 : vector<8x1xf32>
    %202 = vector.broadcast %194 : vector<8x1xf32> to vector<8x32xf32>
    %203 = arith.subf %188, %202 : vector<8x32xf32>
    %cst_75 = arith.constant 9.99999996E-13 : f32
    %204 = vector.broadcast %cst_75 : f32 to vector<8x1xf32>
    %205 = arith.addf %201, %204 : vector<8x1xf32>
    %206 = math.rsqrt %205 : vector<8x1xf32>
    %207 = vector.broadcast %206 : vector<8x1xf32> to vector<8x32xf32>
    %208 = arith.mulf %203, %207 : vector<8x32xf32>
    %209 = vector.broadcast %189 : vector<1x32xf32> to vector<8x32xf32>
    %210 = arith.mulf %209, %208 : vector<8x32xf32>
    %211 = vector.broadcast %190 : vector<1x32xf32> to vector<8x32xf32>
    %212 = arith.addf %210, %211 : vector<8x32xf32>
    %c0_76 = arith.constant 0 : index
    %c0_77 = arith.constant 0 : index
    %213 = vector.load %arg14[%c0_76, %c0_77] : memref<32x64xbf16, #tpu.memory_space<vmem>>, vector<32x64xbf16>
    %214 = arith.truncf %212 : vector<8x32xf32> to vector<8x32xbf16>
    %cst_78 = arith.constant dense<0.000000e+00> : vector<8x64xf32>
    %215 = tpu.matmul %214, %213, %cst_78 {dimension_numbers = #tpu.dot_dimension_numbers<[1], [0], [0], [1], [0, 0, 1, 1], [], []>} : vector<8x32xbf16>, vector<32x64xbf16>, vector<8x64xf32> -> vector<8x64xf32>
    %c0_79 = arith.constant 0 : index
    %c0_80 = arith.constant 0 : index
    %216 = vector.load %arg15[%c0_79, %c0_80] : memref<1x64xf32, #tpu.memory_space<vmem>>, vector<1x64xf32>
    %217 = vector.broadcast %216 : vector<1x64xf32> to vector<8x64xf32>
    %218 = arith.addf %215, %217 : vector<8x64xf32>
    %cst_81 = arith.constant 5.000000e-01 : f32
    %219 = vector.broadcast %cst_81 : f32 to vector<8x64xf32>
    %220 = arith.mulf %218, %219 : vector<8x64xf32>
    %cst_82 = arith.constant 1.41421354 : f32
    %221 = vector.broadcast %cst_82 : f32 to vector<8x64xf32>
    %222 = arith.divf %218, %221 : vector<8x64xf32>
    %223 = math.erf %222 : vector<8x64xf32>
    %cst_83 = arith.constant 1.000000e+00 : f32
    %224 = vector.broadcast %cst_83 : f32 to vector<8x64xf32>
    %225 = arith.addf %224, %223 : vector<8x64xf32>
    %226 = arith.mulf %220, %225 : vector<8x64xf32>
    %c0_84 = arith.constant 0 : index
    %c0_85 = arith.constant 0 : index
    %227 = vector.load %arg16[%c0_84, %c0_85] : memref<64x32xbf16, #tpu.memory_space<vmem>>, vector<64x32xbf16>
    %228 = arith.truncf %226 : vector<8x64xf32> to vector<8x64xbf16>
    %cst_86 = arith.constant dense<0.000000e+00> : vector<8x32xf32>
    %229 = tpu.matmul %228, %227, %cst_86 {dimension_numbers = #tpu.dot_dimension_numbers<[1], [0], [0], [1], [0, 0, 1, 1], [], []>} : vector<8x64xbf16>, vector<64x32xbf16>, vector<8x32xf32> -> vector<8x32xf32>
    %c0_87 = arith.constant 0 : index
    %c0_88 = arith.constant 0 : index
    %230 = vector.load %arg17[%c0_87, %c0_88] : memref<1x32xf32, #tpu.memory_space<vmem>>, vector<1x32xf32>
    %231 = vector.broadcast %230 : vector<1x32xf32> to vector<8x32xf32>
    %232 = arith.addf %229, %231 : vector<8x32xf32>
    %233 = arith.addf %212, %232 : vector<8x32xf32>
    %c0_89 = arith.constant 0 : index
    %c0_90 = arith.constant 0 : index
    %234 = vector.load %arg18[%c0_89, %c0_90] : memref<1x32xf32, #tpu.memory_space<vmem>>, vector<1x32xf32>
    %c0_91 = arith.constant 0 : index
    %c0_92 = arith.constant 0 : index
    %235 = vector.load %arg19[%c0_91, %c0_92] : memref<1x32xf32, #tpu.memory_space<vmem>>, vector<1x32xf32>
    %cst_93 = arith.constant dense<0.000000e+00> : vector<8xf32>
    %236 = vector.multi_reduction <add>, %233, %cst_93 [1] : vector<8x32xf32> to vector<8xf32>
    %237 = vector.shape_cast %236 : vector<8xf32> to vector<8x1xf32>
    %cst_94 = arith.constant 3.200000e+01 : f32
    %238 = vector.broadcast %cst_94 : f32 to vector<8x1xf32>
    %239 = arith.divf %237, %238 : vector<8x1xf32>
    %240 = vector.broadcast %239 : vector<8x1xf32> to vector<8x32xf32>
    %241 = arith.subf %233, %240 : vector<8x32xf32>
    %242 = arith.mulf %241, %241 : vector<8x32xf32>
    %cst_95 = arith.constant dense<0.000000e+00> : vector<8xf32>
    %243 = vector.multi_reduction <add>, %242, %cst_95 [1] : vector<8x32xf32> to vector<8xf32>
    %244 = vector.shape_cast %243 : vector<8xf32> to vector<8x1xf32>
    %cst_96 = arith.constant 3.200000e+01 : f32
    %245 = vector.broadcast %cst_96 : f32 to vector<8x1xf32>
    %246 = arith.divf %244, %245 : vector<8x1xf32>
    %247 = vector.broadcast %239 : vector<8x1xf32> to vector<8x32xf32>
    %248 = arith.subf %233, %247 : vector<8x32xf32>
    %cst_97 = arith.constant 9.99999996E-13 : f32
    %249 = vector.broadcast %cst_97 : f32 to vector<8x1xf32>
    %250 = arith.addf %246, %249 : vector<8x1xf32>
    %251 = math.rsqrt %250 : vector<8x1xf32>
    %252 = vector.broadcast %251 : vector<8x1xf32> to vector<8x32xf32>
    %253 = arith.mulf %248, %252 : vector<8x32xf32>
    %254 = vector.broadcast %234 : vector<1x32xf32> to vector<8x32xf32>
    %255 = arith.mulf %254, %253 : vector<8x32xf32>
    %256 = vector.broadcast %235 : vector<1x32xf32> to vector<8x32xf32>
    %257 = arith.addf %255, %256 : vector<8x32xf32>
    %258 = arith.truncf %257 : vector<8x32xf32> to vector<8x32xbf16>
    %c0_98 = arith.constant 0 : index
    %c0_99 = arith.constant 0 : index
    %c0_100 = arith.constant 0 : index
    %259 = vector.load %arg20[%c0_98, %c0_99, %c0_100] : memref<1x8x32xbf16, #tpu.memory_space<vmem>>, vector<1x8x32xbf16>
    %260 = vector.shape_cast %259 : vector<1x8x32xbf16> to vector<8x32xbf16>
    %261 = vector.shape_cast %258 : vector<8x32xbf16> to vector<1x8x32xbf16>
    tpu.vector_store %arg20[%c0_98, %c0_99, %c0_100], %261 {strides = array<i32>} : memref<1x8x32xbf16, #tpu.memory_space<vmem>>, vector<1x8x32xbf16>,
    return
  }
  func.func @transform_0(%arg0: i32) -> (i32, i32, i32) {
    %c0_i32 = arith.constant 0 : i32
    %c0_i32_0 = arith.constant 0 : i32
    %c0_i32_1 = arith.constant 0 : i32
    return %arg0, %c0_i32, %c0_i32_0 : i32, i32, i32
  }
  func.func @transform_1(%arg0: i32) -> (i32, i32, i32) {
    %c0_i32 = arith.constant 0 : i32
    %c0_i32_0 = arith.constant 0 : i32
    %c0_i32_1 = arith.constant 0 : i32
    return %arg0, %c0_i32, %c0_i32_0 : i32, i32, i32
  }
  func.func @transform_2(%arg0: i32) -> (i32, i32, i32) {
    %c0_i32 = arith.constant 0 : i32
    %c0_i32_0 = arith.constant 0 : i32
    %c0_i32_1 = arith.constant 0 : i32
    return %arg0, %c0_i32, %c0_i32_0 : i32, i32, i32
  }
  func.func @transform_3(%arg0: i32) -> (i32, i32, i32) {
    %c0_i32 = arith.constant 0 : i32
    %c0_i32_0 = arith.constant 0 : i32
    %c0_i32_1 = arith.constant 0 : i32
    %c0_i32_2 = arith.constant 0 : i32
    return %c0_i32, %c0_i32_0, %c0_i32_1 : i32, i32, i32
  }
  func.func @transform_4(%arg0: i32) -> (i32, i32) {
    %c0_i32 = arith.constant 0 : i32
    %c0_i32_0 = arith.constant 0 : i32
    %c0_i32_1 = arith.constant 0 : i32
    return %c0_i32, %c0_i32_0 : i32, i32
  }
  func.func @transform_5(%arg0: i32) -> (i32, i32) {
    %c0_i32 = arith.constant 0 : i32
    %c0_i32_0 = arith.constant 0 : i32
    %c0_i32_1 = arith.constant 0 : i32
    return %c0_i32, %c0_i32_0 : i32, i32
  }
  func.func @transform_6(%arg0: i32) -> (i32, i32) {
    %c0_i32 = arith.constant 0 : i32
    %c0_i32_0 = arith.constant 0 : i32
    %c0_i32_1 = arith.constant 0 : i32
    return %c0_i32, %c0_i32_0 : i32, i32
  }
  func.func @transform_7(%arg0: i32) -> (i32, i32) {
    %c0_i32 = arith.constant 0 : i32
    %c0_i32_0 = arith.constant 0 : i32
    %c0_i32_1 = arith.constant 0 : i32
    return %c0_i32, %c0_i32_0 : i32, i32
  }
  func.func @transform_8(%arg0: i32) -> (i32, i32) {
    %c0_i32 = arith.constant 0 : i32
    %c0_i32_0 = arith.constant 0 : i32
    %c0_i32_1 = arith.constant 0 : i32
    return %c0_i32, %c0_i32_0 : i32, i32
  }
  func.func @transform_9(%arg0: i32) -> (i32, i32) {
    %c0_i32 = arith.constant 0 : i32
    %c0_i32_0 = arith.constant 0 : i32
    %c0_i32_1 = arith.constant 0 : i32
    return %c0_i32, %c0_i32_0 : i32, i32
  }
  func.func @transform_10(%arg0: i32) -> (i32, i32) {
    %c0_i32 = arith.constant 0 : i32
    %c0_i32_0 = arith.constant 0 : i32
    %c0_i32_1 = arith.constant 0 : i32
    return %c0_i32, %c0_i32_0 : i32, i32
  }
  func.func @transform_11(%arg0: i32) -> (i32, i32) {
    %c0_i32 = arith.constant 0 : i32
    %c0_i32_0 = arith.constant 0 : i32
    %c0_i32_1 = arith.constant 0 : i32
    return %c0_i32, %c0_i32_0 : i32, i32
  }
  func.func @transform_12(%arg0: i32) -> (i32, i32) {
    %c0_i32 = arith.constant 0 : i32
    %c0_i32_0 = arith.constant 0 : i32
    %c0_i32_1 = arith.constant 0 : i32
    return %c0_i32, %c0_i32_0 : i32, i32
  }
  func.func @transform_13(%arg0: i32) -> (i32, i32) {
    %c0_i32 = arith.constant 0 : i32
    %c0_i32_0 = arith.constant 0 : i32
    %c0_i32_1 = arith.constant 0 : i32
    return %c0_i32, %c0_i32_0 : i32, i32
  }
  func.func @transform_14(%arg0: i32) -> (i32, i32) {
    %c0_i32 = arith.constant 0 : i32
    %c0_i32_0 = arith.constant 0 : i32
    %c0_i32_1 = arith.constant 0 : i32
    return %c0_i32, %c0_i32_0 : i32, i32
  }
  func.func @transform_15(%arg0: i32) -> (i32, i32) {
    %c0_i32 = arith.constant 0 : i32
    %c0_i32_0 = arith.constant 0 : i32
    %c0_i32_1 = arith.constant 0 : i32
    return %c0_i32, %c0_i32_0 : i32, i32
  }
  func.func @transform_16(%arg0: i32) -> (i32, i32) {
    %c0_i32 = arith.constant 0 : i32
    %c0_i32_0 = arith.constant 0 : i32
    %c0_i32_1 = arith.constant 0 : i32
    return %c0_i32, %c0_i32_0 : i32, i32
  }
  func.func @transform_17(%arg0: i32) -> (i32, i32) {
    %c0_i32 = arith.constant 0 : i32
    %c0_i32_0 = arith.constant 0 : i32
    %c0_i32_1 = arith.constant 0 : i32
    return %c0_i32, %c0_i32_0 : i32, i32
  }
  func.func @transform_18(%arg0: i32) -> (i32, i32) {
    %c0_i32 = arith.constant 0 : i32
    %c0_i32_0 = arith.constant 0 : i32
    %c0_i32_1 = arith.constant 0 : i32
    return %c0_i32, %c0_i32_0 : i32, i32
  }
  func.func @transform_19(%arg0: i32) -> (i32, i32, i32) {
    %c0_i32 = arith.constant 0 : i32
    %c0_i32_0 = arith.constant 0 : i32
    %c0_i32_1 = arith.constant 0 : i32
    return %arg0, %c0_i32, %c0_i32_0 : i32, i32, i32
  }
}

module attributes {stable_mosaic.version = 11 : i64} {
  func.func @block_kernel(%arg0: i32, %arg1: memref<1x8x32xbf16, #tpu.memory_space<vmem>>, %arg2: memref<1x1x8xf32, #tpu.memory_space<vmem>>, %arg3: memref<1x8x1xf32, #tpu.memory_space<vmem>>, %arg4: memref<4x8x8xbf16, #tpu.memory_space<vmem>>, %arg5: memref<32x128xbf16, #tpu.memory_space<vmem>>, %arg6: memref<1x128xf32, #tpu.memory_space<vmem>>, %arg7: memref<32x32xbf16, #tpu.memory_space<vmem>>, %arg8: memref<32x32xbf16, #tpu.memory_space<vmem>>, %arg9: memref<1x32xf32, #tpu.memory_space<vmem>>, %arg10: memref<32x32xbf16, #tpu.memory_space<vmem>>, %arg11: memref<1x32xf32, #tpu.memory_space<vmem>>, %arg12: memref<1x32xf32, #tpu.memory_space<vmem>>, %arg13: memref<1x32xf32, #tpu.memory_space<vmem>>, %arg14: memref<32x64xbf16, #tpu.memory_space<vmem>>, %arg15: memref<1x64xf32, #tpu.memory_space<vmem>>, %arg16: memref<64x32xbf16, #tpu.memory_space<vmem>>, %arg17: memref<1x32xf32, #tpu.memory_space<vmem>>, %arg18: memref<1x32xf32, #tpu.memory_space<vmem>>, %arg19: memref<1x32xf32, #tpu.memory_space<vmem>>, %arg20: memref<1x8x32xbf16, #tpu.memory_space<vmem>>) attributes {dimension_semantics = [#tpu.dimension_semantics<parallel>], iteration_bounds = array<i64: 2>, scalar_prefetch = 0 : i64, scratch_operands = 0 : i64, tpu.core_type = #tpu.core_type<tc>, window_params = [{transform_indices = @transform_0, window_bounds = array<i64: 1, 8, 32>}, {transform_indices = @transform_1, window_bounds = array<i64: 1, 1, 8>}, {transform_indices = @transform_2, window_bounds = array<i64: 1, 8, 1>}, {pipeline_mode = #tpu.pipeline_mode<synchronous>, transform_indices = @transform_3, window_bounds = array<i64: 4, 8, 8>}, {pipeline_mode = #tpu.pipeline_mode<synchronous>, transform_indices = @transform_4, window_bounds = array<i64: 32, 128>}, {pipeline_mode = #tpu.pipeline_mode<synchronous>, transform_indices = @transform_5, window_bounds = array<i64: 1, 128>}, {pipeline_mode = #tpu.pipeline_mode<synchronous>, transform_indices = @transform_6, window_bounds = array<i64: 32, 32>}, {pipeline_mode = #tpu.pipeline_mode<synchronous>, transform_indices = @transform_7, window_bounds = array<i64: 32, 32>}, {pipeline_mode = #tpu.pipeline_mode<synchronous>, transform_indices = @transform_8, window_bounds = array<i64: 1, 32>}, {pipeline_mode = #tpu.pipeline_mode<synchronous>, transform_indices = @transform_9, window_bounds = array<i64: 32, 32>}, {pipeline_mode = #tpu.pipeline_mode<synchronous>, transform_indices = @transform_10, window_bounds = array<i64: 1, 32>}, {pipeline_mode = #tpu.pipeline_mode<synchronous>, transform_indices = @transform_11, window_bounds = array<i64: 1, 32>}, {pipeline_mode = #tpu.pipeline_mode<synchronous>, transform_indices = @transform_12, window_bounds = array<i64: 1, 32>}, {pipeline_mode = #tpu.pipeline_mode<synchronous>, transform_indices = @transform_13, window_bounds = array<i64: 32, 64>}, {pipeline_mode = #tpu.pipeline_mode<synchronous>, transform_indices = @transform_14, window_bounds = array<i64: 1, 64>}, {pipeline_mode = #tpu.pipeline_mode<synchronous>, transform_indices = @transform_15, window_bounds = array<i64: 64, 32>}, {pipeline_mode = #tpu.pipeline_mode<synchronous>, transform_indices = @transform_16, window_bounds = array<i64: 1, 32>}, {pipeline_mode = #tpu.pipeline_mode<synchronous>, transform_indices = @transform_17, window_bounds = array<i64: 1, 32>}, {pipeline_mode = #tpu.pipeline_mode<synchronous>, transform_indices = @transform_18, window_bounds = array<i64: 1, 32>}, {transform_indices = @transform_19, window_bounds = array<i64: 1, 8, 32>}]} {
    %c0 = arith.constant 0 : index
    %c0_0 = arith.constant 0 : index
    %c0_1 = arith.constant 0 : index
    %0 = vector.load %arg1[%c0, %c0_0, %c0_1] : memref<1x8x32xbf16, #tpu.memory_space<vmem>>, vector<1x8x32xbf16>
    %1 = vector.shape_cast %0 : vector<1x8x32xbf16> to vector<8x32xbf16>
    %c0_2 = arith.constant 0 : index
    %c0_3 = arith.constant 0 : index
    %c0_4 = arith.constant 0 : index
    %2 = vector.load %arg2[%c0_2, %c0_3, %c0_4] : memref<1x1x8xf32, #tpu.memory_space<vmem>>, vector<1x1x8xf32>
    %3 = vector.shape_cast %2 : vector<1x1x8xf32> to vector<1x8xf32>
    %c0_5 = arith.constant 0 : index
    %c0_6 = arith.constant 0 : index
    %c0_7 = arith.constant 0 : index
    %4 = vector.load %arg3[%c0_5, %c0_6, %c0_7] : memref<1x8x1xf32, #tpu.memory_space<vmem>>, vector<1x8x1xf32>
    %5 = vector.shape_cast %4 : vector<1x8x1xf32> to vector<8x1xf32>
    %cst = arith.constant 1.000000e+00 : f32
    %6 = vector.broadcast %cst : f32 to vector<1x8xf32>
    %7 = arith.subf %6, %3 : vector<1x8xf32>
    %cst_8 = arith.constant -1.000000e+04 : f32
    %8 = vector.broadcast %cst_8 : f32 to vector<1x8xf32>
    %9 = arith.mulf %8, %7 : vector<1x8xf32>
    %c0_9 = arith.constant 0 : index
    %c0_10 = arith.constant 0 : index
    %10 = vector.load %arg5[%c0_9, %c0_10] : memref<32x128xbf16, #tpu.memory_space<vmem>>, vector<32x128xbf16>
    %cst_11 = arith.constant dense<0.000000e+00> : vector<8x128xf32>
    %11 = tpu.matmul %1, %10, %cst_11 {dimension_numbers = #tpu.dot_dimension_numbers<[1], [0], [0], [1], [0, 0, 1, 1], [], []>} : vector<8x32xbf16>, vector<32x128xbf16>, vector<8x128xf32> -> vector<8x128xf32>
    %c0_12 = arith.constant 0 : index
    %c0_13 = arith.constant 0 : index
    %12 = vector.load %arg6[%c0_12, %c0_13] : memref<1x128xf32, #tpu.memory_space<vmem>>, vector<1x128xf32>
    %13 = vector.broadcast %12 : vector<1x128xf32> to vector<8x128xf32>
    %14 = arith.addf %11, %13 : vector<8x128xf32>
    %c0_14 = arith.constant 0 : index
    %c0_15 = arith.constant 0 : index
    %15 = vector.load %arg7[%c0_14, %c0_15] : memref<32x32xbf16, #tpu.memory_space<vmem>>, vector<32x32xbf16>
    %c0_16 = arith.constant 0 : index
    %c0_17 = arith.constant 0 : index
    %16 = vector.load %arg8[%c0_16, %c0_17] : memref<32x32xbf16, #tpu.memory_space<vmem>>, vector<32x32xbf16>
    %cst_18 = arith.constant 0.000000e+00 : f32
    %17 = vector.broadcast %cst_18 : f32 to vector<8x32xf32>
    %18 = vector.extract_strided_slice %14 {offsets = [0, 0], sizes = [8, 8], strides = [1, 1]} : vector<8x128xf32> to vector<8x8xf32>
    %19 = vector.extract_strided_slice %14 {offsets = [0, 32], sizes = [8, 8], strides = [1, 1]} : vector<8x128xf32> to vector<8x8xf32>
    %20 = vector.extract_strided_slice %14 {offsets = [0, 64], sizes = [8, 8], strides = [1, 1]} : vector<8x128xf32> to vector<8x8xf32>
    %21 = vector.extract_strided_slice %14 {offsets = [0, 96], sizes = [8, 8], strides = [1, 1]} : vector<8x128xf32> to vector<8x8xf32>
    %22 = arith.truncf %18 : vector<8x8xf32> to vector<8x8xbf16>
    %23 = arith.truncf %19 : vector<8x8xf32> to vector<8x8xbf16>
    %cst_19 = arith.constant dense<0.000000e+00> : vector<8x8xf32>
    %24 = tpu.matmul %22, %23, %cst_19 {dimension_numbers = #tpu.dot_dimension_numbers<[1], [1], [0], [0], [0, 0, 1, 0], [], []>} : vector<8x8xbf16>, vector<8x8xbf16>, vector<8x8xf32> -> vector<8x8xf32>
    %cst_20 = arith.constant 0.353553385 : f32
    %25 = vector.broadcast %cst_20 : f32 to vector<8x8xf32>
    %26 = arith.mulf %24, %25 : vector<8x8xf32>
    %27 = vector.broadcast %9 : vector<1x8xf32> to vector<8x8xf32>
    %28 = arith.addf %26, %27 : vector<8x8xf32>
    %cst_21 = arith.constant dense<0xFF800000> : vector<8xf32>
    %29 = vector.multi_reduction <maximumf>, %28, %cst_21 [1] : vector<8x8xf32> to vector<8xf32>
    %30 = vector.shape_cast %29 : vector<8xf32> to vector<8x1xf32>
    %31 = vector.broadcast %30 : vector<8x1xf32> to vector<8x8xf32>
    %32 = arith.subf %28, %31 : vector<8x8xf32>
    %33 = math.exp %32 : vector<8x8xf32>
    %cst_22 = arith.constant dense<0.000000e+00> : vector<8xf32>
    %34 = vector.multi_reduction <add>, %33, %cst_22 [1] : vector<8x8xf32> to vector<8xf32>
    %35 = vector.shape_cast %34 : vector<8xf32> to vector<8x1xf32>
    %36 = tpu.reciprocal %35 {approx = true} : vector<8x1xf32> -> vector<8x1xf32>
    %37 = vector.broadcast %36 : vector<8x1xf32> to vector<8x8xf32>
    %38 = arith.mulf %33, %37 : vector<8x8xf32>
    %39 = arith.truncf %38 : vector<8x8xf32> to vector<8x8xbf16>
    %40 = arith.truncf %20 : vector<8x8xf32> to vector<8x8xbf16>
    %cst_23 = arith.constant dense<0.000000e+00> : vector<8x8xf32>
    %41 = tpu.matmul %39, %40, %cst_23 {dimension_numbers = #tpu.dot_dimension_numbers<[1], [0], [0], [1], [0, 0, 1, 1], [], []>} : vector<8x8xbf16>, vector<8x8xbf16>, vector<8x8xf32> -> vector<8x8xf32>
    %c0_24 = arith.constant 0 : index
    %c0_25 = arith.constant 0 : index
    %c0_26 = arith.constant 0 : index
    %42 = vector.load %arg4[%c0_24, %c0_25, %c0_26] : memref<4x8x8xbf16, #tpu.memory_space<vmem>>, vector<1x8x8xbf16>
    %43 = vector.shape_cast %42 : vector<1x8x8xbf16> to vector<8x8xbf16>
    %44 = vector.broadcast %5 : vector<8x1xf32> to vector<8x8xf32>
    %45 = arith.mulf %21, %44 : vector<8x8xf32>
    %46 = arith.truncf %45 : vector<8x8xf32> to vector<8x8xbf16>
    %cst_27 = arith.constant dense<0.000000e+00> : vector<8x8xf32>
    %47 = tpu.matmul %43, %46, %cst_27 {dimension_numbers = #tpu.dot_dimension_numbers<[1], [0], [0], [1], [0, 0, 1, 1], [], []>} : vector<8x8xbf16>, vector<8x8xbf16>, vector<8x8xf32> -> vector<8x8xf32>
    %48 = vector.broadcast %5 : vector<8x1xf32> to vector<8x8xf32>
    %49 = arith.mulf %47, %48 : vector<8x8xf32>
    %50 = vector.extract_strided_slice %15 {offsets = [0, 0], sizes = [8, 32], strides = [1, 1]} : vector<32x32xbf16> to vector<8x32xbf16>
    %51 = arith.truncf %49 : vector<8x8xf32> to vector<8x8xbf16>
    %cst_28 = arith.constant dense<0.000000e+00> : vector<8x32xf32>
    %52 = tpu.matmul %51, %50, %cst_28 {dimension_numbers = #tpu.dot_dimension_numbers<[1], [0], [0], [1], [0, 0, 1, 1], [], []>} : vector<8x8xbf16>, vector<8x32xbf16>, vector<8x32xf32> -> vector<8x32xf32>
    %53 = arith.addf %17, %52 : vector<8x32xf32>
    %54 = vector.extract_strided_slice %16 {offsets = [0, 0], sizes = [8, 32], strides = [1, 1]} : vector<32x32xbf16> to vector<8x32xbf16>
    %55 = arith.truncf %41 : vector<8x8xf32> to vector<8x8xbf16>
    %cst_29 = arith.constant dense<0.000000e+00> : vector<8x32xf32>
    %56 = tpu.matmul %55, %54, %cst_29 {dimension_numbers = #tpu.dot_dimension_numbers<[1], [0], [0], [1], [0, 0, 1, 1], [], []>} : vector<8x8xbf16>, vector<8x32xbf16>, vector<8x32xf32> -> vector<8x32xf32>
    %57 = arith.addf %53, %56 : vector<8x32xf32>
    %58 = vector.extract_strided_slice %14 {offsets = [0, 8], sizes = [8, 8], strides = [1, 1]} : vector<8x128xf32> to vector<8x8xf32>
    %59 = vector.extract_strided_slice %14 {offsets = [0, 40], sizes = [8, 8], strides = [1, 1]} : vector<8x128xf32> to vector<8x8xf32>
    %60 = vector.extract_strided_slice %14 {offsets = [0, 72], sizes = [8, 8], strides = [1, 1]} : vector<8x128xf32> to vector<8x8xf32>
    %61 = vector.extract_strided_slice %14 {offsets = [0, 104], sizes = [8, 8], strides = [1, 1]} : vector<8x128xf32> to vector<8x8xf32>
    %62 = arith.truncf %58 : vector<8x8xf32> to vector<8x8xbf16>
    %63 = arith.truncf %59 : vector<8x8xf32> to vector<8x8xbf16>
    %cst_30 = arith.constant dense<0.000000e+00> : vector<8x8xf32>
    %64 = tpu.matmul %62, %63, %cst_30 {dimension_numbers = #tpu.dot_dimension_numbers<[1], [1], [0], [0], [0, 0, 1, 0], [], []>} : vector<8x8xbf16>, vector<8x8xbf16>, vector<8x8xf32> -> vector<8x8xf32>
    %cst_31 = arith.constant 0.353553385 : f32
    %65 = vector.broadcast %cst_31 : f32 to vector<8x8xf32>
    %66 = arith.mulf %64, %65 : vector<8x8xf32>
    %67 = vector.broadcast %9 : vector<1x8xf32> to vector<8x8xf32>
    %68 = arith.addf %66, %67 : vector<8x8xf32>
    %cst_32 = arith.constant dense<0xFF800000> : vector<8xf32>
    %69 = vector.multi_reduction <maximumf>, %68, %cst_32 [1] : vector<8x8xf32> to vector<8xf32>
    %70 = vector.shape_cast %69 : vector<8xf32> to vector<8x1xf32>
    %71 = vector.broadcast %70 : vector<8x1xf32> to vector<8x8xf32>
    %72 = arith.subf %68, %71 : vector<8x8xf32>
    %73 = math.exp %72 : vector<8x8xf32>
    %cst_33 = arith.constant dense<0.000000e+00> : vector<8xf32>
    %74 = vector.multi_reduction <add>, %73, %cst_33 [1] : vector<8x8xf32> to vector<8xf32>
    %75 = vector.shape_cast %74 : vector<8xf32> to vector<8x1xf32>
    %76 = tpu.reciprocal %75 {approx = true} : vector<8x1xf32> -> vector<8x1xf32>
    %77 = vector.broadcast %76 : vector<8x1xf32> to vector<8x8xf32>
    %78 = arith.mulf %73, %77 : vector<8x8xf32>
    %79 = arith.truncf %78 : vector<8x8xf32> to vector<8x8xbf16>
    %80 = arith.truncf %60 : vector<8x8xf32> to vector<8x8xbf16>
    %cst_34 = arith.constant dense<0.000000e+00> : vector<8x8xf32>
    %81 = tpu.matmul %79, %80, %cst_34 {dimension_numbers = #tpu.dot_dimension_numbers<[1], [0], [0], [1], [0, 0, 1, 1], [], []>} : vector<8x8xbf16>, vector<8x8xbf16>, vector<8x8xf32> -> vector<8x8xf32>
    %c1 = arith.constant 1 : index
    %c0_35 = arith.constant 0 : index
    %c0_36 = arith.constant 0 : index
    %82 = vector.load %arg4[%c1, %c0_35, %c0_36] : memref<4x8x8xbf16, #tpu.memory_space<vmem>>, vector<1x8x8xbf16>
    %83 = vector.shape_cast %82 : vector<1x8x8xbf16> to vector<8x8xbf16>
    %84 = vector.broadcast %5 : vector<8x1xf32> to vector<8x8xf32>
    %85 = arith.mulf %61, %84 : vector<8x8xf32>
    %86 = arith.truncf %85 : vector<8x8xf32> to vector<8x8xbf16>
    %cst_37 = arith.constant dense<0.000000e+00> : vector<8x8xf32>
    %87 = tpu.matmul %83, %86, %cst_37 {dimension_numbers = #tpu.dot_dimension_numbers<[1], [0], [0], [1], [0, 0, 1, 1], [], []>} : vector<8x8xbf16>, vector<8x8xbf16>, vector<8x8xf32> -> vector<8x8xf32>
    %88 = vector.broadcast %5 : vector<8x1xf32> to vector<8x8xf32>
    %89 = arith.mulf %87, %88 : vector<8x8xf32>
    %90 = vector.extract_strided_slice %15 {offsets = [8, 0], sizes = [8, 32], strides = [1, 1]} : vector<32x32xbf16> to vector<8x32xbf16>
    %91 = arith.truncf %89 : vector<8x8xf32> to vector<8x8xbf16>
    %cst_38 = arith.constant dense<0.000000e+00> : vector<8x32xf32>
    %92 = tpu.matmul %91, %90, %cst_38 {dimension_numbers = #tpu.dot_dimension_numbers<[1], [0], [0], [1], [0, 0, 1, 1], [], []>} : vector<8x8xbf16>, vector<8x32xbf16>, vector<8x32xf32> -> vector<8x32xf32>
    %93 = arith.addf %57, %92 : vector<8x32xf32>
    %94 = vector.extract_strided_slice %16 {offsets = [8, 0], sizes = [8, 32], strides = [1, 1]} : vector<32x32xbf16> to vector<8x32xbf16>
    %95 = arith.truncf %81 : vector<8x8xf32> to vector<8x8xbf16>
    %cst_39 = arith.constant dense<0.000000e+00> : vector<8x32xf32>
    %96 = tpu.matmul %95, %94, %cst_39 {dimension_numbers = #tpu.dot_dimension_numbers<[1], [0], [0], [1], [0, 0, 1, 1], [], []>} : vector<8x8xbf16>, vector<8x32xbf16>, vector<8x32xf32> -> vector<8x32xf32>
    %97 = arith.addf %93, %96 : vector<8x32xf32>
    %98 = vector.extract_strided_slice %14 {offsets = [0, 16], sizes = [8, 8], strides = [1, 1]} : vector<8x128xf32> to vector<8x8xf32>
    %99 = vector.extract_strided_slice %14 {offsets = [0, 48], sizes = [8, 8], strides = [1, 1]} : vector<8x128xf32> to vector<8x8xf32>
    %100 = vector.extract_strided_slice %14 {offsets = [0, 80], sizes = [8, 8], strides = [1, 1]} : vector<8x128xf32> to vector<8x8xf32>
    %101 = vector.extract_strided_slice %14 {offsets = [0, 112], sizes = [8, 8], strides = [1, 1]} : vector<8x128xf32> to vector<8x8xf32>
    %102 = arith.truncf %98 : vector<8x8xf32> to vector<8x8xbf16>
    %103 = arith.truncf %99 : vector<8x8xf32> to vector<8x8xbf16>
    %cst_40 = arith.constant dense<0.000000e+00> : vector<8x8xf32>
    %104 = tpu.matmul %102, %103, %cst_40 {dimension_numbers = #tpu.dot_dimension_numbers<[1], [1], [0], [0], [0, 0, 1, 0], [], []>} : vector<8x8xbf16>, vector<8x8xbf16>, vector<8x8xf32> -> vector<8x8xf32>
    %cst_41 = arith.constant 0.353553385 : f32
    %105 = vector.broadcast %cst_41 : f32 to vector<8x8xf32>
    %106 = arith.mulf %104, %105 : vector<8x8xf32>
    %107 = vector.broadcast %9 : vector<1x8xf32> to vector<8x8xf32>
    %108 = arith.addf %106, %107 : vector<8x8xf32>
    %cst_42 = arith.constant dense<0xFF800000> : vector<8xf32>
    %109 = vector.multi_reduction <maximumf>, %108, %cst_42 [1] : vector<8x8xf32> to vector<8xf32>
    %110 = vector.shape_cast %109 : vector<8xf32> to vector<8x1xf32>
    %111 = vector.broadcast %110 : vector<8x1xf32> to vector<8x8xf32>
    %112 = arith.subf %108, %111 : vector<8x8xf32>
    %113 = math.exp %112 : vector<8x8xf32>
    %cst_43 = arith.constant dense<0.000000e+00> : vector<8xf32>
    %114 = vector.multi_reduction <add>, %113, %cst_43 [1] : vector<8x8xf32> to vector<8xf32>
    %115 = vector.shape_cast %114 : vector<8xf32> to vector<8x1xf32>
    %116 = tpu.reciprocal %115 {approx = true} : vector<8x1xf32> -> vector<8x1xf32>
    %117 = vector.broadcast %116 : vector<8x1xf32> to vector<8x8xf32>
    %118 = arith.mulf %113, %117 : vector<8x8xf32>
    %119 = arith.truncf %118 : vector<8x8xf32> to vector<8x8xbf16>
    %120 = arith.truncf %100 : vector<8x8xf32> to vector<8x8xbf16>
    %cst_44 = arith.constant dense<0.000000e+00> : vector<8x8xf32>
    %121 = tpu.matmul %119, %120, %cst_44 {dimension_numbers = #tpu.dot_dimension_numbers<[1], [0], [0], [1], [0, 0, 1, 1], [], []>} : vector<8x8xbf16>, vector<8x8xbf16>, vector<8x8xf32> -> vector<8x8xf32>
    %c2 = arith.constant 2 : index
    %c0_45 = arith.constant 0 : index
    %c0_46 = arith.constant 0 : index
    %122 = vector.load %arg4[%c2, %c0_45, %c0_46] : memref<4x8x8xbf16, #tpu.memory_space<vmem>>, vector<1x8x8xbf16>
    %123 = vector.shape_cast %122 : vector<1x8x8xbf16> to vector<8x8xbf16>
    %124 = vector.broadcast %5 : vector<8x1xf32> to vector<8x8xf32>
    %125 = arith.mulf %101, %124 : vector<8x8xf32>
    %126 = arith.truncf %125 : vector<8x8xf32> to vector<8x8xbf16>
    %cst_47 = arith.constant dense<0.000000e+00> : vector<8x8xf32>
    %127 = tpu.matmul %123, %126, %cst_47 {dimension_numbers = #tpu.dot_dimension_numbers<[1], [0], [0], [1], [0, 0, 1, 1], [], []>} : vector<8x8xbf16>, vector<8x8xbf16>, vector<8x8xf32> -> vector<8x8xf32>
    %128 = vector.broadcast %5 : vector<8x1xf32> to vector<8x8xf32>
    %129 = arith.mulf %127, %128 : vector<8x8xf32>
    %130 = vector.extract_strided_slice %15 {offsets = [16, 0], sizes = [8, 32], strides = [1, 1]} : vector<32x32xbf16> to vector<8x32xbf16>
    %131 = arith.truncf %129 : vector<8x8xf32> to vector<8x8xbf16>
    %cst_48 = arith.constant dense<0.000000e+00> : vector<8x32xf32>
    %132 = tpu.matmul %131, %130, %cst_48 {dimension_numbers = #tpu.dot_dimension_numbers<[1], [0], [0], [1], [0, 0, 1, 1], [], []>} : vector<8x8xbf16>, vector<8x32xbf16>, vector<8x32xf32> -> vector<8x32xf32>
    %133 = arith.addf %97, %132 : vector<8x32xf32>
    %134 = vector.extract_strided_slice %16 {offsets = [16, 0], sizes = [8, 32], strides = [1, 1]} : vector<32x32xbf16> to vector<8x32xbf16>
    %135 = arith.truncf %121 : vector<8x8xf32> to vector<8x8xbf16>
    %cst_49 = arith.constant dense<0.000000e+00> : vector<8x32xf32>
    %136 = tpu.matmul %135, %134, %cst_49 {dimension_numbers = #tpu.dot_dimension_numbers<[1], [0], [0], [1], [0, 0, 1, 1], [], []>} : vector<8x8xbf16>, vector<8x32xbf16>, vector<8x32xf32> -> vector<8x32xf32>
    %137 = arith.addf %133, %136 : vector<8x32xf32>
    %138 = vector.extract_strided_slice %14 {offsets = [0, 24], sizes = [8, 8], strides = [1, 1]} : vector<8x128xf32> to vector<8x8xf32>
    %139 = vector.extract_strided_slice %14 {offsets = [0, 56], sizes = [8, 8], strides = [1, 1]} : vector<8x128xf32> to vector<8x8xf32>
    %140 = vector.extract_strided_slice %14 {offsets = [0, 88], sizes = [8, 8], strides = [1, 1]} : vector<8x128xf32> to vector<8x8xf32>
    %141 = vector.extract_strided_slice %14 {offsets = [0, 120], sizes = [8, 8], strides = [1, 1]} : vector<8x128xf32> to vector<8x8xf32>
    %142 = arith.truncf %138 : vector<8x8xf32> to vector<8x8xbf16>
    %143 = arith.truncf %139 : vector<8x8xf32> to vector<8x8xbf16>
    %cst_50 = arith.constant dense<0.000000e+00> : vector<8x8xf32>
    %144 = tpu.matmul %142, %143, %cst_50 {dimension_numbers = #tpu.dot_dimension_numbers<[1], [1], [0], [0], [0, 0, 1, 0], [], []>} : vector<8x8xbf16>, vector<8x8xbf16>, vector<8x8xf32> -> vector<8x8xf32>
    %cst_51 = arith.constant 0.353553385 : f32
    %145 = vector.broadcast %cst_51 : f32 to vector<8x8xf32>
    %146 = arith.mulf %144, %145 : vector<8x8xf32>
    %147 = vector.broadcast %9 : vector<1x8xf32> to vector<8x8xf32>
    %148 = arith.addf %146, %147 : vector<8x8xf32>
    %cst_52 = arith.constant dense<0xFF800000> : vector<8xf32>
    %149 = vector.multi_reduction <maximumf>, %148, %cst_52 [1] : vector<8x8xf32> to vector<8xf32>
    %150 = vector.shape_cast %149 : vector<8xf32> to vector<8x1xf32>
    %151 = vector.broadcast %150 : vector<8x1xf32> to vector<8x8xf32>
    %152 = arith.subf %148, %151 : vector<8x8xf32>
    %153 = math.exp %152 : vector<8x8xf32>
    %cst_53 = arith.constant dense<0.000000e+00> : vector<8xf32>
    %154 = vector.multi_reduction <add>, %153, %cst_53 [1] : vector<8x8xf32> to vector<8xf32>
    %155 = vector.shape_cast %154 : vector<8xf32> to vector<8x1xf32>
    %156 = tpu.reciprocal %155 {approx = true} : vector<8x1xf32> -> vector<8x1xf32>
    %157 = vector.broadcast %156 : vector<8x1xf32> to vector<8x8xf32>
    %158 = arith.mulf %153, %157 : vector<8x8xf32>
    %159 = arith.truncf %158 : vector<8x8xf32> to vector<8x8xbf16>
    %160 = arith.truncf %140 : vector<8x8xf32> to vector<8x8xbf16>
    %cst_54 = arith.constant dense<0.000000e+00> : vector<8x8xf32>
    %161 = tpu.matmul %159, %160, %cst_54 {dimension_numbers = #tpu.dot_dimension_numbers<[1], [0], [0], [1], [0, 0, 1, 1], [], []>} : vector<8x8xbf16>, vector<8x8xbf16>, vector<8x8xf32> -> vector<8x8xf32>
    %c3 = arith.constant 3 : index
    %c0_55 = arith.constant 0 : index
    %c0_56 = arith.constant 0 : index
    %162 = vector.load %arg4[%c3, %c0_55, %c0_56] : memref<4x8x8xbf16, #tpu.memory_space<vmem>>, vector<1x8x8xbf16>
    %163 = vector.shape_cast %162 : vector<1x8x8xbf16> to vector<8x8xbf16>
    %164 = vector.broadcast %5 : vector<8x1xf32> to vector<8x8xf32>
    %165 = arith.mulf %141, %164 : vector<8x8xf32>
    %166 = arith.truncf %165 : vector<8x8xf32> to vector<8x8xbf16>
    %cst_57 = arith.constant dense<0.000000e+00> : vector<8x8xf32>
    %167 = tpu.matmul %163, %166, %cst_57 {dimension_numbers = #tpu.dot_dimension_numbers<[1], [0], [0], [1], [0, 0, 1, 1], [], []>} : vector<8x8xbf16>, vector<8x8xbf16>, vector<8x8xf32> -> vector<8x8xf32>
    %168 = vector.broadcast %5 : vector<8x1xf32> to vector<8x8xf32>
    %169 = arith.mulf %167, %168 : vector<8x8xf32>
    %170 = vector.extract_strided_slice %15 {offsets = [24, 0], sizes = [8, 32], strides = [1, 1]} : vector<32x32xbf16> to vector<8x32xbf16>
    %171 = arith.truncf %169 : vector<8x8xf32> to vector<8x8xbf16>
    %cst_58 = arith.constant dense<0.000000e+00> : vector<8x32xf32>
    %172 = tpu.matmul %171, %170, %cst_58 {dimension_numbers = #tpu.dot_dimension_numbers<[1], [0], [0], [1], [0, 0, 1, 1], [], []>} : vector<8x8xbf16>, vector<8x32xbf16>, vector<8x32xf32> -> vector<8x32xf32>
    %173 = arith.addf %137, %172 : vector<8x32xf32>
    %174 = vector.extract_strided_slice %16 {offsets = [24, 0], sizes = [8, 32], strides = [1, 1]} : vector<32x32xbf16> to vector<8x32xbf16>
    %175 = arith.truncf %161 : vector<8x8xf32> to vector<8x8xbf16>
    %cst_59 = arith.constant dense<0.000000e+00> : vector<8x32xf32>
    %176 = tpu.matmul %175, %174, %cst_59 {dimension_numbers = #tpu.dot_dimension_numbers<[1], [0], [0], [1], [0, 0, 1, 1], [], []>} : vector<8x8xbf16>, vector<8x32xbf16>, vector<8x32xf32> -> vector<8x32xf32>
    %177 = arith.addf %173, %176 : vector<8x32xf32>
    %c0_60 = arith.constant 0 : index
    %c0_61 = arith.constant 0 : index
    %178 = vector.load %arg9[%c0_60, %c0_61] : memref<1x32xf32, #tpu.memory_space<vmem>>, vector<1x32xf32>
    %179 = vector.broadcast %178 : vector<1x32xf32> to vector<8x32xf32>
    %180 = arith.addf %177, %179 : vector<8x32xf32>
    %c0_62 = arith.constant 0 : index
    %c0_63 = arith.constant 0 : index
    %181 = vector.load %arg10[%c0_62, %c0_63] : memref<32x32xbf16, #tpu.memory_space<vmem>>, vector<32x32xbf16>
    %182 = arith.truncf %180 : vector<8x32xf32> to vector<8x32xbf16>
    %cst_64 = arith.constant dense<0.000000e+00> : vector<8x32xf32>
    %183 = tpu.matmul %182, %181, %cst_64 {dimension_numbers = #tpu.dot_dimension_numbers<[1], [0], [0], [1], [0, 0, 1, 1], [], []>} : vector<8x32xbf16>, vector<32x32xbf16>, vector<8x32xf32> -> vector<8x32xf32>
    %c0_65 = arith.constant 0 : index
    %c0_66 = arith.constant 0 : index
    %184 = vector.load %arg11[%c0_65, %c0_66] : memref<1x32xf32, #tpu.memory_space<vmem>>, vector<1x32xf32>
    %185 = vector.broadcast %184 : vector<1x32xf32> to vector<8x32xf32>
    %186 = arith.addf %183, %185 : vector<8x32xf32>
    %187 = arith.extf %1 : vector<8x32xbf16> to vector<8x32xf32>
    %188 = arith.addf %187, %186 : vector<8x32xf32>
    %c0_67 = arith.constant 0 : index
    %c0_68 = arith.constant 0 : index
    %189 = vector.load %arg12[%c0_67, %c0_68] : memref<1x32xf32, #tpu.memory_space<vmem>>, vector<1x32xf32>
    %c0_69 = arith.constant 0 : index
    %c0_70 = arith.constant 0 : index
    %190 = vector.load %arg13[%c0_69, %c0_70] : memref<1x32xf32, #tpu.memory_space<vmem>>, vector<1x32xf32>
    %cst_71 = arith.constant dense<0.000000e+00> : vector<8xf32>
    %191 = vector.multi_reduction <add>, %188, %cst_71 [1] : vector<8x32xf32> to vector<8xf32>
    %192 = vector.shape_cast %191 : vector<8xf32> to vector<8x1xf32>
    %cst_72 = arith.constant 3.200000e+01 : f32
    %193 = vector.broadcast %cst_72 : f32 to vector<8x1xf32>
    %194 = arith.divf %192, %193 : vector<8x1xf32>
    %195 = vector.broadcast %194 : vector<8x1xf32> to vector<8x32xf32>
    %196 = arith.subf %188, %195 : vector<8x32xf32>
    %197 = arith.mulf %196, %196 : vector<8x32xf32>
    %cst_73 = arith.constant dense<0.000000e+00> : vector<8xf32>
    %198 = vector.multi_reduction <add>, %197, %cst_73 [1] : vector<8x32xf32> to vector<8xf32>
    %199 = vector.shape_cast %198 : vector<8xf32> to vector<8x1xf32>
    %cst_74 = arith.constant 3.200000e+01 : f32
    %200 = vector.broadcast %cst_74 : f32 to vector<8x1xf32>
    %201 = arith.divf %199, %200 : vector<8x1xf32>
    %202 = vector.broadcast %194 : vector<8x1xf32> to vector<8x32xf32>
    %203 = arith.subf %188, %202 : vector<8x32xf32>
    %cst_75 = arith.constant 9.99999996E-13 : f32
    %204 = vector.broadcast %cst_75 : f32 to vector<8x1xf32>
    %205 = arith.addf %201, %204 : vector<8x1xf32>
    %206 = math.rsqrt %205 : vector<8x1xf32>
    %207 = vector.broadcast %206 : vector<8x1xf32> to vector<8x32xf32>
    %208 = arith.mulf %203, %207 : vector<8x32xf32>
    %209 = vector.broadcast %189 : vector<1x32xf32> to vector<8x32xf32>
    %210 = arith.mulf %209, %208 : vector<8x32xf32>
    %211 = vector.broadcast %190 : vector<1x32xf32> to vector<8x32xf32>
    %212 = arith.addf %210, %211 : vector<8x32xf32>
    %c0_76 = arith.constant 0 : index
    %c0_77 = arith.constant 0 : index
    %213 = vector.load %arg14[%c0_76, %c0_77] : memref<32x64xbf16, #tpu.memory_space<vmem>>, vector<32x64xbf16>
    %214 = arith.truncf %212 : vector<8x32xf32> to vector<8x32xbf16>
    %cst_78 = arith.constant dense<0.000000e+00> : vector<8x64xf32>
    %215 = tpu.matmul %214, %213, %cst_78 {dimension_numbers = #tpu.dot_dimension_numbers<[1], [0], [0], [1], [0, 0, 1, 1], [], []>} : vector<8x32xbf16>, vector<32x64xbf16>, vector<8x64xf32> -> vector<8x64xf32>
    %c0_79 = arith.constant 0 : index
    %c0_80 = arith.constant 0 : index
    %216 = vector.load %arg15[%c0_79, %c0_80] : memref<1x64xf32, #tpu.memory_space<vmem>>, vector<1x64xf32>
    %217 = vector.broadcast %216 : vector<1x64xf32> to vector<8x64xf32>
    %218 = arith.addf %215, %217 : vector<8x64xf32>
    %cst_81 = arith.constant 5.000000e-01 : f32
    %219 = vector.broadcast %cst_81 : f32 to vector<8x64xf32>
    %220 = arith.mulf %218, %219 : vector<8x64xf32>
    %cst_82 = arith.constant 1.41421354 : f32
    %221 = vector.broadcast %cst_82 : f32 to vector<8x64xf32>
    %222 = arith.divf %218, %221 : vector<8x64xf32>
    %223 = math.erf %222 : vector<8x64xf32>
    %cst_83 = arith.constant 1.000000e+00 : f32
    %224 = vector.broadcast %cst_83 : f32 to vector<8x64xf32>
    %225 = arith.addf %224, %223 : vector<8x64xf32>
    %226 = arith.mulf %220, %225 : vector<8x64xf32>
    %c0_84 = arith.constant 0 : index
    %c0_85 = arith.constant 0 : index
    %227 = vector.load %arg16[%c0_84, %c0_85] : memref<64x32xbf16, #tpu.memory_space<vmem>>, vector<64x32xbf16>
    %228 = arith.truncf %226 : vector<8x64xf32> to vector<8x64xbf16>
    %cst_86 = arith.constant dense<0.000000e+00> : vector<8x32xf32>
    %229 = tpu.matmul %228, %227, %cst_86 {dimension_numbers = #tpu.dot_dimension_numbers<[1], [0], [0], [1], [0, 0, 1, 1], [], []>} : vector<8x64xbf16>, vector<64x32xbf16>, vector<8x32xf32> -> vector<8x32xf32>
    %c0_87 = arith.constant 0 : index
    %c0_88 = arith.constant 0 : index
    %230 = vector.load %arg17[%c0_87, %c0_88] : memref<1x32xf32, #tpu.memory_space<vmem>>, vector<1x32xf32>
    %231 = vector.broadcast %230 : vector<1x32xf32> to vector<8x32xf32>
    %232 = arith.addf %229, %231 : vector<8x32xf32>
    %233 = arith.addf %212, %232 : vector<8x32xf32>
    %c0_89 = arith.constant 0 : index
    %c0_90 = arith.constant 0 : index
    %234 = vector.load %arg18[%c0_89, %c0_90] : memref<1x32xf32, #tpu.memory_space<vmem>>, vector<1x32xf32>
    %c0_91 = arith.constant 0 : index
    %c0_92 = arith.constant 0 : index
    %235 = vector.load %arg19[%c0_91, %c0_92] : memref<1x32xf32, #tpu.memory_space<vmem>>, vector<1x32xf32>
    %cst_93 = arith.constant dense<0.000000e+00> : vector<8xf32>
    %236 = vector.multi_reduction <add>, %233, %cst_93 [1] : vector<8x32xf32> to vector<8xf32>
    %237 = vector.shape_cast %236 : vector<8xf32> to vector<8x1xf32>
    %cst_94 = arith.constant 3.200000e+01 : f32
    %238 = vector.broadcast %cst_94 : f32 to vector<8x1xf32>
    %239 = arith.divf %237, %238 : vector<8x1xf32>
    %240 = vector.broadcast %239 : vector<8x1xf32> to vector<8x32xf32>
    %241 = arith.subf %233, %240 : vector<8x32xf32>
    %242 = arith.mulf %241, %241 : vector<8x32xf32>
    %cst_95 = arith.constant dense<0.000000e+00> : vector<8xf32>
    %243 = vector.multi_reduction <add>, %242, %cst_95 [1] : vector<8x32xf32> to vector<8xf32>
    %244 = vector.shape_cast %243 : vector<8xf32> to vector<8x1xf32>
    %cst_96 = arith.constant 3.200000e+01 : f32
    %245 = vector.broadcast %cst_96 : f32 to vector<8x1xf32>
    %246 = arith.divf %244, %245 : vector<8x1xf32>
    %247 = vector.broadcast %239 : vector<8x1xf32> to vector<8x32xf32>
    %248 = arith.subf %233, %247 : vector<8x32xf32>
    %cst_97 = arith.constant 9.99999996E-13 : f32
    %249 = vector.broadcast %cst_97 : f32 to vector<8x1xf32>
    %250 = arith.addf %246, %249 : vector<8x1xf32>
    %251 = math.rsqrt %250 : vector<8x1xf32>
    %252 = vector.broadcast %251 : vector<8x1xf32> to vector<8x32xf32>
    %253 = arith.mulf %248, %252 : vector<8x32xf32>
    %254 = vector.broadcast %234 : vector<1x32xf32> to vector<8x32xf32>
    %255 = arith.mulf %254, %253 : vector<8x32xf32>
    %256 = vector.broadcast %235 : vector<1x32xf32> to vector<8x32xf32>
    %257 = arith.addf %255, %256 : vector<8x32xf32>
    %258 = arith.truncf %257 : vector<8x32xf32> to vector<8x32xbf16>
    %c0_98 = arith.constant 0 : index
    %c0_99 = arith.constant 0 : index
    %c0_100 = arith.constant 0 : index
    %259 = vector.load %arg20[%c0_98, %c0_99, %c0_100] : memref<1x8x32xbf16, #tpu.memory_space<vmem>>, vector<1x8x32xbf16>
    %260 = vector.shape_cast %259 : vector<1x8x32xbf16> to vector<8x32xbf16>
    %261 = vector.shape_cast %258 : vector<8x32xbf16> to vector<1x8x32xbf16>
    tpu.vector_store %arg20[%c0_98, %c0_99, %c0_100], %261 {strides = array<i32>} : memref<1x8x32xbf16, #tpu.memory_space<vmem>>, vector<1x8x32xbf16>,
    return
  }
  func.func @transform_0(%arg0: i32) -> (i32, i32, i32) {
    %c0_i32 = arith.constant 0 : i32
    %c0_i32_0 = arith.constant 0 : i32
    %c0_i32_1 = arith.constant 0 : i32
    return %arg0, %c0_i32, %c0_i32_0 : i32, i32, i32
  }
  func.func @transform_1(%arg0: i32) -> (i32, i32, i32) {
    %c0_i32 = arith.constant 0 : i32
    %c0_i32_0 = arith.constant 0 : i32
    %c0_i32_1 = arith.constant 0 : i32
    return %arg0, %c0_i32, %c0_i32_0 : i32, i32, i32
  }
  func.func @transform_2(%arg0: i32) -> (i32, i32, i32) {
    %c0_i32 = arith.constant 0 : i32
    %c0_i32_0 = arith.constant 0 : i32
    %c0_i32_1 = arith.constant 0 : i32
    return %arg0, %c0_i32, %c0_i32_0 : i32, i32, i32
  }
  func.func @transform_3(%arg0: i32) -> (i32, i32, i32) {
    %c0_i32 = arith.constant 0 : i32
    %c0_i32_0 = arith.constant 0 : i32
    %c0_i32_1 = arith.constant 0 : i32
    %c0_i32_2 = arith.constant 0 : i32
    return %c0_i32, %c0_i32_0, %c0_i32_1 : i32, i32, i32
  }
  func.func @transform_4(%arg0: i32) -> (i32, i32) {
    %c0_i32 = arith.constant 0 : i32
    %c0_i32_0 = arith.constant 0 : i32
    %c0_i32_1 = arith.constant 0 : i32
    return %c0_i32, %c0_i32_0 : i32, i32
  }
  func.func @transform_5(%arg0: i32) -> (i32, i32) {
    %c0_i32 = arith.constant 0 : i32
    %c0_i32_0 = arith.constant 0 : i32
    %c0_i32_1 = arith.constant 0 : i32
    return %c0_i32, %c0_i32_0 : i32, i32
  }
  func.func @transform_6(%arg0: i32) -> (i32, i32) {
    %c0_i32 = arith.constant 0 : i32
    %c0_i32_0 = arith.constant 0 : i32
    %c0_i32_1 = arith.constant 0 : i32
    return %c0_i32, %c0_i32_0 : i32, i32
  }
  func.func @transform_7(%arg0: i32) -> (i32, i32) {
    %c0_i32 = arith.constant 0 : i32
    %c0_i32_0 = arith.constant 0 : i32
    %c0_i32_1 = arith.constant 0 : i32
    return %c0_i32, %c0_i32_0 : i32, i32
  }
  func.func @transform_8(%arg0: i32) -> (i32, i32) {
    %c0_i32 = arith.constant 0 : i32
    %c0_i32_0 = arith.constant 0 : i32
    %c0_i32_1 = arith.constant 0 : i32
    return %c0_i32, %c0_i32_0 : i32, i32
  }
  func.func @transform_9(%arg0: i32) -> (i32, i32) {
    %c0_i32 = arith.constant 0 : i32
    %c0_i32_0 = arith.constant 0 : i32
    %c0_i32_1 = arith.constant 0 : i32
    return %c0_i32, %c0_i32_0 : i32, i32
  }
  func.func @transform_10(%arg0: i32) -> (i32, i32) {
    %c0_i32 = arith.constant 0 : i32
    %c0_i32_0 = arith.constant 0 : i32
    %c0_i32_1 = arith.constant 0 : i32
    return %c0_i32, %c0_i32_0 : i32, i32
  }
  func.func @transform_11(%arg0: i32) -> (i32, i32) {
    %c0_i32 = arith.constant 0 : i32
    %c0_i32_0 = arith.constant 0 : i32
    %c0_i32_1 = arith.constant 0 : i32
    return %c0_i32, %c0_i32_0 : i32, i32
  }
  func.func @transform_12(%arg0: i32) -> (i32, i32) {
    %c0_i32 = arith.constant 0 : i32
    %c0_i32_0 = arith.constant 0 : i32
    %c0_i32_1 = arith.constant 0 : i32
    return %c0_i32, %c0_i32_0 : i32, i32
  }
  func.func @transform_13(%arg0: i32) -> (i32, i32) {
    %c0_i32 = arith.constant 0 : i32
    %c0_i32_0 = arith.constant 0 : i32
    %c0_i32_1 = arith.constant 0 : i32
    return %c0_i32, %c0_i32_0 : i32, i32
  }
  func.func @transform_14(%arg0: i32) -> (i32, i32) {
    %c0_i32 = arith.constant 0 : i32
    %c0_i32_0 = arith.constant 0 : i32
    %c0_i32_1 = arith.constant 0 : i32
    return %c0_i32, %c0_i32_0 : i32, i32
  }
  func.func @transform_15(%arg0: i32) -> (i32, i32) {
    %c0_i32 = arith.constant 0 : i32
    %c0_i32_0 = arith.constant 0 : i32
    %c0_i32_1 = arith.constant 0 : i32
    return %c0_i32, %c0_i32_0 : i32, i32
  }
  func.func @transform_16(%arg0: i32) -> (i32, i32) {
    %c0_i32 = arith.constant 0 : i32
    %c0_i32_0 = arith.constant 0 : i32
    %c0_i32_1 = arith.constant 0 : i32
    return %c0_i32, %c0_i32_0 : i32, i32
  }
  func.func @transform_17(%arg0: i32) -> (i32, i32) {
    %c0_i32 = arith.constant 0 : i32
    %c0_i32_0 = arith.constant 0 : i32
    %c0_i32_1 = arith.constant 0 : i32
    return %c0_i32, %c0_i32_0 : i32, i32
  }
  func.func @transform_18(%arg0: i32) -> (i32, i32) {
    %c0_i32 = arith.constant 0 : i32
    %c0_i32_0 = arith.constant 0 : i32
    %c0_i32_1 = arith.constant 0 : i32
    return %c0_i32, %c0_i32_0 : i32, i32
  }
  func.func @transform_19(%arg0: i32) -> (i32, i32, i32) {
    %c0_i32 = arith.constant 0 : i32
    %c0_i32_0 = arith.constant 0 : i32
    %c0_i32_1 = arith.constant 0 : i32
    return %arg0, %c0_i32, %c0_i32_0 : i32, i32, i32
  }
}

</mosaic_0001>

<bundles_post_ra>
// kernel: tpu_custom_call.1
= control target key start
LH: loop header
LB: loop body
LE: loop exit
PB: predicated region body
PF: predicated region fallthrough
CT: control target
= control target key end

     0   :  { %s3515_s0 = inlined_call_operand.hbm [shape: bf16[2,8,32], index: 0, kind: input, shape index: {}]   ;;  %s3516_s1 = inlined_call_operand.hbm [shape: f32[2,1,8], index: 1, kind: input, shape index: {}]   ;;  %s3517_s2 = inlined_call_operand.vmem [shape: f32[2,8,1], index: 2, kind: input, shape index: {}]   ;;  %s3518_s3 = inlined_call_operand.vmem [shape: bf16[4,8,8], index: 3, kind: input, shape index: {}]   ;;  %s3519_s4 = inlined_call_operand.vmem [shape: bf16[32,128], index: 4, kind: input, shape index: {}]   ;;  %s3520_s5 = inlined_call_operand.hbm [shape: f32[1,128], index: 5, kind: input, shape index: {}]   ;;  %s3521_s6 = inlined_call_operand.vmem [shape: bf16[32,32], index: 6, kind: input, shape index: {}]   ;;  %s3522_s7 = inlined_call_operand.vmem [shape: bf16[32,32], index: 7, kind: input, shape index: {}]   ;;  %s3523_s8 = inlined_call_operand.hbm [shape: f32[1,32], index: 8, kind: input, shape index: {}]   ;;  %s3524_s9 = inlined_call_operand.vmem [shape: bf16[32,32], index: 9, kind: input, shape index: {}]   ;;  %s3525_s10 = inlined_call_operand.vmem [shape: f32[1,32], index: 10, kind: input, shape index: {}]   ;;  %s3526_s11 = inlined_call_operand.vmem [shape: f32[1,32], index: 11, kind: input, shape index: {}]   ;;  %s3527_s12 = inlined_call_operand.vmem [shape: f32[1,32], index: 12, kind: input, shape index: {}]   ;;  %s3528_s13 = inlined_call_operand.vmem [shape: bf16[32,64], index: 13, kind: input, shape index: {}]   ;;  %s3529_s14 = inlined_call_operand.vmem [shape: f32[1,64], index: 14, kind: input, shape index: {}]   ;;  %s3530_s15 = inlined_call_operand.vmem [shape: bf16[64,32], index: 15, kind: input, shape index: {}]   ;;  %s3531_s16 = inlined_call_operand.vmem [shape: f32[1,32], index: 16, kind: input, shape index: {}]   ;;  %s3532_s17 = inlined_call_operand.vmem [shape: f32[1,32], index: 17, kind: input, shape index: {}]   ;;  %s3533_s18 = inlined_call_operand.vmem [shape: f32[1,32], index: 18, kind: input, shape index: {}]   ;;  %s3534_s19 = inlined_call_operand.hbm [shape: bf16[2,8,32], index: 19, kind: output, shape index: {}]  }
   0x1   :  { %3551 = sst [smem:[#allocation22_spill]] %s3515_s0 }
   0x2   :  { %3552 = sst [smem:[#allocation23_spill]] %s3516_s1 }
   0x3   :  { %3553 = sst [smem:[#allocation24_spill]] %s3517_s2 }
   0x4   :  { %3554 = sst [smem:[#allocation25_spill]] %s3518_s3 }
   0x5   :  { %3555 = sst [smem:[#allocation26_spill]] %s3520_s5 }
   0x6   :  { %3556 = sst [smem:[#allocation27_spill]] %s3523_s8 }
   0x7   :  { %3557 = sst [smem:[#allocation28_spill]] %s3531_s16 }
   0x8   :  { %3558 = sst [smem:[#allocation29_spill]] %s3532_s17 }
   0x9   :  { %3559 = sst [smem:[#allocation30_spill]] %s3533_s18 }
   0xa   :  { %3560 = sst [smem:[#allocation31_spill]] %s3534_s19 }
   0xb   :  { %24 = vsyncpa [#allocation3], 0 }
   0xc   :  { %26 = vsyncpa [#allocation3 + $0x1], 0 }
   0xd   :  { %27 = vsyncpa [#allocation6], 0 }
   0xe   :  { %29 = vsyncpa [#allocation6 + $0x1], 0 }
   0xf   :  { %30 = vsyncpa [#allocation9], 0 }
  0x10   :  { %31 = vsyncpa [#allocation4], 0 }
  0x11   :  { %33 = vsyncpa [#allocation4 + $0x1], 0  ;;  %s2973_s0 = smov 0   ;;  %s2975_s30 = smov 0  }
  0x12   :  { %s2977_s20 = smov 0   ;;  %s2979_s21 = smov 0  }
  0x13 LB: > { %3561 = sst [smem:[#allocation16_spill]] %s2836_s0  ;;  %s2994_s1 = sadd.s32 4294967295, %s2848_s21   ;;  %s2848_s21 = sphi %s2979_s21, %s3600_s21   ;;  %s2844_s20 = sphi %s2977_s20, %s3602_s20   ;;  %s2840_s30 = sphi %s2975_s30, %s3604_s30   ;;  %s2836_s0 = sphi %s2973_s0, %s3603_s0  }
  0x14   : > { %3562 = sst [smem:[#allocation17_spill]] %s2844_s20  ;;  %s2256_s22 = sadd.s32 4294967294, %s2848_s21  }
  0x15   : > { %p59_p0 = scmp.ne.s32.totalorder %s2840_s30, %s2836_s0  ;;  %p3541_p1 = scmp.eq.s32.totalorder %s2994_s1, 0 }
  0x16   : > { %p477_p3 = scmp.eq.s32.totalorder %s2256_s22, 1  ;;  %p2257_p5 = scmp.ge.s32.totalorder %s2848_s21, 1 }
  0x17   : > { %p3003_p4 = por %p3541_p1, %p59_p0  ;;  %p484_p7 = scmp.lt.s32.totalorder %s2848_s21, 3 }
  0x18   : > { %p3008_p6 = por %p477_p3, %p59_p0  ;;  %s2850_s25 = smov [#allocation7]  }
  0x19   : > { %s3563_s2 = scalar_select %p3003_p4, 1, 0 }
  0x1a   : > { %s3564_s23 = scalar_select %p3008_p6, 1, 0 }
  0x1b   : > { %p3013_p8 = pnand %p2257_p5, %p484_p7  ;;  %s503_s3 = sshll.u32 %s2850_s25, 4  ;;  %s504_s3 = int_to_ptr.vmem [resolvable:$true] %s503_s3 }
  0x1c   : > { %3565 = sst [smem:[#allocation18_spill]] %s3564_s23  ;;  %s2851_s26 = smov [#allocation8]  }
  0x1d   : > { %s3566_s24 = scalar_select %p3013_p8, 1, 0 }
  0x1e   : > { %p2544_p10 = pneg %p3013_p8  ;;  %s520_s27 = sshll.u32 %s2851_s26, 4  ;;  %s3026_s27 = int_to_ptr.vmem [resolvable:$true] %s520_s27 }
  0x1f   : > { %s3029_s29 = sadd.s32 1, %s2848_s21   ;;  %s3569_s5 = sld [smem:[#allocation26_spill]] }
  0x20   : > { %p3022_p11 = pnand %p2544_p10, %p3541_p1  ;;  %3568 = sst [smem:[#allocation19_spill]] %s3029_s29 }
  0x22   : > { %p2656_p13 = pneg %p3022_p11 }
  0x25   : > { %s2654_s0 = scalar_lea.hbm %s3569_s5, 16 }
  0x26   : > { %p2655_p12 = scmp.ne.s32.totalorder %s3569_s5, %s2654_s0  ;;  %p2661_p5 = scmp.lt.u32.totalorder %s2654_s0, %s3569_s5 }
  0x28   : > { %p2657_p0 = pnand %p2656_p13, %p2655_p12 }
  0x2a   : > { %p2658_p3 = pneg %p2657_p0 }
  0x2c   : > { %p2663_p7 = pnand %p2661_p5, %p2658_p3 }
  0x2e   : > { %2666 = shalt.err (!%p2663_p7)
}
  0x2f   : > { %s2667_s22 = scalar_lea.vmem %s504_s3, 16  ;;  %s2674_s18 = scalar_lea.vmem %s504_s3, 32 }
  0x30   : > { %p2668_p10 = scmp.ne.s32.totalorder %s504_s3, %s2667_s22  ;;  %p2675_p2 = scmp.lt.s32.totalorder %s504_s3, %s504_s3 }
  0x31   : > { %p2676_p6 = scmp.lt.s32.totalorder %s2674_s18, %s2667_s22 }
  0x32   : > { %p2670_p9 = pnand %p2668_p10, %p2656_p13 }
  0x33   : > { %p2677_p4 = por %p2676_p6, %p2675_p2 }
  0x34   : > { %p2671_p1 = pneg %p2670_p9 }
  0x36   : > { %p2678_p8 = pnand %p2677_p4, %p2671_p1 }
  0x38   : > { %2681 = shalt.err (!%p2678_p8)
}
  0x39   : > { %2547 = dma.hbm_to_vmem [thread:$0]  (!%p3022_p11), %s3569_s5, 16, %s504_s3, [#allocation6]  }
  0x3a   : > { %s3570_s8 = sld [smem:[#allocation27_spill]] }
  0x40   : > { %s2682_s25 = scalar_lea.hbm %s3570_s8, 16 }
  0x41   : > { %p2683_p9 = scmp.ne.s32.totalorder %s3570_s8, %s2682_s25  ;;  %p2689_p4 = scmp.lt.u32.totalorder %s2682_s25, %s3570_s8 }
  0x43   : > { %p2685_p2 = pnand %p2683_p9, %p2656_p13 }
  0x45   : > { %p2686_p1 = pneg %p2685_p2 }
  0x47   : > { %p2691_p6 = pnand %p2689_p4, %p2686_p1 }
  0x49   : > { %2694 = shalt.err (!%p2691_p6)
}
  0x4a   : > { %s2695_s3 = scalar_lea.vmem %s3026_s27, 16  ;;  %s2702_s16 = scalar_lea.vmem %s3026_s27, 32 }
  0x4b   : > { %p2696_p8 = scmp.ne.s32.totalorder %s3026_s27, %s2695_s3  ;;  %p2703_p3 = scmp.lt.s32.totalorder %s3026_s27, %s3026_s27 }
  0x4c   : > { %p2704_p5 = scmp.lt.s32.totalorder %s2702_s16, %s2695_s3 }
  0x4d   : > { %p2698_p12 = pnand %p2696_p8, %p2656_p13 }
  0x4e   : > { %p2705_p7 = por %p2704_p5, %p2703_p3 }
  0x4f   : > { %p2699_p0 = pneg %p2698_p12 }
  0x51   : > { %p2706_p10 = pnand %p2705_p7, %p2699_p0 }
  0x53   : > { %2709 = shalt.err (!%p2706_p10)
}
  0x54   : > { %2550 = dma.hbm_to_vmem [thread:$0]  (!%p3022_p11), %s3570_s8, 16, %s3026_s27, [#allocation9]  }
  0x55   : > { %s3571_s0 = ssub.s32 %s2848_s21, %s3029_s29  ;;  %s46_s28 = sadd.s32 1, %s2844_s20 }
  0x56   : > { %p44_p13 = scmp.eq.s32.totalorder %s3571_s0, 0  ;;  %p53_p9 = scmp.ne.s32.totalorder %s2844_s20, %s2840_s30 }
  0x57   : > { %p54_p2 = scmp.eq.s32.totalorder %s2848_s21, 0  ;;  %p3573_p4 = scmp.eq.s32.totalorder %s2994_s1, 1 }
  0x58   : > { %s3089_s23 = scalar_select %p44_p13, %s2844_s20, %s46_s28  }
  0x59   : > { %p55_p1 = por %p54_p2, %p53_p9  ;;  %p3093_p6 = por %p3573_p4, %p53_p9 }
  0x5a   : > { %3572 = sst [smem:[#allocation20_spill]] %s3089_s23  ;;  %p2564_p8 = scmp.lt.s32.totalorder %s2848_s21, 2 }
  0x5b   : > { %s3574_s25 = scalar_select %p3093_p6, 1, 0 }
  0x5c   : > { %s3099_s26 = sand.u32 1, %s2844_s20   ;;  %s2262_s22 = sshll.u32 %s2848_s21, 6 }
  0x5d   : > { %3575 = sst [smem:[#allocation21_spill]] %s3574_s25  ;;  %s2261_s27 = sshll.u32 %s3099_s26, 2 }
  0x5e   : > { %s3576_s16 = sld [smem:[#allocation22_spill]]  ;;  %s565_s17 = scalar_lea.vmem [#allocation2], %s2261_s27 }
  0x5f   : > { %s572_s0 = sshll.u32 %s565_s17, 4  ;;  %p3110_p11 = pnand %p2564_p8, %p55_p1  ;;  %s3108_s0 = int_to_ptr.vmem [resolvable:$true] %s572_s0 }
  0x60   : > { %s562_s8 = scalar_lea.sflag [#allocation3], %s3099_s26 }
  0x61   : > { %p2712_p0 = pneg %p3110_p11 }
  0x64   : > { %s3106_s19 = scalar_lea.hbm %s3576_s16, %s2262_s22  ;;  %s2715_s18 = scalar_lea.hbm %s3576_s16, 128 }
  0x65   : > { %s2710_s23 = scalar_lea.hbm %s3106_s19, 64  ;;  %p2716_p7 = scmp.lt.u32.totalorder %s3106_s19, %s3576_s16 }
  0x66   : > { %p2711_p12 = scmp.ne.s32.totalorder %s3106_s19, %s2710_s23  ;;  %p2717_p10 = scmp.lt.u32.totalorder %s2715_s18, %s2710_s23 }
  0x67   : > { %p2719_p9 = scmp.lt.u32.totalorder %s2710_s23, %s3106_s19 }
  0x68   : > { %p2713_p3 = pnand %p2712_p0, %p2711_p12  ;;  %p2718_p13 = por %p2717_p10, %p2716_p7 }
  0x6a   : > { %p2714_p5 = pneg %p2713_p3  ;;  %p2720_p2 = por %p2719_p9, %p2718_p13 }
  0x6c   : > { %p2721_p1 = pnand %p2720_p2, %p2714_p5 }
  0x6e   : > { %2724 = shalt.err (!%p2721_p1)
}
  0x6f   : > { %s2725_s5 = scalar_lea.vmem %s3108_s0, 64  ;;  %s2852_s27 = smov [#allocation2]  }
  0x70   : > { %p2726_p4 = scmp.ne.s32.totalorder %s3108_s0, %s2725_s5  ;;  %s2730_s22 = sshll.u32 %s2852_s27, 4  ;;  %s2731_s22 = int_to_ptr.vmem [resolvable:$false] %s2730_s22 }
  0x71   : > { %s2732_s3 = scalar_lea.vmem %s2731_s22, 128  ;;  %p2733_p3 = scmp.lt.s32.totalorder %s3108_s0, %s2731_s22 }
  0x72   : > { %p2728_p8 = pnand %p2726_p4, %p2712_p0  ;;  %p2734_p7 = scmp.lt.s32.totalorder %s2732_s3, %s2725_s5 }
  0x74   : > { %p2729_p12 = pneg %p2728_p8  ;;  %p2735_p10 = por %p2734_p7, %p2733_p3 }
  0x76   : > { %p2736_p13 = pnand %p2735_p10, %p2729_p12 }
  0x78   : > { %2739 = shalt.err (!%p2736_p13)
}
  0x79   : > { %2554 = dma.hbm_to_vmem [thread:$0]  (!%p3110_p11), %s3106_s19, 64, %s3108_s0, %s562_s8  }
  0x7a   : > { %s2263_s23 = sshll.u32 %s2848_s21, 4  ;;  %s582_s18 = scalar_lea.vmem [#allocation5], %s3099_s26 }
  0x7b   : > { %s589_s17 = sshll.u32 %s582_s18, 4  ;;  %s3578_s20 = sld [smem:[#allocation23_spill]]  ;;  %s590_s17 = int_to_ptr.vmem [resolvable:$true] %s589_s17 }
  0x7c   : > { %s3580_s5 = sand.u32 1, %s2848_s21  }
  0x7d   : > { %s580_s3 = scalar_lea.sflag [#allocation6], %s3580_s5 }
  0x81   : > { %s3579_s29 = smov %s3578_s20  ;;  %s3146_s22 = scalar_lea.hbm %s3578_s20, %s2263_s23 }
  0x82   : > { %s2740_s25 = scalar_lea.hbm %s3146_s22, 16  ;;  %s2745_s19 = scalar_lea.hbm %s3579_s29, 32 }
  0x83   : > { %p2741_p5 = scmp.ne.s32.totalorder %s3146_s22, %s2740_s25  ;;  %p2746_p1 = scmp.lt.u32.totalorder %s3146_s22, %s3579_s29 }
  0x84   : > { %p2747_p4 = scmp.lt.u32.totalorder %s2745_s19, %s2740_s25  ;;  %p2749_p12 = scmp.lt.u32.totalorder %s2740_s25, %s3146_s22 }
  0x85   : > { %p2743_p9 = pnand %p2741_p5, %p2712_p0 }
  0x86   : > { %p2748_p8 = por %p2747_p4, %p2746_p1 }
  0x87   : > { %p2744_p2 = pneg %p2743_p9 }
  0x88   : > { %p2750_p3 = por %p2749_p12, %p2748_p8 }
  0x8a   : > { %p2751_p7 = pnand %p2750_p3, %p2744_p2 }
  0x8c   : > { %2754 = shalt.err (!%p2751_p7)
}
  0x8d   : > { %s2755_s0 = scalar_lea.vmem %s590_s17, 16  ;;  %s2853_s23 = smov [#allocation5]  }
  0x8e   : > { %p2756_p10 = scmp.ne.s32.totalorder %s590_s17, %s2755_s0  ;;  %s2760_s18 = sshll.u32 %s2853_s23, 4  ;;  %s2761_s18 = int_to_ptr.vmem [resolvable:$false] %s2760_s18 }
  0x8f   : > { %s2762_s27 = scalar_lea.vmem %s2761_s18, 32  ;;  %p2763_p9 = scmp.lt.s32.totalorder %s590_s17, %s2761_s18 }
  0x90   : > { %p2758_p13 = pnand %p2756_p10, %p2712_p0  ;;  %p2764_p6 = scmp.lt.s32.totalorder %s2762_s27, %s2755_s0 }
  0x92   : > { %p2759_p5 = pneg %p2758_p13  ;;  %p2765_p1 = por %p2764_p6, %p2763_p9 }
  0x94   : > { %p2766_p4 = pnand %p2765_p1, %p2759_p5 }
  0x96   : > { %2769 = shalt.err (!%p2766_p4)
}
  0x97   : > { %2557 = dma.hbm_to_vmem [thread:$0]  (!%p3110_p11), %s3146_s22, 16, %s590_s17, %s580_s3  }
  0x98   : > { %p3581_p2 = scmp.ne.s32.totalorder %s3566_s24, 0 }
  0x99   : > { %s3172_s25 = sand.u32 (!%p3581_p2), 1, %s2840_s30   ;;  %p3582_p6 = scmp.ne.s32.totalorder (!%p3581_p2), %s3563_s2, 0 }
  0x9a   : > { %605 = sbr.rel (%p3581_p2) target bundleno = 4646 (0x1226), region = 96  ;;  %s2265_s5 = sshll.u32 (!%p3581_p2), %s3172_s25, 2 }
  0x9b   : > { %s608_s8 = scalar_lea.sflag (!%p3581_p2), [#allocation3], %s3172_s25  ;;  %s611_s26 = scalar_lea.vmem (!%p3581_p2), [#allocation2], %s2265_s5 }
  0xa1   : > { %2815 = dma.done.wait (%p3582_p6), %s608_s8, 64  }
  0xa2   : > { %2817 = vsyncadd (%p3582_p6), %s608_s8, 4294967232  ;;  %s616_s24 = sand.u32 1, %s2994_s1   ;;  %s619_s17 = scalar_lea.vmem [#allocation5], %s3172_s25 }
  0xa3   : > { %s617_s28 = scalar_lea.sflag [#allocation6], %s616_s24 }
  0xa4   : > { %2819 = dma.done.wait (%p3582_p6), %s617_s28, 16  }
  0xa5   : > { %2821 = vsyncadd (%p3582_p6), %s617_s28, 4294967280  ;;  %p3583_p11 = scmp.eq.s32.totalorder %s2994_s1, 0 }
  0xa7   : > { %2823 = dma.done.wait (%p3583_p11), [#allocation6], 16   ;;  %p3584_p0 = pmov %p3583_p11 }
  0xa9   : > { %2825 = vsyncadd (%p3584_p0), [#allocation6], 4294967280  ;;  %p3585_p8 = pmov %p3584_p0 }
  0xaa   : > { %p3586_p12 = pmov %p3584_p0 }
  0xab   : > { %2827 = dma.done.wait (%p3585_p8), [#allocation9], 16  }
  0xac   : > { %2829 = vsyncadd (%p3586_p12), [#allocation9], 4294967280  ;;  %v2854_v0 = vmov 0.0   ;;  %vm2855_vm0 = vmmov 0   ;;  %v2622_v1 = vld [vmem:[%s3519_s4] sm:$0xff]   ;;  %v2623_v2 = vld [vmem:[%s3519_s4 + $0x8] sm:$0xff]   ;;  %v828_v13 = vlaneseq }
  0xad   : > { %2374 = vmatprep.subr.bf16.mxu0 %v2854_v0  ;;  %2378 = vmatprep.mubr.msk.bf16.mxu0 %vm2855_vm0, %v2854_v0  ;;  %vm723_vm1 = vcmask 261120   ;;  %v3209_v3 = vld [vmem:[%s611_s26] sm:$0xf]  ;;  %v2270_v4 = vld [vmem:[#allocation7] ss:$0 sm:$0xff]  ;;  %s2856_s16 = smov 96  }
  0xae   : > { %2382 = vmatprep.subr.bf16.mxu1 %v2854_v0  ;;  %2384 = vmatprep.mubr.msk.bf16.mxu1 %vm2855_vm0, %v2854_v0  ;;  %vm779_vm2 = vcmask 64512   ;;  %v696_v14 = vld [vmem:[%s619_s17] sm:$0x1]  ;;  %v829_v16 = vshrl.u32 %v828_v13, 7  ;;  %v2857_v27 = vmov 0   ;;  %p690_p3 = scmp.lt.s32.totalorder %s2994_s1, 1 }
  0xaf   : > { %2375 = vmatpush3.bf16.msra.mxu0 %v2622_v1  ;;  %v698_v15 = vsub.f32 1.0, %v696_v14  ;;  %2620 = vset.pattern.permute.xlu1 %v2857_v27  ;;  %s2858_s0 = smov 64   ;;  %s2859_s18 = smov 88   ;;  %vm851_vm3 = vcmask 1043456   ;;  %v771_v41 = vld [vmem:[%s3522_s7] sm:$0xf] }
  0xb0   : > { %2376 = vmatprep.subr.bf16.mxu0 %v2854_v0  ;;  %v830_v18 = vsub.s32 0, %v829_v16  ;;  %2621 = vset.pattern.permute.xlu0 %v2857_v27  ;;  %s691_s20 = scalar_select %p690_p3, %s2994_s1, 1  ;;  %v959_v43 = vsel %vm851_vm3, %v771_v41, 0  ;;  %v767_v50 = vld [vmem:[%s3521_s6] sm:$0xf]  ;;  %vm2044_vm4 = vcmask 523264  }
  0xb1   : > { %v699_v17 = vmul.f32 -10000.0, %v698_v15  ;;  %s3587_s26 = sld [smem:[#allocation24_spill]]  ;;  %s2860_s28 = smov 120   ;;  %v1005_v51 = vsel %vm851_vm3, %v767_v50, 0  ;;  %v772_v50 = vld [vmem:[%s3522_s7 + $0x4] sm:$0xf] }
  0xb2   : > { %s2269_s23 = sshll.u32 %s691_s20, 3  ;;  %s2861_s22 = smov 24   ;;  %vm2119_vm5 = vcmask 257024  }
  0xb3   : > { %2377 = vmatpush3.bf16.msra.mxu0 %v2623_v2  ;;  %v3231_v19 = vrot.slane %v699_v17, %v830_v18  ;;  %s2862_s3 = smov 32   ;;  %s3588_s20 = sld [smem:[#allocation25_spill]] }
  0xb4   : > { %2388 = vmatprep.subr.bf16.mxu0 %v2854_v0  ;;  %s2866_s17 = smov 80   ;;  %s2869_s27 = smov 72  }
  0xb5   : > { %s3592_s8 = sld [smem:[#allocation21_spill]]  ;;  %s689_s2 = scalar_lea.vmem [#allocation10], %s2265_s5 }
  0xb6   : > { %2379 = vmatmul.mubr.msk.bf16.vlgmr.msra.gmra.mrb[0].mxu0 %vm723_vm1, %v3209_v3 }
  0xb7   : > { %2390 = vmatprep.mubr.msk.bf16.mxu0 %vm2855_vm0, %v2854_v0  ;;  %s693_s24 = scalar_lea.vmem %s3587_s26, %s2269_s23  ;;  %s2863_s26 = smov 56  }
  0xb8   : > { %v697_v33 = vld [vmem:[%s693_s24] sm:$0xff]  ;;  %s2864_s24 = smov 112  }
  0xb9   : > { %s3589_s23 = smov %s3588_s20  ;;  %v895_v49 = vld [vmem:[%s3588_s20] sm:$0xf]  ;;  %s3590_s20 = sld [smem:[#allocation28_spill]] }
  0xba   : > { %v2281_v60 = vld [vmem:[%s3589_s23 + $0x4] sm:$0xf] }
  0xbb   : > { %p3595_p10 = scmp.ne.s32.totalorder %s3592_s8, 0 }
 0x189   : > { %v761_v5 = vpop.f32.mrb[0].mxu0 }
 0x18a   : > { %v3216_v6 = vadd.f32 %v2270_v4, %v761_v5  ;;  %v2380_v7 = vpop.f32.mrb[1].mxu0 }
 0x18b   : > { %v764_v8 = vpop.f32.mrb[2].mxu0 }
 0x18c   : > { %v3220_v9 = vpack.c.bf16 %v3216_v6, %v3216_v6  ;;  %v2381_v10 = vpop.f32.mrb[3].mxu0 }
 0x18e   : > { %777 = vrot.lane.b32.xlu0 %v3220_v9, %s2856_s16  ;;  %s3594_s16 = sld [smem:[#allocation31_spill]] }
 0x200   : > { %v778_v11 = vpop.permute.xlu0 %777 }
 0x201   : > { %v784_v12 = vsel %vm779_vm2, %v778_v11, 0 }
 0x202   : > { %2383 = vmatpush3.bf16.xpose.msra.mxu1 %v784_v12 }
 0x203   : > { %2394 = vmatprep.subr.bf16.mxu1 %v2854_v0 }
 0x209   : > { %2385 = vmatmul.mubr.msk.bf16.vlgmr.msra.gmra.mrb[0].mxu1 %vm779_vm2, %v3220_v9 }
 0x20a   : > { %2396 = vmatprep.mubr.msk.bf16.mxu1 %vm2855_vm0, %v2854_v0 }
 0x2dc   : > { %v820_v20 = vpop.f32.mrb[0].mxu1 }
 0x2dd   : > { %v826_v21 = vmul.f32 0.35355338, %v820_v20  ;;  %v2386_v22 = vpop.f32.mrb[1].mxu1 }
 0x2de   : > { %v823_v23 = vpop.f32.mrb[2].mxu1 }
 0x2df   : > { %v2387_v24 = vpop.f32.mrb[3].mxu1  ;;  %v833_v25 = vadd.f32 %v3231_v19, %v826_v21 }
 0x2e1   : > { %v834_v26 = vsel %vm779_vm2, %v833_v25, -inf }
 0x2e2   : > { %835 = vmax.xlane.f32.xlu0 %v834_v26 }
 0x36f   : > { %v836_v28 = vpop.xlane.xlu0 %835 }
 0x370   : > { %v837_v29 = vsub.f32 %v833_v25, %v836_v28 }
 0x372   : > { %v838_v30 = vmul.f32 1.442695, %v837_v29 }
 0x374   : > { %2632 = vpow2.f32 %v838_v30 }
 0x37e   : > { %v2633_v31 = vpop.eup %2632 }
 0x37f   : > { %v840_v32 = vsel %vm779_vm2, %v2633_v31, 0.0 }
 0x380   : > { %841 = vadd.xlane.f32.xlu1 %v840_v32 }
 0x391   : > { %846 = vrot.lane.b32.xlu1 %v3220_v9, %s2858_s0  ;;  %s2867_s0 = smov 48  }
 0x395   : > { %1049 = vrot.lane.b32.xlu1 %v3220_v9, %s2859_s18  ;;  %s2868_s18 = smov 104  }
 0x399   : > { %1047 = vrot.lane.b32.xlu1 %v3220_v9, %s2860_s28  ;;  %s2865_s28 = smov 16  }
 0x39d   : > { %898 = vperm.xlu1 %2620, %v697_v33  }
 0x40d   : > { %v842_v34 = vpop.xlane.xlu1 %841 }
 0x40e   : > { %2634 = vrcp.f32 %v842_v34 }
 0x411   : > { %v847_v35 = vpop.permute.xlu1 %846 }
 0x412   : > { %v853_v36 = vsel %vm851_vm3, %v847_v35, 0 }
 0x413   : > { %2389 = vmatpush3.bf16.msra.mxu0 %v853_v36  ;;  %v768_v36 = vld [vmem:[%s3521_s6 + $0x4] sm:$0xf] }
 0x414   : > { %2400 = vmatprep.subr.bf16.mxu0 %v2854_v0 }
 0x415   : > { %v1050_v37 = vpop.permute.xlu1 %1049 }
 0x416   : > { %v1055_v56 = vsel %vm779_vm2, %v1050_v37, 0 }
 0x418   : > { %v2635_v38 = vpop.eup %2634 }
 0x419   : > { %v844_v39 = vmul.f32 %v2635_v38, %v2633_v31  ;;  %v1048_v40 = vpop.permute.xlu1 %1047 }
 0x41b   : > { %v845_v42 = vpack.c.bf16 %v844_v39, %v844_v39  ;;  %v1215_v39 = vsel %vm851_vm3, %v768_v36, 0  ;;  %v773_v36 = vld [vmem:[%s3522_s7 + $0x8] sm:$0xf] }
 0x41d   : > { %2391 = vmatmul.mubr.msk.bf16.vlgmr.msra.gmra.mrb[4].mxu0 %vm779_vm2, %v845_v42  ;;  %v3251_v44 = vpop.permute.xlu1 %898 }
 0x41e   : > { %v901_v45 = vmul.f32 %v3251_v44, %v3216_v6  ;;  %2401 = vmatpush3.bf16.msra.mxu0 %v959_v43  ;;  %2402 = vmatprep.mubr.msk.bf16.mxu0 %vm2855_vm0, %v2854_v0 }
 0x41f   : > { %2412 = vmatprep.subr.bf16.mxu0 %v2854_v0 }
 0x420   : > { %v3258_v46 = vpack.c.bf16 %v901_v45, %v901_v45 }
 0x422   : > { %1161 = vrot.lane.b32.xlu0 %v3258_v46, %s2861_s22  ;;  %904 = vrot.lane.b32.xlu1 %v3258_v46, %s2862_s3  ;;  %s2871_s3 = smov 40   ;;  %s2135_s22 = sshll.u32 %s689_s2, 4  ;;  %s3473_s22 = int_to_ptr.vmem [resolvable:$true] %s2135_s22 }
 0x494   : > { %v905_v47 = vpop.permute.xlu1 %904  ;;  %v1162_v58 = vpop.permute.xlu0 %1161 }
 0x495   : > { %v910_v48 = vsel %vm851_vm3, %v905_v47, 0  ;;  %v1167_v59 = vsel %vm851_vm3, %v1162_v58, 0 }
 0x496   : > { %2395 = vmatpush3.bf16.msra.mxu1 %v910_v48 }
 0x497   : > { %2406 = vmatprep.subr.bf16.mxu1 %v2854_v0 }
 0x499   : > { %2397 = vmatmul.mubr.msk.bf16.vlgmr.msra.gmra.mrb[4].mxu1 %vm779_vm2, %v895_v49  ;;  %v2287_v49 = vld [vmem:[%s3589_s23 + $0x8] sm:$0xf] }
 0x49a   : > { %2408 = vmatprep.mubr.msk.bf16.mxu1 %vm2855_vm0, %v2854_v0  ;;  %2407 = vmatpush3.bf16.msra.mxu1 %v1005_v51  ;;  %v1263_v51 = vsel %vm851_vm3, %v772_v50, 0 }
 0x49b   : > { %2418 = vmatprep.subr.bf16.mxu1 %v2854_v0 }
 0x4f0   : > { %v889_v52 = vpop.f32.mrb[4].mxu0 }
 0x4f1   : > { %v954_v53 = vpack.c.bf16 %v889_v52, %v889_v52  ;;  %v2392_v54 = vpop.f32.mrb[5].mxu0 }
 0x4f2   : > { %v892_v55 = vpop.f32.mrb[6].mxu0 }
 0x4f3   : > { %v2393_v57 = vpop.f32.mrb[7].mxu0  ;;  %2403 = vmatmul.mubr.msk.bf16.vlgmr.msra.gmra.mrb[8].mxu0 %vm779_vm2, %v954_v53 }
 0x4f4   : > { %2413 = vmatpush3.bf16.xpose.msra.mxu0 %v1055_v56  ;;  %2414 = vmatprep.mubr.msk.bf16.mxu0 %vm2855_vm0, %v2854_v0 }
 0x4f5   : > { %2424 = vmatprep.subr.bf16.mxu0 %v2854_v0 }
 0x4fb   : > { %2415 = vmatmul.mubr.msk.bf16.vlgmr.msra.gmra.mrb[12].mxu0 %vm779_vm2, %v1048_v40 }
 0x4fc   : > { %2425 = vmatpush3.bf16.msra.mxu0 %v1167_v59  ;;  %2426 = vmatprep.mubr.msk.bf16.mxu0 %vm2855_vm0, %v2854_v0 }
 0x4fd   : > { %2436 = vmatprep.subr.bf16.mxu0 %v2854_v0 }
 0x503   : > { %2427 = vmatmul.mubr.msk.bf16.vlgmr.msra.gmra.mrb[16].mxu0 %vm779_vm2, %v2281_v60 }
 0x504   : > { %2438 = vmatprep.mubr.msk.bf16.mxu0 %vm2855_vm0, %v2854_v0  ;;  %2437 = vmatpush3.bf16.msra.mxu0 %v1263_v51 }
 0x505   : > { %2448 = vmatprep.subr.bf16.mxu0 %v2854_v0 }
 0x56c   : > { %v946_v61 = vpop.f32.mrb[4].mxu1 }
 0x56d   : > { %v952_v62 = vmul.f32 %v946_v61, %v3251_v44  ;;  %v2398_v63 = vpop.f32.mrb[5].mxu1 }
 0x56e   : > { %v949_v1 = vpop.f32.mrb[6].mxu1 }
 0x56f   : > { %v953_v2 = vpack.c.bf16 %v952_v62, %v952_v62  ;;  %v2399_v4 = vpop.f32.mrb[7].mxu1 }
 0x571   : > { %2409 = vmatmul.mubr.msk.bf16.vlgmr.msra.gmra.mrb[8].mxu1 %vm779_vm2, %v953_v2 }
 0x572   : > { %2420 = vmatprep.mubr.msk.bf16.mxu1 %vm2855_vm0, %v2854_v0 }
 0x5c6   : > { %v995_v5 = vpop.f32.mrb[8].mxu0 }
 0x5c7   : > { %v2404_v6 = vpop.f32.mrb[9].mxu0 }
 0x5c8   : > { %v998_v7 = vpop.f32.mrb[10].mxu0 }
 0x5c9   : > { %v2405_v8 = vpop.f32.mrb[11].mxu0 }
 0x5ce   : > { %v1091_v10 = vpop.f32.mrb[12].mxu0 }
 0x5cf   : > { %v1097_v11 = vmul.f32 0.35355338, %v1091_v10  ;;  %v2416_v12 = vpop.f32.mrb[13].mxu0 }
 0x5d0   : > { %v1094_v13 = vpop.f32.mrb[14].mxu0 }
 0x5d1   : > { %v2417_v14 = vpop.f32.mrb[15].mxu0  ;;  %v1098_v15 = vadd.f32 %v1097_v11, %v3231_v19 }
 0x5d3   : > { %v1099_v16 = vsel %vm779_vm2, %v1098_v15, -inf }
 0x5d4   : > { %1100 = vmax.xlane.f32.xlu1 %v1099_v16 }
 0x5d6   : > { %v1203_v17 = vpop.f32.mrb[16].mxu0 }
 0x5d7   : > { %v2428_v18 = vpop.f32.mrb[17].mxu0  ;;  %v1209_v40 = vmul.f32 %v1203_v17, %v3251_v44 }
 0x5d8   : > { %v1206_v20 = vpop.f32.mrb[18].mxu0 }
 0x5d9   : > { %v2429_v21 = vpop.f32.mrb[19].mxu0  ;;  %v1210_v41 = vpack.c.bf16 %v1209_v40, %v1209_v40 }
 0x5e5   : > { %1111 = vrot.lane.b32.xlu1 %v3220_v9, %s2863_s26 }
 0x5e9   : > { %1306 = vrot.lane.b32.xlu1 %v3220_v9, %s2864_s24 }
 0x5ed   : > { %1420 = vrot.lane.b32.xlu1 %v3258_v46, %s2865_s28  ;;  %s3593_s28 = sld [smem:[#allocation30_spill]] }
 0x644   : > { %v1041_v22 = vpop.f32.mrb[8].mxu1 }
 0x645   : > { %v1042_v23 = vadd.f32 %v1041_v22, %v995_v5  ;;  %v2410_v24 = vpop.f32.mrb[9].mxu1 }
 0x646   : > { %v1044_v25 = vpop.f32.mrb[10].mxu1 }
 0x647   : > { %v2411_v26 = vpop.f32.mrb[11].mxu1 }
 0x661   : > { %v1101_v27 = vpop.xlane.xlu1 %1100 }
 0x662   : > { %v1102_v28 = vsub.f32 %v1098_v15, %v1101_v27  ;;  %v769_v27 = vld [vmem:[%s3521_s6 + $0x8] sm:$0xf] }
 0x664   : > { %v1103_v29 = vmul.f32 1.442695, %v1102_v28 }
 0x665   : > { %v1112_v30 = vpop.permute.xlu1 %1111 }
 0x666   : > { %2636 = vpow2.f32 %v1103_v29  ;;  %v1117_v31 = vsel %vm851_vm3, %v1112_v30, 0  ;;  %v1474_v30 = vsel %vm851_vm3, %v769_v27, 0 }
 0x667   : > { %2419 = vmatpush3.bf16.msra.mxu1 %v1117_v31 }
 0x668   : > { %2430 = vmatprep.subr.bf16.mxu1 %v2854_v0 }
 0x669   : > { %v1307_v43 = vpop.permute.xlu1 %1306 }
 0x66d   : > { %v1421_v47 = vpop.permute.xlu1 %1420 }
 0x66e   : > { %v1426_v48 = vsel %vm851_vm3, %v1421_v47, 0 }
 0x670   : > { %v2637_v32 = vpop.eup %2636 }
 0x671   : > { %v1105_v33 = vsel %vm779_vm2, %v2637_v32, 0.0 }
 0x672   : > { %1106 = vadd.xlane.f32.xlu0 %v1105_v33 }
 0x688   : > { %1308 = vrot.lane.b32.xlu0 %v3220_v9, %s2866_s17  ;;  %s2870_s17 = smov 8  }
 0x6ff   : > { %v1107_v34 = vpop.xlane.xlu0 %1106 }
 0x700   : > { %2638 = vrcp.f32 %v1107_v34 }
 0x703   : > { %v1309_v42 = vpop.permute.xlu0 %1308 }
 0x704   : > { %v1314_v45 = vsel %vm779_vm2, %v1309_v42, 0 }
 0x70a   : > { %v2639_v35 = vpop.eup %2638 }
 0x70b   : > { %v1109_v37 = vmul.f32 %v2639_v35, %v2637_v32 }
 0x70d   : > { %v1110_v38 = vpack.c.bf16 %v1109_v37, %v1109_v37  ;;  %v1522_v37 = vsel %vm851_vm3, %v773_v36, 0 }
 0x70f   : > { %2421 = vmatmul.mubr.msk.bf16.vlgmr.msra.gmra.mrb[12].mxu1 %vm779_vm2, %v1110_v38 }
 0x710   : > { %2431 = vmatpush3.bf16.msra.mxu1 %v1215_v39  ;;  %2432 = vmatprep.mubr.msk.bf16.mxu1 %vm2855_vm0, %v2854_v0 }
 0x711   : > { %2442 = vmatprep.subr.bf16.mxu1 %v2854_v0 }
 0x717   : > { %2433 = vmatmul.mubr.msk.bf16.vlgmr.msra.gmra.mrb[16].mxu1 %vm779_vm2, %v1210_v41 }
 0x718   : > { %2444 = vmatprep.mubr.msk.bf16.mxu1 %vm2855_vm0, %v2854_v0 }
 0x719   : > { %2443 = vmatpush3.bf16.xpose.msra.mxu1 %v1314_v45 }
 0x71a   : > { %2454 = vmatprep.subr.bf16.mxu1 %v2854_v0 }
 0x720   : > { %2445 = vmatmul.mubr.msk.bf16.vlgmr.msra.gmra.mrb[20].mxu1 %vm779_vm2, %v1307_v43 }
 0x721   : > { %2455 = vmatpush3.bf16.msra.mxu1 %v1426_v48  ;;  %2456 = vmatprep.mubr.msk.bf16.mxu1 %vm2855_vm0, %v2854_v0 }
 0x722   : > { %2466 = vmatprep.subr.bf16.mxu1 %v2854_v0 }
 0x728   : > { %2457 = vmatmul.mubr.msk.bf16.vlgmr.msra.gmra.mrb[24].mxu1 %vm779_vm2, %v2287_v49 }
 0x729   : > { %2468 = vmatprep.mubr.msk.bf16.mxu1 %vm2855_vm0, %v2854_v0  ;;  %2467 = vmatpush3.bf16.msra.mxu1 %v1522_v37 }
 0x72a   : > { %2478 = vmatprep.subr.bf16.mxu1 %v2854_v0 }
 0x7e2   : > { %v1153_v52 = vpop.f32.mrb[12].mxu1 }
 0x7e3   : > { %v1258_v53 = vpack.c.bf16 %v1153_v52, %v1153_v52  ;;  %v2422_v54 = vpop.f32.mrb[13].mxu1 }
 0x7e4   : > { %v1156_v55 = vpop.f32.mrb[14].mxu1 }
 0x7e5   : > { %v2423_v56 = vpop.f32.mrb[15].mxu1  ;;  %2439 = vmatmul.mubr.msk.bf16.vlgmr.msra.gmra.mrb[20].mxu0 %vm779_vm2, %v1258_v53 }
 0x7e6   : > { %2450 = vmatprep.mubr.msk.bf16.mxu0 %vm2855_vm0, %v2854_v0 }
 0x7ea   : > { %v1251_v57 = vpop.f32.mrb[16].mxu1 }
 0x7eb   : > { %v1257_v58 = vadd.f32 %v1251_v57, %v1042_v23  ;;  %v2434_v59 = vpop.f32.mrb[17].mxu1 }
 0x7ec   : > { %v1254_v60 = vpop.f32.mrb[18].mxu1 }
 0x7ed   : > { %v2435_v61 = vpop.f32.mrb[19].mxu1 }
 0x7f3   : > { %v1350_v62 = vpop.f32.mrb[20].mxu1 }
 0x7f4   : > { %v1356_v63 = vmul.f32 0.35355338, %v1350_v62  ;;  %v2446_v1 = vpop.f32.mrb[21].mxu1  ;;  %v2293_v62 = vld [vmem:[%s3589_s23 + $0xc] sm:$0xf] }
 0x7f5   : > { %v1353_v2 = vpop.f32.mrb[22].mxu1 }
 0x7f6   : > { %v2447_v4 = vpop.f32.mrb[23].mxu1  ;;  %v1357_v5 = vadd.f32 %v1356_v63, %v3231_v19 }
 0x7f8   : > { %v1358_v6 = vsel %vm779_vm2, %v1357_v5, -inf }
 0x7f9   : > { %1359 = vmax.xlane.f32.xlu1 %v1358_v6  ;;  %v774_v6 = vld [vmem:[%s3522_s7 + $0xc] sm:$0xf] }
 0x7fb   : > { %v1462_v7 = vpop.f32.mrb[24].mxu1 }
 0x7fc   : > { %v2458_v8 = vpop.f32.mrb[25].mxu1  ;;  %v1468_v31 = vmul.f32 %v1462_v7, %v3251_v44  ;;  %v1781_v7 = vsel %vm851_vm3, %v774_v6, 0  ;;  %v2629_v6 = vld [vmem:[%s3530_s15 + $0x8] sm:$0xff]  }
 0x7fd   : > { %v1465_v10 = vpop.f32.mrb[26].mxu1 }
 0x7fe   : > { %v2459_v11 = vpop.f32.mrb[27].mxu1  ;;  %v1469_v32 = vpack.c.bf16 %v1468_v31, %v1468_v31 }
 0x80a   : > { %1370 = vrot.lane.b32.xlu1 %v3220_v9, %s2867_s0  ;;  %s2122_s0 = scalar_lea.sflag [#allocation4], %s3172_s25 }
 0x80e   : > { %1565 = vrot.lane.b32.xlu1 %v3220_v9, %s2868_s18  ;;  %s2770_s18 = scalar_lea.vmem %s3473_s22, 64 }
 0x80f   : > { %p2771_p7 = scmp.ne.s32.totalorder %s3473_s22, %s2770_s18 }
 0x811   : > { %p2772_p13 = pnand %p2771_p7, %p3595_p10 }
 0x813   : > { %p2773_p5 = pneg %p2772_p13 }
 0x886   : > { %v1360_v12 = vpop.xlane.xlu1 %1359 }
 0x887   : > { %v1361_v13 = vsub.f32 %v1357_v5, %v1360_v12  ;;  %v770_v12 = vld [vmem:[%s3521_s6 + $0xc] sm:$0xf] }
 0x889   : > { %v1362_v14 = vmul.f32 1.442695, %v1361_v13 }
 0x88a   : > { %v1371_v15 = vpop.permute.xlu1 %1370 }
 0x88b   : > { %2640 = vpow2.f32 %v1362_v14  ;;  %v1376_v16 = vsel %vm851_vm3, %v1371_v15, 0  ;;  %v1733_v15 = vsel %vm851_vm3, %v770_v12, 0 }
 0x88c   : > { %2449 = vmatpush3.bf16.msra.mxu0 %v1376_v16 }
 0x88d   : > { %2460 = vmatprep.subr.bf16.mxu0 %v2854_v0 }
 0x88e   : > { %v1566_v35 = vpop.permute.xlu1 %1565 }
 0x895   : > { %v2641_v17 = vpop.eup %2640 }
 0x896   : > { %v1364_v18 = vsel %vm779_vm2, %v2641_v17, 0.0 }
 0x897   : > { %1365 = vadd.xlane.f32.xlu0 %v1364_v18 }
 0x8ad   : > { %1567 = vrot.lane.b32.xlu0 %v3220_v9, %s2869_s27  ;;  %s3591_s27 = sld [smem:[#allocation29_spill]] }
 0x8b8   : > { %v1299_v20 = vpop.f32.mrb[20].mxu0 }
 0x8b9   : > { %v1305_v21 = vadd.f32 %v1299_v20, %v1257_v58  ;;  %v2440_v22 = vpop.f32.mrb[21].mxu0 }
 0x8ba   : > { %v1302_v23 = vpop.f32.mrb[22].mxu0 }
 0x8bb   : > { %v2441_v24 = vpop.f32.mrb[23].mxu0 }
 0x924   : > { %v1366_v25 = vpop.xlane.xlu0 %1365 }
 0x925   : > { %2642 = vrcp.f32 %v1366_v25 }
 0x928   : > { %v1568_v33 = vpop.permute.xlu0 %1567 }
 0x929   : > { %v1573_v34 = vsel %vm779_vm2, %v1568_v33, 0  ;;  %v2625_v33 = vld [vmem:[%s3524_s9 + $0x8] sm:$0xff]  }
 0x92f   : > { %v2643_v26 = vpop.eup %2642 }
 0x930   : > { %v1368_v28 = vmul.f32 %v2643_v26, %v2641_v17 }
 0x932   : > { %v1369_v29 = vpack.c.bf16 %v1368_v28, %v1368_v28 }
 0x934   : > { %2451 = vmatmul.mubr.msk.bf16.vlgmr.msra.gmra.mrb[24].mxu0 %vm779_vm2, %v1369_v29 }
 0x935   : > { %2461 = vmatpush3.bf16.msra.mxu0 %v1474_v30  ;;  %2462 = vmatprep.mubr.msk.bf16.mxu0 %vm2855_vm0, %v2854_v0 }
 0x936   : > { %2472 = vmatprep.subr.bf16.mxu0 %v2854_v0 }
 0x93c   : > { %2463 = vmatmul.mubr.msk.bf16.vlgmr.msra.gmra.mrb[28].mxu0 %vm779_vm2, %v1469_v32  ;;  %v2624_v32 = vld [vmem:[%s3524_s9] sm:$0xff]  }
 0x93d   : > { %2474 = vmatprep.mubr.msk.bf16.mxu0 %vm2855_vm0, %v2854_v0 }
 0x93e   : > { %2473 = vmatpush3.bf16.xpose.msra.mxu0 %v1573_v34 }
 0x93f   : > { %2484 = vmatprep.subr.bf16.mxu0 %v2854_v0 }
 0x945   : > { %2475 = vmatmul.mubr.msk.bf16.vlgmr.msra.gmra.mrb[32].mxu0 %vm779_vm2, %v1566_v35  ;;  %v2297_v35 = vld [vmem:[#allocation8] ss:$0 sm:$0xff] }
 0x946   : > { %2486 = vmatprep.mubr.msk.bf16.mxu0 %vm2855_vm0, %v2854_v0 }
 0xa07   : > { %v1412_v38 = vpop.f32.mrb[24].mxu0 }
 0xa08   : > { %v1517_v39 = vpack.c.bf16 %v1412_v38, %v1412_v38  ;;  %v2452_v40 = vpop.f32.mrb[25].mxu0 }
 0xa09   : > { %v1415_v41 = vpop.f32.mrb[26].mxu0 }
 0xa0a   : > { %v2453_v42 = vpop.f32.mrb[27].mxu0  ;;  %2469 = vmatmul.mubr.msk.bf16.vlgmr.msra.gmra.mrb[28].mxu1 %vm779_vm2, %v1517_v39 }
 0xa0b   : > { %2480 = vmatprep.mubr.msk.bf16.mxu1 %vm2855_vm0, %v2854_v0  ;;  %v2298_v42 = vld [vmem:[%s3525_s10] ss:$0 sm:$0xff] }
 0xa0f   : > { %v1510_v43 = vpop.f32.mrb[28].mxu0 }
 0xa10   : > { %v1516_v45 = vadd.f32 %v1510_v43, %v1305_v21  ;;  %v2464_v47 = vpop.f32.mrb[29].mxu0  ;;  %v1899_v43 = vunpack.c.l.bf16 %v3209_v3  ;;  %v2626_v3 = vld [vmem:[%s3528_s13] sm:$0xff]  }
 0xa11   : > { %v1513_v48 = vpop.f32.mrb[30].mxu0 }
 0xa12   : > { %v2465_v49 = vpop.f32.mrb[31].mxu0 }
 0xa18   : > { %v1609_v50 = vpop.f32.mrb[32].mxu0 }
 0xa19   : > { %v1615_v51 = vmul.f32 0.35355338, %v1609_v50  ;;  %v2476_v52 = vpop.f32.mrb[33].mxu0 }
 0xa1a   : > { %v1612_v53 = vpop.f32.mrb[34].mxu0 }
 0xa1b   : > { %v2477_v54 = vpop.f32.mrb[35].mxu0  ;;  %v1616_v55 = vadd.f32 %v1615_v51, %v3231_v19 }
 0xa1d   : > { %v1617_v56 = vsel %vm779_vm2, %v1616_v55, -inf }
 0xa1e   : > { %1618 = vmax.xlane.f32.xlu1 %v1617_v56 }
 0xa2f   : > { %1679 = vrot.lane.b32.xlu1 %v3258_v46, %s2870_s17  ;;  %s2317_s17 = sshll.u32 %s2994_s1, 6  ;;  %s2872_s1 = smov [#allocation10]  }
 0xa30   : > { %s2774_s5 = sshll.u32 %s2872_s1, 4  ;;  %s2775_s5 = int_to_ptr.vmem [resolvable:$false] %s2774_s5 }
 0xa31   : > { %p2777_p9 = scmp.lt.s32.totalorder %s3473_s22, %s2775_s5 }
 0xaab   : > { %v1619_v57 = vpop.xlane.xlu1 %1618 }
 0xaac   : > { %v1620_v58 = vsub.f32 %v1616_v55, %v1619_v57 }
 0xaae   : > { %v1621_v59 = vmul.f32 1.442695, %v1620_v58  ;;  %v2627_v58 = vld [vmem:[%s3528_s13 + $0x8] sm:$0xff]  }
 0xaaf   : > { %v1680_v60 = vpop.permute.xlu1 %1679 }
 0xab0   : > { %2644 = vpow2.f32 %v1621_v59  ;;  %v1685_v61 = vsel %vm851_vm3, %v1680_v60, 0 }
 0xab1   : > { %2485 = vmatpush3.bf16.msra.mxu0 %v1685_v61 }
 0xab2   : > { %2496 = vmatprep.subr.bf16.mxu0 %v2854_v0 }
 0xab4   : > { %2487 = vmatmul.mubr.msk.bf16.vlgmr.msra.gmra.mrb[36].mxu0 %vm779_vm2, %v2293_v62 }
 0xab5   : > { %2498 = vmatprep.mubr.msk.bf16.mxu0 %vm2855_vm0, %v2854_v0  ;;  %2497 = vmatpush3.bf16.msra.mxu0 %v1781_v7  ;;  %v2630_v7 = vld [vmem:[%s3530_s15 + $0x10] sm:$0xff]  }
 0xab6   : > { %2510 = vmatprep.subr.bf16.mxu0 %v2854_v0 }
 0xaba   : > { %v2645_v19 = vpop.eup %2644 }
 0xabb   : > { %v1623_v46 = vsel %vm779_vm2, %v2645_v19, 0.0 }
 0xabc   : > { %1624 = vadd.xlane.f32.xlu0 %v1623_v46 }
 0xad2   : > { %1629 = vrot.lane.b32.xlu0 %v3220_v9, %s2871_s3 }
 0xadd   : > { %v1558_v63 = vpop.f32.mrb[28].mxu1 }
 0xade   : > { %v1564_v1 = vadd.f32 %v1558_v63, %v1516_v45  ;;  %v2470_v2 = vpop.f32.mrb[29].mxu1  ;;  %v2303_v63 = vld [vmem:[%s3527_s12] ss:$0 sm:$0xff] }
 0xadf   : > { %v1561_v4 = vpop.f32.mrb[30].mxu1 }
 0xae0   : > { %v2471_v5 = vpop.f32.mrb[31].mxu1 }
 0xae1   : > { %v2628_v5 = vld [vmem:[%s3530_s15] sm:$0xff]  }
 0xb49   : > { %v1625_v8 = vpop.xlane.xlu0 %1624 }
 0xb4a   : > { %2646 = vrcp.f32 %v1625_v8  ;;  %v2631_v8 = vld [vmem:[%s3530_s15 + $0x18] sm:$0xff]  }
 0xb4d   : > { %v1630_v10 = vpop.permute.xlu0 %1629 }
 0xb4e   : > { %v1635_v11 = vsel %vm851_vm3, %v1630_v10, 0  ;;  %v2304_v10 = vld [vmem:[%s3529_s14] ss:$0 sm:$0xff] }
 0xb4f   : > { %2479 = vmatpush3.bf16.msra.mxu1 %v1635_v11 }
 0xb50   : > { %2490 = vmatprep.subr.bf16.mxu1 %v2854_v0 }
 0xb54   : > { %v2647_v9 = vpop.eup %2646 }
 0xb55   : > { %v1627_v13 = vmul.f32 %v2647_v9, %v2645_v19  ;;  %v2302_v19 = vld [vmem:[%s3526_s11] ss:$0 sm:$0xff] }
 0xb57   : > { %v1628_v14 = vpack.c.bf16 %v1627_v13, %v1627_v13 }
 0xb59   : > { %2481 = vmatmul.mubr.msk.bf16.vlgmr.msra.gmra.mrb[32].mxu1 %vm779_vm2, %v1628_v14 }
 0xb5a   : > { %2491 = vmatpush3.bf16.msra.mxu1 %v1733_v15  ;;  %2492 = vmatprep.mubr.msk.bf16.mxu1 %vm2855_vm0, %v2854_v0 }
 0xb5b   : > { %2502 = vmatprep.subr.bf16.mxu1 %v2854_v0 }
 0xb87   : > { %v1721_v16 = vpop.f32.mrb[36].mxu0 }
 0xb88   : > { %v1727_v17 = vmul.f32 %v1721_v16, %v3251_v44  ;;  %v2488_v18 = vpop.f32.mrb[37].mxu0 }
 0xb89   : > { %v1724_v20 = vpop.f32.mrb[38].mxu0 }
 0xb8a   : > { %v1728_v21 = vpack.c.bf16 %v1727_v17, %v1727_v17  ;;  %v2489_v22 = vpop.f32.mrb[39].mxu0 }
 0xb8c   : > { %2493 = vmatmul.mubr.msk.bf16.vlgmr.msra.gmra.mrb[36].mxu1 %vm779_vm2, %v1728_v21  ;;  %v2308_v21 = vld [vmem:[%s3590_s20] ss:$0 sm:$0xff]  ;;  %s3471_s20 = scalar_lea.hbm %s3594_s16, %s2317_s17 }
 0xb8d   : > { %2506 = vmatprep.mubr.msk.bf16.mxu1 %vm2855_vm0, %v2854_v0  ;;  %2503 = vmatpush3.bf16.msra.mxu1 %v2624_v32 }
 0xb8e   : > { %2504 = vmatprep.subr.bf16.mxu1 %v2854_v0 }
 0xb91   : > { %2505 = vmatpush3.bf16.msra.mxu1 %v2625_v33 }
 0xb92   : > { %2518 = vmatprep.subr.bf16.mxu1 %v2854_v0 }
 0xc2c   : > { %v1671_v23 = vpop.f32.mrb[32].mxu1 }
 0xc2d   : > { %v1776_v24 = vpack.c.bf16 %v1671_v23, %v1671_v23  ;;  %v2482_v25 = vpop.f32.mrb[33].mxu1 }
 0xc2e   : > { %v1674_v26 = vpop.f32.mrb[34].mxu1 }
 0xc2f   : > { %v2483_v27 = vpop.f32.mrb[35].mxu1  ;;  %2499 = vmatmul.mubr.msk.bf16.vlgmr.msra.gmra.mrb[40].mxu0 %vm779_vm2, %v1776_v24 }
 0xc30   : > { %2514 = vmatprep.mubr.msk.bf16.mxu0 %vm2855_vm0, %v2854_v0  ;;  %2511 = vmatpush3.bf16.msra.mxu0 %v2626_v3 }
 0xc31   : > { %2512 = vmatprep.subr.bf16.mxu0 %v2854_v0 }
 0xc34   : > { %2513 = vmatpush3.bf16.msra.mxu0 %v2627_v58 }
 0xc5f   : > { %v1769_v44 = vpop.f32.mrb[36].mxu1 }
 0xc60   : > { %v1775_v28 = vadd.f32 %v1769_v44, %v1564_v1  ;;  %v2494_v29 = vpop.f32.mrb[37].mxu1 }
 0xc61   : > { %v1772_v30 = vpop.f32.mrb[38].mxu1 }
 0xc62   : > { %v2495_v31 = vpop.f32.mrb[39].mxu1 }
 0xd02   : > { %v1817_v34 = vpop.f32.mrb[40].mxu0 }
 0xd03   : > { %v1823_v36 = vadd.f32 %v1817_v34, %v1775_v28  ;;  %v2500_v37 = vpop.f32.mrb[41].mxu0 }
 0xd04   : > { %v1820_v38 = vpop.f32.mrb[42].mxu0  ;;  %v2314_v37 = vld [vmem:[%s3591_s27] ss:$0 sm:$0xff]  ;;  %s2776_s27 = scalar_lea.vmem %s2775_s5, 128 }
 0xd05   : > { %v1831_v39 = vadd.f32 %v2297_v35, %v1823_v36  ;;  %v2501_v40 = vpop.f32.mrb[43].mxu0  ;;  %p2778_p1 = scmp.lt.s32.totalorder %s2776_s27, %s2770_s18 }
 0xd07   : > { %v1836_v41 = vpack.c.bf16 %v1831_v39, %v1831_v39  ;;  %v2315_v39 = vld [vmem:[%s3593_s28] ss:$0 sm:$0xff]  ;;  %p2779_p4 = por %p2778_p1, %p2777_p9 }
 0xd09   : > { %2507 = vmatmul.mubr.msk.bf16.vlgmr.msra.gmra.mrb[40].mxu1 %vm723_vm1, %v1836_v41  ;;  %p2780_p2 = pnand %p2779_p4, %p2773_p5 }
 0xd0a   : > { %2526 = vmatprep.mubr.msk.bf16.mxu1 %vm2855_vm0, %v2854_v0  ;;  %2519 = vmatpush3.bf16.msra.mxu1 %v2628_v5 }
 0xd0b   : > { %2520 = vmatprep.subr.bf16.mxu1 %v2854_v0 }
 0xd0e   : > { %2521 = vmatpush3.bf16.msra.mxu1 %v2629_v6 }
 0xd0f   : > { %2522 = vmatprep.subr.bf16.mxu1 %v2854_v0 }
 0xd12   : > { %2523 = vmatpush3.bf16.msra.mxu1 %v2630_v7 }
 0xd13   : > { %2524 = vmatprep.subr.bf16.mxu1 %v2854_v0 }
 0xd16   : > { %2525 = vmatpush3.bf16.msra.mxu1 %v2631_v8 }
 0xddc   : > { %v1893_v45 = vpop.f32.mrb[40].mxu1 }
 0xddd   : > { %v1894_v47 = vadd.f32 %v2298_v42, %v1893_v45  ;;  %v2508_v48 = vpop.f32.mrb[41].mxu1 }
 0xdde   : > { %v1896_v49 = vpop.f32.mrb[42].mxu1 }
 0xddf   : > { %v2509_v50 = vpop.f32.mrb[43].mxu1  ;;  %v1900_v51 = vadd.f32 %v1899_v43, %v1894_v47 }
 0xde1   : > { %v1903_v52 = vsel %vm723_vm1, %v1900_v51, 0.0 }
 0xde2   : > { %1904 = vadd.xlane.f32.xlu1 %v1903_v52 }
 0xe6f   : > { %v1905_v53 = vpop.xlane.xlu1 %1904 }
 0xe70   : > { %v1907_v54 = vmul.f32 0.03125, %v1905_v53 }
 0xe72   : > { %v1908_v55 = vsub.f32 %v1900_v51, %v1907_v54 }
 0xe74   : > { %v1909_v56 = vmul.f32 %v1908_v55, %v1908_v55 }
 0xe76   : > { %v1910_v57 = vsel %vm723_vm1, %v1909_v56, 0.0 }
 0xe77   : > { %1911 = vadd.xlane.f32.xlu0 %v1910_v57 }
 0xf04   : > { %v1912_v59 = vpop.xlane.xlu0 %1911 }
 0xf05   : > { %v1913_v60 = vmul.f32 0.03125, %v1912_v59 }
 0xf07   : > { %v1914_v61 = vadd.f32 1e-12, %v1913_v60 }
 0xf09   : > { %2648 = vrsqrt.f32 %v1914_v61 }
 0xf13   : > { %v2649_v62 = vpop.eup %2648 }
 0xf14   : > { %v1916_v46 = vmul.f32 %v2649_v62, %v1908_v55 }
 0xf16   : > { %v1923_v1 = vmul.f32 %v2302_v19, %v1916_v46 }
 0xf18   : > { %v1930_v2 = vadd.f32 %v2303_v63, %v1923_v1 }
 0xf1a   : > { %v1935_v4 = vpack.c.bf16 %v1930_v2, %v1930_v2 }
 0xf1c   : > { %2515 = vmatmul.mubr.msk.bf16.vlgmr.msra.gmra.mrb[44].mxu0 %vm723_vm1, %v1935_v4 }
 0xfef   : > { %v1992_v11 = vpop.f32.mrb[44].mxu0 }
 0xff0   : > { %v1993_v9 = vadd.f32 %v2304_v10, %v1992_v11  ;;  %v2516_v12 = vpop.f32.mrb[45].mxu0 }
 0xff1   : > { %v1995_v13 = vpop.f32.mrb[46].mxu0 }
 0xff2   : > { %v2000_v14 = vmul.f32 0.70710677, %v1993_v9  ;;  %v2517_v15 = vpop.f32.mrb[47].mxu0  ;;  %v1998_v17 = vmul.f32 0.5, %v1993_v9 }
 0xff4   : > { %2650 = verf.f32 %v2000_v14 }
 0xffe   : > { %v2651_v16 = vpop.eup %2650 }
 0xfff   : > { %v2002_v18 = vadd.f32 1.0, %v2651_v16 }
0x1001   : > { %v2003_v0 = vmul.f32 %v2002_v18, %v1998_v17 }
0x1003   : > { %v2012_v20 = vpack.c.bf16 %v2003_v0, %v2003_v0 }
0x1005   : > { %2527 = vmatmul.mubr.msk.bf16.vlgmr.msra.gmra.mrb[44].mxu1 %vm2044_vm4, %v2012_v20 }
0x10d8   : > { %v2082_v22 = vpop.f32.mrb[44].mxu1 }
0x10d9   : > { %v2083_v23 = vadd.f32 %v2308_v21, %v2082_v22  ;;  %v2528_v24 = vpop.f32.mrb[45].mxu1 }
0x10da   : > { %v2085_v25 = vpop.f32.mrb[46].mxu1 }
0x10db   : > { %v2529_v26 = vpop.f32.mrb[47].mxu1  ;;  %v2088_v27 = vadd.f32 %v2083_v23, %v1930_v2 }
0x10dd   : > { %v2091_v44 = vsel %vm723_vm1, %v2088_v27, 0.0 }
0x10de   : > { %2092 = vadd.xlane.f32.xlu1 %v2091_v44 }
0x116b   : > { %v2093_v28 = vpop.xlane.xlu1 %2092 }
0x116c   : > { %v2094_v29 = vmul.f32 0.03125, %v2093_v28 }
0x116e   : > { %v2095_v30 = vsub.f32 %v2088_v27, %v2094_v29 }
0x1170   : > { %v2096_v31 = vmul.f32 %v2095_v30, %v2095_v30 }
0x1172   : > { %v2097_v32 = vsel %vm723_vm1, %v2096_v31, 0.0 }
0x1173   : > { %2098 = vadd.xlane.f32.xlu0 %v2097_v32 }
0x1200   : > { %v2099_v33 = vpop.xlane.xlu0 %2098 }
0x1201   : > { %v2100_v34 = vmul.f32 0.03125, %v2099_v33 }
0x1203   : > { %v2101_v35 = vadd.f32 1e-12, %v2100_v34 }
0x1205   : > { %2652 = vrsqrt.f32 %v2101_v35 }
0x120f   : > { %v2653_v36 = vpop.eup %2652 }
0x1210   : > { %v2103_v38 = vmul.f32 %v2653_v36, %v2095_v30 }
0x1212   : > { %v2110_v40 = vmul.f32 %v2314_v37, %v2103_v38 }
0x1214   : > { %v2117_v41 = vadd.f32 %v2315_v39, %v2110_v40 }
0x1216   : > { %v2118_v42 = vpack.c.bf16 %v2117_v41, %v2117_v41 }
0x1218   : > { %2120 = vst.msk [vmem:[%s689_s2] sm:$0xf] %vm2119_vm5, %v2118_v42 }
0x1219   : > { %2783 = shalt.err (!%p2780_p2)
}
0x121a   : > { %s2784_s25 = scalar_lea.hbm %s3471_s20, 64  ;;  %s2788_s28 = scalar_lea.hbm %s3594_s16, 128 }
0x121b   : > { %p2785_p6 = scmp.ne.s32.totalorder %s3471_s20, %s2784_s25  ;;  %p2789_p8 = scmp.lt.u32.totalorder %s3471_s20, %s3594_s16 }
0x121c   : > { %p2790_p12 = scmp.lt.u32.totalorder %s2788_s28, %s2784_s25  ;;  %p2792_p7 = scmp.lt.u32.totalorder %s2784_s25, %s3471_s20 }
0x121d   : > { %p2786_p11 = pnand %p2785_p6, %p3595_p10 }
0x121e   : > { %p2791_p3 = por %p2790_p12, %p2789_p8 }
0x121f   : > { %p2787_p0 = pneg %p2786_p11 }
0x1220   : > { %p2793_p13 = por %p2792_p7, %p2791_p3 }
0x1222   : > { %p2794_p5 = pnand %p2793_p13, %p2787_p0 }
0x1224   : > { %2797 = shalt.err (!%p2794_p5)
}
0x1225   : > { %2542 = dma.vmem_to_hbm [thread:$0]  (%p3595_p10), %s3473_s22, 64, %s3471_s20, %s2122_s0  }
0x1226 PF: > { %s3596_s3 = sld [smem:[#allocation16_spill]]  ;;  %s3597_s19 = sld [smem:[#allocation18_spill]] }
0x1227   : > { %p3599_p1 = scmp.ge.s32.totalorder %s2848_s21, 2 }
0x122c   : > { %s2147_s18 = sand.u32 1, %s3596_s3   ;;  %p3598_p9 = scmp.ne.s32.totalorder %s3597_s19, 0 }
0x122d   : > { %s2148_s1 = scalar_lea.sflag [#allocation4], %s2147_s18 }
0x122e   : > { %p2559_p4 = pnand %p3599_p1, %p3598_p9 }
0x1230   : > { %2831 = dma.done.wait (!%p2559_p4), %s2148_s1, 64  }
0x1231   : > { %2833 = vsyncadd (!%p2559_p4), %s2148_s1, 4294967232  ;;  %s3600_s21 = sld [smem:[#allocation19_spill]]  ;;  %s3601_s5 = sld [smem:[#allocation17_spill]] }
0x1232   : > { %s3602_s20 = sld [smem:[#allocation20_spill]]  ;;  %s3603_s0 = smov %s2840_s30 }
0x1237   : > { %p36_p2 = scmp.ge.s32.totalorder %s3600_s21, 4   ;;  %s3604_s30 = smov %s3601_s5 }
0x1239   :  { %38 = sbr.rel (!%p36_p2) target bundleno = 19 (0x13), region = 168 }
0x1240   :  { %2153 = vsyncpa [#allocation3], 1 }
0x1241   :  { %2155 = vsyncpa [#allocation3 + $0x1], 1 }
0x1242   :  { %2156 = vsyncpa [#allocation6], 1 }
0x1243   :  { %2158 = vsyncpa [#allocation6 + $0x1], 1 }
0x1244   :  { %2159 = vsyncpa [#allocation9], 1 }
0x1245   :  { %2160 = vsyncpa [#allocation4], 1 }
0x1246   :  { %2162 = vsyncpa [#allocation4 + $0x1], 1 }

// kernel: tpu_custom_call.1
= control target key start
LH: loop header
LB: loop body
LE: loop exit
PB: predicated region body
PF: predicated region fallthrough
CT: control target
= control target key end

     0   :  { %s3515_s0 = inlined_call_operand.hbm [shape: bf16[2,8,32], index: 0, kind: input, shape index: {}]   ;;  %s3516_s1 = inlined_call_operand.hbm [shape: f32[2,1,8], index: 1, kind: input, shape index: {}]   ;;  %s3517_s2 = inlined_call_operand.vmem [shape: f32[2,8,1], index: 2, kind: input, shape index: {}]   ;;  %s3518_s3 = inlined_call_operand.vmem [shape: bf16[4,8,8], index: 3, kind: input, shape index: {}]   ;;  %s3519_s4 = inlined_call_operand.vmem [shape: bf16[32,128], index: 4, kind: input, shape index: {}]   ;;  %s3520_s5 = inlined_call_operand.hbm [shape: f32[1,128], index: 5, kind: input, shape index: {}]   ;;  %s3521_s6 = inlined_call_operand.vmem [shape: bf16[32,32], index: 6, kind: input, shape index: {}]   ;;  %s3522_s7 = inlined_call_operand.vmem [shape: bf16[32,32], index: 7, kind: input, shape index: {}]   ;;  %s3523_s8 = inlined_call_operand.hbm [shape: f32[1,32], index: 8, kind: input, shape index: {}]   ;;  %s3524_s9 = inlined_call_operand.vmem [shape: bf16[32,32], index: 9, kind: input, shape index: {}]   ;;  %s3525_s10 = inlined_call_operand.vmem [shape: f32[1,32], index: 10, kind: input, shape index: {}]   ;;  %s3526_s11 = inlined_call_operand.vmem [shape: f32[1,32], index: 11, kind: input, shape index: {}]   ;;  %s3527_s12 = inlined_call_operand.vmem [shape: f32[1,32], index: 12, kind: input, shape index: {}]   ;;  %s3528_s13 = inlined_call_operand.vmem [shape: bf16[32,64], index: 13, kind: input, shape index: {}]   ;;  %s3529_s14 = inlined_call_operand.vmem [shape: f32[1,64], index: 14, kind: input, shape index: {}]   ;;  %s3530_s15 = inlined_call_operand.vmem [shape: bf16[64,32], index: 15, kind: input, shape index: {}]   ;;  %s3531_s16 = inlined_call_operand.vmem [shape: f32[1,32], index: 16, kind: input, shape index: {}]   ;;  %s3532_s17 = inlined_call_operand.vmem [shape: f32[1,32], index: 17, kind: input, shape index: {}]   ;;  %s3533_s18 = inlined_call_operand.vmem [shape: f32[1,32], index: 18, kind: input, shape index: {}]   ;;  %s3534_s19 = inlined_call_operand.hbm [shape: bf16[2,8,32], index: 19, kind: output, shape index: {}]  }
   0x1   :  { %3551 = sst [smem:[#allocation22_spill]] %s3515_s0 }
   0x2   :  { %3552 = sst [smem:[#allocation23_spill]] %s3516_s1 }
   0x3   :  { %3553 = sst [smem:[#allocation24_spill]] %s3517_s2 }
   0x4   :  { %3554 = sst [smem:[#allocation25_spill]] %s3518_s3 }
   0x5   :  { %3555 = sst [smem:[#allocation26_spill]] %s3520_s5 }
   0x6   :  { %3556 = sst [smem:[#allocation27_spill]] %s3523_s8 }
   0x7   :  { %3557 = sst [smem:[#allocation28_spill]] %s3531_s16 }
   0x8   :  { %3558 = sst [smem:[#allocation29_spill]] %s3532_s17 }
   0x9   :  { %3559 = sst [smem:[#allocation30_spill]] %s3533_s18 }
   0xa   :  { %3560 = sst [smem:[#allocation31_spill]] %s3534_s19 }
   0xb   :  { %24 = vsyncpa [#allocation3], 0 }
   0xc   :  { %26 = vsyncpa [#allocation3 + $0x1], 0 }
   0xd   :  { %27 = vsyncpa [#allocation6], 0 }
   0xe   :  { %29 = vsyncpa [#allocation6 + $0x1], 0 }
   0xf   :  { %30 = vsyncpa [#allocation9], 0 }
  0x10   :  { %31 = vsyncpa [#allocation4], 0 }
  0x11   :  { %33 = vsyncpa [#allocation4 + $0x1], 0  ;;  %s2973_s0 = smov 0   ;;  %s2975_s30 = smov 0  }
  0x12   :  { %s2977_s20 = smov 0   ;;  %s2979_s21 = smov 0  }
  0x13 LB: > { %3561 = sst [smem:[#allocation16_spill]] %s2836_s0  ;;  %s2994_s1 = sadd.s32 4294967295, %s2848_s21   ;;  %s2848_s21 = sphi %s2979_s21, %s3600_s21   ;;  %s2844_s20 = sphi %s2977_s20, %s3602_s20   ;;  %s2840_s30 = sphi %s2975_s30, %s3604_s30   ;;  %s2836_s0 = sphi %s2973_s0, %s3603_s0  }
  0x14   : > { %3562 = sst [smem:[#allocation17_spill]] %s2844_s20  ;;  %s2256_s22 = sadd.s32 4294967294, %s2848_s21  }
  0x15   : > { %p59_p0 = scmp.ne.s32.totalorder %s2840_s30, %s2836_s0  ;;  %p3541_p1 = scmp.eq.s32.totalorder %s2994_s1, 0 }
  0x16   : > { %p477_p3 = scmp.eq.s32.totalorder %s2256_s22, 1  ;;  %p2257_p5 = scmp.ge.s32.totalorder %s2848_s21, 1 }
  0x17   : > { %p3003_p4 = por %p3541_p1, %p59_p0  ;;  %p484_p7 = scmp.lt.s32.totalorder %s2848_s21, 3 }
  0x18   : > { %p3008_p6 = por %p477_p3, %p59_p0  ;;  %s2850_s25 = smov [#allocation7]  }
  0x19   : > { %s3563_s2 = scalar_select %p3003_p4, 1, 0 }
  0x1a   : > { %s3564_s23 = scalar_select %p3008_p6, 1, 0 }
  0x1b   : > { %p3013_p8 = pnand %p2257_p5, %p484_p7  ;;  %s503_s3 = sshll.u32 %s2850_s25, 4  ;;  %s504_s3 = int_to_ptr.vmem [resolvable:$true] %s503_s3 }
  0x1c   : > { %3565 = sst [smem:[#allocation18_spill]] %s3564_s23  ;;  %s2851_s26 = smov [#allocation8]  }
  0x1d   : > { %s3566_s24 = scalar_select %p3013_p8, 1, 0 }
  0x1e   : > { %p2544_p10 = pneg %p3013_p8  ;;  %s520_s27 = sshll.u32 %s2851_s26, 4  ;;  %s3026_s27 = int_to_ptr.vmem [resolvable:$true] %s520_s27 }
  0x1f   : > { %s3029_s29 = sadd.s32 1, %s2848_s21   ;;  %s3569_s5 = sld [smem:[#allocation26_spill]] }
  0x20   : > { %p3022_p11 = pnand %p2544_p10, %p3541_p1  ;;  %3568 = sst [smem:[#allocation19_spill]] %s3029_s29 }
  0x22   : > { %p2656_p13 = pneg %p3022_p11 }
  0x25   : > { %s2654_s0 = scalar_lea.hbm %s3569_s5, 16 }
  0x26   : > { %p2655_p12 = scmp.ne.s32.totalorder %s3569_s5, %s2654_s0  ;;  %p2661_p5 = scmp.lt.u32.totalorder %s2654_s0, %s3569_s5 }
  0x28   : > { %p2657_p0 = pnand %p2656_p13, %p2655_p12 }
  0x2a   : > { %p2658_p3 = pneg %p2657_p0 }
  0x2c   : > { %p2663_p7 = pnand %p2661_p5, %p2658_p3 }
  0x2e   : > { %2666 = shalt.err (!%p2663_p7)
}
  0x2f   : > { %s2667_s22 = scalar_lea.vmem %s504_s3, 16  ;;  %s2674_s18 = scalar_lea.vmem %s504_s3, 32 }
  0x30   : > { %p2668_p10 = scmp.ne.s32.totalorder %s504_s3, %s2667_s22  ;;  %p2675_p2 = scmp.lt.s32.totalorder %s504_s3, %s504_s3 }
  0x31   : > { %p2676_p6 = scmp.lt.s32.totalorder %s2674_s18, %s2667_s22 }
  0x32   : > { %p2670_p9 = pnand %p2668_p10, %p2656_p13 }
  0x33   : > { %p2677_p4 = por %p2676_p6, %p2675_p2 }
  0x34   : > { %p2671_p1 = pneg %p2670_p9 }
  0x36   : > { %p2678_p8 = pnand %p2677_p4, %p2671_p1 }
  0x38   : > { %2681 = shalt.err (!%p2678_p8)
}
  0x39   : > { %2547 = dma.hbm_to_vmem [thread:$0]  (!%p3022_p11), %s3569_s5, 16, %s504_s3, [#allocation6]  }
  0x3a   : > { %s3570_s8 = sld [smem:[#allocation27_spill]] }
  0x40   : > { %s2682_s25 = scalar_lea.hbm %s3570_s8, 16 }
  0x41   : > { %p2683_p9 = scmp.ne.s32.totalorder %s3570_s8, %s2682_s25  ;;  %p2689_p4 = scmp.lt.u32.totalorder %s2682_s25, %s3570_s8 }
  0x43   : > { %p2685_p2 = pnand %p2683_p9, %p2656_p13 }
  0x45   : > { %p2686_p1 = pneg %p2685_p2 }
  0x47   : > { %p2691_p6 = pnand %p2689_p4, %p2686_p1 }
  0x49   : > { %2694 = shalt.err (!%p2691_p6)
}
  0x4a   : > { %s2695_s3 = scalar_lea.vmem %s3026_s27, 16  ;;  %s2702_s16 = scalar_lea.vmem %s3026_s27, 32 }
  0x4b   : > { %p2696_p8 = scmp.ne.s32.totalorder %s3026_s27, %s2695_s3  ;;  %p2703_p3 = scmp.lt.s32.totalorder %s3026_s27, %s3026_s27 }
  0x4c   : > { %p2704_p5 = scmp.lt.s32.totalorder %s2702_s16, %s2695_s3 }
  0x4d   : > { %p2698_p12 = pnand %p2696_p8, %p2656_p13 }
  0x4e   : > { %p2705_p7 = por %p2704_p5, %p2703_p3 }
  0x4f   : > { %p2699_p0 = pneg %p2698_p12 }
  0x51   : > { %p2706_p10 = pnand %p2705_p7, %p2699_p0 }
  0x53   : > { %2709 = shalt.err (!%p2706_p10)
}
  0x54   : > { %2550 = dma.hbm_to_vmem [thread:$0]  (!%p3022_p11), %s3570_s8, 16, %s3026_s27, [#allocation9]  }
  0x55   : > { %s3571_s0 = ssub.s32 %s2848_s21, %s3029_s29  ;;  %s46_s28 = sadd.s32 1, %s2844_s20 }
  0x56   : > { %p44_p13 = scmp.eq.s32.totalorder %s3571_s0, 0  ;;  %p53_p9 = scmp.ne.s32.totalorder %s2844_s20, %s2840_s30 }
  0x57   : > { %p54_p2 = scmp.eq.s32.totalorder %s2848_s21, 0  ;;  %p3573_p4 = scmp.eq.s32.totalorder %s2994_s1, 1 }
  0x58   : > { %s3089_s23 = scalar_select %p44_p13, %s2844_s20, %s46_s28  }
  0x59   : > { %p55_p1 = por %p54_p2, %p53_p9  ;;  %p3093_p6 = por %p3573_p4, %p53_p9 }
  0x5a   : > { %3572 = sst [smem:[#allocation20_spill]] %s3089_s23  ;;  %p2564_p8 = scmp.lt.s32.totalorder %s2848_s21, 2 }
  0x5b   : > { %s3574_s25 = scalar_select %p3093_p6, 1, 0 }
  0x5c   : > { %s3099_s26 = sand.u32 1, %s2844_s20   ;;  %s2262_s22 = sshll.u32 %s2848_s21, 6 }
  0x5d   : > { %3575 = sst [smem:[#allocation21_spill]] %s3574_s25  ;;  %s2261_s27 = sshll.u32 %s3099_s26, 2 }
  0x5e   : > { %s3576_s16 = sld [smem:[#allocation22_spill]]  ;;  %s565_s17 = scalar_lea.vmem [#allocation2], %s2261_s27 }
  0x5f   : > { %s572_s0 = sshll.u32 %s565_s17, 4  ;;  %p3110_p11 = pnand %p2564_p8, %p55_p1  ;;  %s3108_s0 = int_to_ptr.vmem [resolvable:$true] %s572_s0 }
  0x60   : > { %s562_s8 = scalar_lea.sflag [#allocation3], %s3099_s26 }
  0x61   : > { %p2712_p0 = pneg %p3110_p11 }
  0x64   : > { %s3106_s19 = scalar_lea.hbm %s3576_s16, %s2262_s22  ;;  %s2715_s18 = scalar_lea.hbm %s3576_s16, 128 }
  0x65   : > { %s2710_s23 = scalar_lea.hbm %s3106_s19, 64  ;;  %p2716_p7 = scmp.lt.u32.totalorder %s3106_s19, %s3576_s16 }
  0x66   : > { %p2711_p12 = scmp.ne.s32.totalorder %s3106_s19, %s2710_s23  ;;  %p2717_p10 = scmp.lt.u32.totalorder %s2715_s18, %s2710_s23 }
  0x67   : > { %p2719_p9 = scmp.lt.u32.totalorder %s2710_s23, %s3106_s19 }
  0x68   : > { %p2713_p3 = pnand %p2712_p0, %p2711_p12  ;;  %p2718_p13 = por %p2717_p10, %p2716_p7 }
  0x6a   : > { %p2714_p5 = pneg %p2713_p3  ;;  %p2720_p2 = por %p2719_p9, %p2718_p13 }
  0x6c   : > { %p2721_p1 = pnand %p2720_p2, %p2714_p5 }
  0x6e   : > { %2724 = shalt.err (!%p2721_p1)
}
  0x6f   : > { %s2725_s5 = scalar_lea.vmem %s3108_s0, 64  ;;  %s2852_s27 = smov [#allocation2]  }
  0x70   : > { %p2726_p4 = scmp.ne.s32.totalorder %s3108_s0, %s2725_s5  ;;  %s2730_s22 = sshll.u32 %s2852_s27, 4  ;;  %s2731_s22 = int_to_ptr.vmem [resolvable:$false] %s2730_s22 }
  0x71   : > { %s2732_s3 = scalar_lea.vmem %s2731_s22, 128  ;;  %p2733_p3 = scmp.lt.s32.totalorder %s3108_s0, %s2731_s22 }
  0x72   : > { %p2728_p8 = pnand %p2726_p4, %p2712_p0  ;;  %p2734_p7 = scmp.lt.s32.totalorder %s2732_s3, %s2725_s5 }
  0x74   : > { %p2729_p12 = pneg %p2728_p8  ;;  %p2735_p10 = por %p2734_p7, %p2733_p3 }
  0x76   : > { %p2736_p13 = pnand %p2735_p10, %p2729_p12 }
  0x78   : > { %2739 = shalt.err (!%p2736_p13)
}
  0x79   : > { %2554 = dma.hbm_to_vmem [thread:$0]  (!%p3110_p11), %s3106_s19, 64, %s3108_s0, %s562_s8  }
  0x7a   : > { %s2263_s23 = sshll.u32 %s2848_s21, 4  ;;  %s582_s18 = scalar_lea.vmem [#allocation5], %s3099_s26 }
  0x7b   : > { %s589_s17 = sshll.u32 %s582_s18, 4  ;;  %s3578_s20 = sld [smem:[#allocation23_spill]]  ;;  %s590_s17 = int_to_ptr.vmem [resolvable:$true] %s589_s17 }
  0x7c   : > { %s3580_s5 = sand.u32 1, %s2848_s21  }
  0x7d   : > { %s580_s3 = scalar_lea.sflag [#allocation6], %s3580_s5 }
  0x81   : > { %s3579_s29 = smov %s3578_s20  ;;  %s3146_s22 = scalar_lea.hbm %s3578_s20, %s2263_s23 }
  0x82   : > { %s2740_s25 = scalar_lea.hbm %s3146_s22, 16  ;;  %s2745_s19 = scalar_lea.hbm %s3579_s29, 32 }
  0x83   : > { %p2741_p5 = scmp.ne.s32.totalorder %s3146_s22, %s2740_s25  ;;  %p2746_p1 = scmp.lt.u32.totalorder %s3146_s22, %s3579_s29 }
  0x84   : > { %p2747_p4 = scmp.lt.u32.totalorder %s2745_s19, %s2740_s25  ;;  %p2749_p12 = scmp.lt.u32.totalorder %s2740_s25, %s3146_s22 }
  0x85   : > { %p2743_p9 = pnand %p2741_p5, %p2712_p0 }
  0x86   : > { %p2748_p8 = por %p2747_p4, %p2746_p1 }
  0x87   : > { %p2744_p2 = pneg %p2743_p9 }
  0x88   : > { %p2750_p3 = por %p2749_p12, %p2748_p8 }
  0x8a   : > { %p2751_p7 = pnand %p2750_p3, %p2744_p2 }
  0x8c   : > { %2754 = shalt.err (!%p2751_p7)
}
  0x8d   : > { %s2755_s0 = scalar_lea.vmem %s590_s17, 16  ;;  %s2853_s23 = smov [#allocation5]  }
  0x8e   : > { %p2756_p10 = scmp.ne.s32.totalorder %s590_s17, %s2755_s0  ;;  %s2760_s18 = sshll.u32 %s2853_s23, 4  ;;  %s2761_s18 = int_to_ptr.vmem [resolvable:$false] %s2760_s18 }
  0x8f   : > { %s2762_s27 = scalar_lea.vmem %s2761_s18, 32  ;;  %p2763_p9 = scmp.lt.s32.totalorder %s590_s17, %s2761_s18 }
  0x90   : > { %p2758_p13 = pnand %p2756_p10, %p2712_p0  ;;  %p2764_p6 = scmp.lt.s32.totalorder %s2762_s27, %s2755_s0 }
  0x92   : > { %p2759_p5 = pneg %p2758_p13  ;;  %p2765_p1 = por %p2764_p6, %p2763_p9 }
  0x94   : > { %p2766_p4 = pnand %p2765_p1, %p2759_p5 }
  0x96   : > { %2769 = shalt.err (!%p2766_p4)
}
  0x97   : > { %2557 = dma.hbm_to_vmem [thread:$0]  (!%p3110_p11), %s3146_s22, 16, %s590_s17, %s580_s3  }
  0x98   : > { %p3581_p2 = scmp.ne.s32.totalorder %s3566_s24, 0 }
  0x99   : > { %s3172_s25 = sand.u32 (!%p3581_p2), 1, %s2840_s30   ;;  %p3582_p6 = scmp.ne.s32.totalorder (!%p3581_p2), %s3563_s2, 0 }
  0x9a   : > { %605 = sbr.rel (%p3581_p2) target bundleno = 4646 (0x1226), region = 96  ;;  %s2265_s5 = sshll.u32 (!%p3581_p2), %s3172_s25, 2 }
  0x9b   : > { %s608_s8 = scalar_lea.sflag (!%p3581_p2), [#allocation3], %s3172_s25  ;;  %s611_s26 = scalar_lea.vmem (!%p3581_p2), [#allocation2], %s2265_s5 }
  0xa1   : > { %2815 = dma.done.wait (%p3582_p6), %s608_s8, 64  }
  0xa2   : > { %2817 = vsyncadd (%p3582_p6), %s608_s8, 4294967232  ;;  %s616_s24 = sand.u32 1, %s2994_s1   ;;  %s619_s17 = scalar_lea.vmem [#allocation5], %s3172_s25 }
  0xa3   : > { %s617_s28 = scalar_lea.sflag [#allocation6], %s616_s24 }
  0xa4   : > { %2819 = dma.done.wait (%p3582_p6), %s617_s28, 16  }
  0xa5   : > { %2821 = vsyncadd (%p3582_p6), %s617_s28, 4294967280  ;;  %p3583_p11 = scmp.eq.s32.totalorder %s2994_s1, 0 }
  0xa7   : > { %2823 = dma.done.wait (%p3583_p11), [#allocation6], 16   ;;  %p3584_p0 = pmov %p3583_p11 }
  0xa9   : > { %2825 = vsyncadd (%p3584_p0), [#allocation6], 4294967280  ;;  %p3585_p8 = pmov %p3584_p0 }
  0xaa   : > { %p3586_p12 = pmov %p3584_p0 }
  0xab   : > { %2827 = dma.done.wait (%p3585_p8), [#allocation9], 16  }
  0xac   : > { %2829 = vsyncadd (%p3586_p12), [#allocation9], 4294967280  ;;  %v2854_v0 = vmov 0.0   ;;  %vm2855_vm0 = vmmov 0   ;;  %v2622_v1 = vld [vmem:[%s3519_s4] sm:$0xff]   ;;  %v2623_v2 = vld [vmem:[%s3519_s4 + $0x8] sm:$0xff]   ;;  %v828_v13 = vlaneseq }
  0xad   : > { %2374 = vmatprep.subr.bf16.mxu0 %v2854_v0  ;;  %2378 = vmatprep.mubr.msk.bf16.mxu0 %vm2855_vm0, %v2854_v0  ;;  %vm723_vm1 = vcmask 261120   ;;  %v3209_v3 = vld [vmem:[%s611_s26] sm:$0xf]  ;;  %v2270_v4 = vld [vmem:[#allocation7] ss:$0 sm:$0xff]  ;;  %s2856_s16 = smov 96  }
  0xae   : > { %2382 = vmatprep.subr.bf16.mxu1 %v2854_v0  ;;  %2384 = vmatprep.mubr.msk.bf16.mxu1 %vm2855_vm0, %v2854_v0  ;;  %vm779_vm2 = vcmask 64512   ;;  %v696_v14 = vld [vmem:[%s619_s17] sm:$0x1]  ;;  %v829_v16 = vshrl.u32 %v828_v13, 7  ;;  %v2857_v27 = vmov 0   ;;  %p690_p3 = scmp.lt.s32.totalorder %s2994_s1, 1 }
  0xaf   : > { %2375 = vmatpush3.bf16.msra.mxu0 %v2622_v1  ;;  %v698_v15 = vsub.f32 1.0, %v696_v14  ;;  %2620 = vset.pattern.permute.xlu1 %v2857_v27  ;;  %s2858_s0 = smov 64   ;;  %s2859_s18 = smov 88   ;;  %vm851_vm3 = vcmask 1043456   ;;  %v771_v41 = vld [vmem:[%s3522_s7] sm:$0xf] }
  0xb0   : > { %2376 = vmatprep.subr.bf16.mxu0 %v2854_v0  ;;  %v830_v18 = vsub.s32 0, %v829_v16  ;;  %2621 = vset.pattern.permute.xlu0 %v2857_v27  ;;  %s691_s20 = scalar_select %p690_p3, %s2994_s1, 1  ;;  %v959_v43 = vsel %vm851_vm3, %v771_v41, 0  ;;  %v767_v50 = vld [vmem:[%s3521_s6] sm:$0xf]  ;;  %vm2044_vm4 = vcmask 523264  }
  0xb1   : > { %v699_v17 = vmul.f32 -10000.0, %v698_v15  ;;  %s3587_s26 = sld [smem:[#allocation24_spill]]  ;;  %s2860_s28 = smov 120   ;;  %v1005_v51 = vsel %vm851_vm3, %v767_v50, 0  ;;  %v772_v50 = vld [vmem:[%s3522_s7 + $0x4] sm:$0xf] }
  0xb2   : > { %s2269_s23 = sshll.u32 %s691_s20, 3  ;;  %s2861_s22 = smov 24   ;;  %vm2119_vm5 = vcmask 257024  }
  0xb3   : > { %2377 = vmatpush3.bf16.msra.mxu0 %v2623_v2  ;;  %v3231_v19 = vrot.slane %v699_v17, %v830_v18  ;;  %s2862_s3 = smov 32   ;;  %s3588_s20 = sld [smem:[#allocation25_spill]] }
  0xb4   : > { %2388 = vmatprep.subr.bf16.mxu0 %v2854_v0  ;;  %s2866_s17 = smov 80   ;;  %s2869_s27 = smov 72  }
  0xb5   : > { %s3592_s8 = sld [smem:[#allocation21_spill]]  ;;  %s689_s2 = scalar_lea.vmem [#allocation10], %s2265_s5 }
  0xb6   : > { %2379 = vmatmul.mubr.msk.bf16.vlgmr.msra.gmra.mrb[0].mxu0 %vm723_vm1, %v3209_v3 }
  0xb7   : > { %2390 = vmatprep.mubr.msk.bf16.mxu0 %vm2855_vm0, %v2854_v0  ;;  %s693_s24 = scalar_lea.vmem %s3587_s26, %s2269_s23  ;;  %s2863_s26 = smov 56  }
  0xb8   : > { %v697_v33 = vld [vmem:[%s693_s24] sm:$0xff]  ;;  %s2864_s24 = smov 112  }
  0xb9   : > { %s3589_s23 = smov %s3588_s20  ;;  %v895_v49 = vld [vmem:[%s3588_s20] sm:$0xf]  ;;  %s3590_s20 = sld [smem:[#allocation28_spill]] }
  0xba   : > { %v2281_v60 = vld [vmem:[%s3589_s23 + $0x4] sm:$0xf] }
  0xbb   : > { %p3595_p10 = scmp.ne.s32.totalorder %s3592_s8, 0 }
 0x189   : > { %v761_v5 = vpop.f32.mrb[0].mxu0 }
 0x18a   : > { %v3216_v6 = vadd.f32 %v2270_v4, %v761_v5  ;;  %v2380_v7 = vpop.f32.mrb[1].mxu0 }
 0x18b   : > { %v764_v8 = vpop.f32.mrb[2].mxu0 }
 0x18c   : > { %v3220_v9 = vpack.c.bf16 %v3216_v6, %v3216_v6  ;;  %v2381_v10 = vpop.f32.mrb[3].mxu0 }
 0x18e   : > { %777 = vrot.lane.b32.xlu0 %v3220_v9, %s2856_s16  ;;  %s3594_s16 = sld [smem:[#allocation31_spill]] }
 0x200   : > { %v778_v11 = vpop.permute.xlu0 %777 }
 0x201   : > { %v784_v12 = vsel %vm779_vm2, %v778_v11, 0 }
 0x202   : > { %2383 = vmatpush3.bf16.xpose.msra.mxu1 %v784_v12 }
 0x203   : > { %2394 = vmatprep.subr.bf16.mxu1 %v2854_v0 }
 0x209   : > { %2385 = vmatmul.mubr.msk.bf16.vlgmr.msra.gmra.mrb[0].mxu1 %vm779_vm2, %v3220_v9 }
 0x20a   : > { %2396 = vmatprep.mubr.msk.bf16.mxu1 %vm2855_vm0, %v2854_v0 }
 0x2dc   : > { %v820_v20 = vpop.f32.mrb[0].mxu1 }
 0x2dd   : > { %v826_v21 = vmul.f32 0.35355338, %v820_v20  ;;  %v2386_v22 = vpop.f32.mrb[1].mxu1 }
 0x2de   : > { %v823_v23 = vpop.f32.mrb[2].mxu1 }
 0x2df   : > { %v2387_v24 = vpop.f32.mrb[3].mxu1  ;;  %v833_v25 = vadd.f32 %v3231_v19, %v826_v21 }
 0x2e1   : > { %v834_v26 = vsel %vm779_vm2, %v833_v25, -inf }
 0x2e2   : > { %835 = vmax.xlane.f32.xlu0 %v834_v26 }
 0x36f   : > { %v836_v28 = vpop.xlane.xlu0 %835 }
 0x370   : > { %v837_v29 = vsub.f32 %v833_v25, %v836_v28 }
 0x372   : > { %v838_v30 = vmul.f32 1.442695, %v837_v29 }
 0x374   : > { %2632 = vpow2.f32 %v838_v30 }
 0x37e   : > { %v2633_v31 = vpop.eup %2632 }
 0x37f   : > { %v840_v32 = vsel %vm779_vm2, %v2633_v31, 0.0 }
 0x380   : > { %841 = vadd.xlane.f32.xlu1 %v840_v32 }
 0x391   : > { %846 = vrot.lane.b32.xlu1 %v3220_v9, %s2858_s0  ;;  %s2867_s0 = smov 48  }
 0x395   : > { %1049 = vrot.lane.b32.xlu1 %v3220_v9, %s2859_s18  ;;  %s2868_s18 = smov 104  }
 0x399   : > { %1047 = vrot.lane.b32.xlu1 %v3220_v9, %s2860_s28  ;;  %s2865_s28 = smov 16  }
 0x39d   : > { %898 = vperm.xlu1 %2620, %v697_v33  }
 0x40d   : > { %v842_v34 = vpop.xlane.xlu1 %841 }
 0x40e   : > { %2634 = vrcp.f32 %v842_v34 }
 0x411   : > { %v847_v35 = vpop.permute.xlu1 %846 }
 0x412   : > { %v853_v36 = vsel %vm851_vm3, %v847_v35, 0 }
 0x413   : > { %2389 = vmatpush3.bf16.msra.mxu0 %v853_v36  ;;  %v768_v36 = vld [vmem:[%s3521_s6 + $0x4] sm:$0xf] }
 0x414   : > { %2400 = vmatprep.subr.bf16.mxu0 %v2854_v0 }
 0x415   : > { %v1050_v37 = vpop.permute.xlu1 %1049 }
 0x416   : > { %v1055_v56 = vsel %vm779_vm2, %v1050_v37, 0 }
 0x418   : > { %v2635_v38 = vpop.eup %2634 }
 0x419   : > { %v844_v39 = vmul.f32 %v2635_v38, %v2633_v31  ;;  %v1048_v40 = vpop.permute.xlu1 %1047 }
 0x41b   : > { %v845_v42 = vpack.c.bf16 %v844_v39, %v844_v39  ;;  %v1215_v39 = vsel %vm851_vm3, %v768_v36, 0  ;;  %v773_v36 = vld [vmem:[%s3522_s7 + $0x8] sm:$0xf] }
 0x41d   : > { %2391 = vmatmul.mubr.msk.bf16.vlgmr.msra.gmra.mrb[4].mxu0 %vm779_vm2, %v845_v42  ;;  %v3251_v44 = vpop.permute.xlu1 %898 }
 0x41e   : > { %v901_v45 = vmul.f32 %v3251_v44, %v3216_v6  ;;  %2401 = vmatpush3.bf16.msra.mxu0 %v959_v43  ;;  %2402 = vmatprep.mubr.msk.bf16.mxu0 %vm2855_vm0, %v2854_v0 }
 0x41f   : > { %2412 = vmatprep.subr.bf16.mxu0 %v2854_v0 }
 0x420   : > { %v3258_v46 = vpack.c.bf16 %v901_v45, %v901_v45 }
 0x422   : > { %1161 = vrot.lane.b32.xlu0 %v3258_v46, %s2861_s22  ;;  %904 = vrot.lane.b32.xlu1 %v3258_v46, %s2862_s3  ;;  %s2871_s3 = smov 40   ;;  %s2135_s22 = sshll.u32 %s689_s2, 4  ;;  %s3473_s22 = int_to_ptr.vmem [resolvable:$true] %s2135_s22 }
 0x494   : > { %v905_v47 = vpop.permute.xlu1 %904  ;;  %v1162_v58 = vpop.permute.xlu0 %1161 }
 0x495   : > { %v910_v48 = vsel %vm851_vm3, %v905_v47, 0  ;;  %v1167_v59 = vsel %vm851_vm3, %v1162_v58, 0 }
 0x496   : > { %2395 = vmatpush3.bf16.msra.mxu1 %v910_v48 }
 0x497   : > { %2406 = vmatprep.subr.bf16.mxu1 %v2854_v0 }
 0x499   : > { %2397 = vmatmul.mubr.msk.bf16.vlgmr.msra.gmra.mrb[4].mxu1 %vm779_vm2, %v895_v49  ;;  %v2287_v49 = vld [vmem:[%s3589_s23 + $0x8] sm:$0xf] }
 0x49a   : > { %2408 = vmatprep.mubr.msk.bf16.mxu1 %vm2855_vm0, %v2854_v0  ;;  %2407 = vmatpush3.bf16.msra.mxu1 %v1005_v51  ;;  %v1263_v51 = vsel %vm851_vm3, %v772_v50, 0 }
 0x49b   : > { %2418 = vmatprep.subr.bf16.mxu1 %v2854_v0 }
 0x4f0   : > { %v889_v52 = vpop.f32.mrb[4].mxu0 }
 0x4f1   : > { %v954_v53 = vpack.c.bf16 %v889_v52, %v889_v52  ;;  %v2392_v54 = vpop.f32.mrb[5].mxu0 }
 0x4f2   : > { %v892_v55 = vpop.f32.mrb[6].mxu0 }
 0x4f3   : > { %v2393_v57 = vpop.f32.mrb[7].mxu0  ;;  %2403 = vmatmul.mubr.msk.bf16.vlgmr.msra.gmra.mrb[8].mxu0 %vm779_vm2, %v954_v53 }
 0x4f4   : > { %2413 = vmatpush3.bf16.xpose.msra.mxu0 %v1055_v56  ;;  %2414 = vmatprep.mubr.msk.bf16.mxu0 %vm2855_vm0, %v2854_v0 }
 0x4f5   : > { %2424 = vmatprep.subr.bf16.mxu0 %v2854_v0 }
 0x4fb   : > { %2415 = vmatmul.mubr.msk.bf16.vlgmr.msra.gmra.mrb[12].mxu0 %vm779_vm2, %v1048_v40 }
 0x4fc   : > { %2425 = vmatpush3.bf16.msra.mxu0 %v1167_v59  ;;  %2426 = vmatprep.mubr.msk.bf16.mxu0 %vm2855_vm0, %v2854_v0 }
 0x4fd   : > { %2436 = vmatprep.subr.bf16.mxu0 %v2854_v0 }
 0x503   : > { %2427 = vmatmul.mubr.msk.bf16.vlgmr.msra.gmra.mrb[16].mxu0 %vm779_vm2, %v2281_v60 }
 0x504   : > { %2438 = vmatprep.mubr.msk.bf16.mxu0 %vm2855_vm0, %v2854_v0  ;;  %2437 = vmatpush3.bf16.msra.mxu0 %v1263_v51 }
 0x505   : > { %2448 = vmatprep.subr.bf16.mxu0 %v2854_v0 }
 0x56c   : > { %v946_v61 = vpop.f32.mrb[4].mxu1 }
 0x56d   : > { %v952_v62 = vmul.f32 %v946_v61, %v3251_v44  ;;  %v2398_v63 = vpop.f32.mrb[5].mxu1 }
 0x56e   : > { %v949_v1 = vpop.f32.mrb[6].mxu1 }
 0x56f   : > { %v953_v2 = vpack.c.bf16 %v952_v62, %v952_v62  ;;  %v2399_v4 = vpop.f32.mrb[7].mxu1 }
 0x571   : > { %2409 = vmatmul.mubr.msk.bf16.vlgmr.msra.gmra.mrb[8].mxu1 %vm779_vm2, %v953_v2 }
 0x572   : > { %2420 = vmatprep.mubr.msk.bf16.mxu1 %vm2855_vm0, %v2854_v0 }
 0x5c6   : > { %v995_v5 = vpop.f32.mrb[8].mxu0 }
 0x5c7   : > { %v2404_v6 = vpop.f32.mrb[9].mxu0 }
 0x5c8   : > { %v998_v7 = vpop.f32.mrb[10].mxu0 }
 0x5c9   : > { %v2405_v8 = vpop.f32.mrb[11].mxu0 }
 0x5ce   : > { %v1091_v10 = vpop.f32.mrb[12].mxu0 }
 0x5cf   : > { %v1097_v11 = vmul.f32 0.35355338, %v1091_v10  ;;  %v2416_v12 = vpop.f32.mrb[13].mxu0 }
 0x5d0   : > { %v1094_v13 = vpop.f32.mrb[14].mxu0 }
 0x5d1   : > { %v2417_v14 = vpop.f32.mrb[15].mxu0  ;;  %v1098_v15 = vadd.f32 %v1097_v11, %v3231_v19 }
 0x5d3   : > { %v1099_v16 = vsel %vm779_vm2, %v1098_v15, -inf }
 0x5d4   : > { %1100 = vmax.xlane.f32.xlu1 %v1099_v16 }
 0x5d6   : > { %v1203_v17 = vpop.f32.mrb[16].mxu0 }
 0x5d7   : > { %v2428_v18 = vpop.f32.mrb[17].mxu0  ;;  %v1209_v40 = vmul.f32 %v1203_v17, %v3251_v44 }
 0x5d8   : > { %v1206_v20 = vpop.f32.mrb[18].mxu0 }
 0x5d9   : > { %v2429_v21 = vpop.f32.mrb[19].mxu0  ;;  %v1210_v41 = vpack.c.bf16 %v1209_v40, %v1209_v40 }
 0x5e5   : > { %1111 = vrot.lane.b32.xlu1 %v3220_v9, %s2863_s26 }
 0x5e9   : > { %1306 = vrot.lane.b32.xlu1 %v3220_v9, %s2864_s24 }
 0x5ed   : > { %1420 = vrot.lane.b32.xlu1 %v3258_v46, %s2865_s28  ;;  %s3593_s28 = sld [smem:[#allocation30_spill]] }
 0x644   : > { %v1041_v22 = vpop.f32.mrb[8].mxu1 }
 0x645   : > { %v1042_v23 = vadd.f32 %v1041_v22, %v995_v5  ;;  %v2410_v24 = vpop.f32.mrb[9].mxu1 }
 0x646   : > { %v1044_v25 = vpop.f32.mrb[10].mxu1 }
 0x647   : > { %v2411_v26 = vpop.f32.mrb[11].mxu1 }
 0x661   : > { %v1101_v27 = vpop.xlane.xlu1 %1100 }
 0x662   : > { %v1102_v28 = vsub.f32 %v1098_v15, %v1101_v27  ;;  %v769_v27 = vld [vmem:[%s3521_s6 + $0x8] sm:$0xf] }
 0x664   : > { %v1103_v29 = vmul.f32 1.442695, %v1102_v28 }
 0x665   : > { %v1112_v30 = vpop.permute.xlu1 %1111 }
 0x666   : > { %2636 = vpow2.f32 %v1103_v29  ;;  %v1117_v31 = vsel %vm851_vm3, %v1112_v30, 0  ;;  %v1474_v30 = vsel %vm851_vm3, %v769_v27, 0 }
 0x667   : > { %2419 = vmatpush3.bf16.msra.mxu1 %v1117_v31 }
 0x668   : > { %2430 = vmatprep.subr.bf16.mxu1 %v2854_v0 }
 0x669   : > { %v1307_v43 = vpop.permute.xlu1 %1306 }
 0x66d   : > { %v1421_v47 = vpop.permute.xlu1 %1420 }
 0x66e   : > { %v1426_v48 = vsel %vm851_vm3, %v1421_v47, 0 }
 0x670   : > { %v2637_v32 = vpop.eup %2636 }
 0x671   : > { %v1105_v33 = vsel %vm779_vm2, %v2637_v32, 0.0 }
 0x672   : > { %1106 = vadd.xlane.f32.xlu0 %v1105_v33 }
 0x688   : > { %1308 = vrot.lane.b32.xlu0 %v3220_v9, %s2866_s17  ;;  %s2870_s17 = smov 8  }
 0x6ff   : > { %v1107_v34 = vpop.xlane.xlu0 %1106 }
 0x700   : > { %2638 = vrcp.f32 %v1107_v34 }
 0x703   : > { %v1309_v42 = vpop.permute.xlu0 %1308 }
 0x704   : > { %v1314_v45 = vsel %vm779_vm2, %v1309_v42, 0 }
 0x70a   : > { %v2639_v35 = vpop.eup %2638 }
 0x70b   : > { %v1109_v37 = vmul.f32 %v2639_v35, %v2637_v32 }
 0x70d   : > { %v1110_v38 = vpack.c.bf16 %v1109_v37, %v1109_v37  ;;  %v1522_v37 = vsel %vm851_vm3, %v773_v36, 0 }
 0x70f   : > { %2421 = vmatmul.mubr.msk.bf16.vlgmr.msra.gmra.mrb[12].mxu1 %vm779_vm2, %v1110_v38 }
 0x710   : > { %2431 = vmatpush3.bf16.msra.mxu1 %v1215_v39  ;;  %2432 = vmatprep.mubr.msk.bf16.mxu1 %vm2855_vm0, %v2854_v0 }
 0x711   : > { %2442 = vmatprep.subr.bf16.mxu1 %v2854_v0 }
 0x717   : > { %2433 = vmatmul.mubr.msk.bf16.vlgmr.msra.gmra.mrb[16].mxu1 %vm779_vm2, %v1210_v41 }
 0x718   : > { %2444 = vmatprep.mubr.msk.bf16.mxu1 %vm2855_vm0, %v2854_v0 }
 0x719   : > { %2443 = vmatpush3.bf16.xpose.msra.mxu1 %v1314_v45 }
 0x71a   : > { %2454 = vmatprep.subr.bf16.mxu1 %v2854_v0 }
 0x720   : > { %2445 = vmatmul.mubr.msk.bf16.vlgmr.msra.gmra.mrb[20].mxu1 %vm779_vm2, %v1307_v43 }
 0x721   : > { %2455 = vmatpush3.bf16.msra.mxu1 %v1426_v48  ;;  %2456 = vmatprep.mubr.msk.bf16.mxu1 %vm2855_vm0, %v2854_v0 }
 0x722   : > { %2466 = vmatprep.subr.bf16.mxu1 %v2854_v0 }
 0x728   : > { %2457 = vmatmul.mubr.msk.bf16.vlgmr.msra.gmra.mrb[24].mxu1 %vm779_vm2, %v2287_v49 }
 0x729   : > { %2468 = vmatprep.mubr.msk.bf16.mxu1 %vm2855_vm0, %v2854_v0  ;;  %2467 = vmatpush3.bf16.msra.mxu1 %v1522_v37 }
 0x72a   : > { %2478 = vmatprep.subr.bf16.mxu1 %v2854_v0 }
 0x7e2   : > { %v1153_v52 = vpop.f32.mrb[12].mxu1 }
 0x7e3   : > { %v1258_v53 = vpack.c.bf16 %v1153_v52, %v1153_v52  ;;  %v2422_v54 = vpop.f32.mrb[13].mxu1 }
 0x7e4   : > { %v1156_v55 = vpop.f32.mrb[14].mxu1 }
 0x7e5   : > { %v2423_v56 = vpop.f32.mrb[15].mxu1  ;;  %2439 = vmatmul.mubr.msk.bf16.vlgmr.msra.gmra.mrb[20].mxu0 %vm779_vm2, %v1258_v53 }
 0x7e6   : > { %2450 = vmatprep.mubr.msk.bf16.mxu0 %vm2855_vm0, %v2854_v0 }
 0x7ea   : > { %v1251_v57 = vpop.f32.mrb[16].mxu1 }
 0x7eb   : > { %v1257_v58 = vadd.f32 %v1251_v57, %v1042_v23  ;;  %v2434_v59 = vpop.f32.mrb[17].mxu1 }
 0x7ec   : > { %v1254_v60 = vpop.f32.mrb[18].mxu1 }
 0x7ed   : > { %v2435_v61 = vpop.f32.mrb[19].mxu1 }
 0x7f3   : > { %v1350_v62 = vpop.f32.mrb[20].mxu1 }
 0x7f4   : > { %v1356_v63 = vmul.f32 0.35355338, %v1350_v62  ;;  %v2446_v1 = vpop.f32.mrb[21].mxu1  ;;  %v2293_v62 = vld [vmem:[%s3589_s23 + $0xc] sm:$0xf] }
 0x7f5   : > { %v1353_v2 = vpop.f32.mrb[22].mxu1 }
 0x7f6   : > { %v2447_v4 = vpop.f32.mrb[23].mxu1  ;;  %v1357_v5 = vadd.f32 %v1356_v63, %v3231_v19 }
 0x7f8   : > { %v1358_v6 = vsel %vm779_vm2, %v1357_v5, -inf }
 0x7f9   : > { %1359 = vmax.xlane.f32.xlu1 %v1358_v6  ;;  %v774_v6 = vld [vmem:[%s3522_s7 + $0xc] sm:$0xf] }
 0x7fb   : > { %v1462_v7 = vpop.f32.mrb[24].mxu1 }
 0x7fc   : > { %v2458_v8 = vpop.f32.mrb[25].mxu1  ;;  %v1468_v31 = vmul.f32 %v1462_v7, %v3251_v44  ;;  %v1781_v7 = vsel %vm851_vm3, %v774_v6, 0  ;;  %v2629_v6 = vld [vmem:[%s3530_s15 + $0x8] sm:$0xff]  }
 0x7fd   : > { %v1465_v10 = vpop.f32.mrb[26].mxu1 }
 0x7fe   : > { %v2459_v11 = vpop.f32.mrb[27].mxu1  ;;  %v1469_v32 = vpack.c.bf16 %v1468_v31, %v1468_v31 }
 0x80a   : > { %1370 = vrot.lane.b32.xlu1 %v3220_v9, %s2867_s0  ;;  %s2122_s0 = scalar_lea.sflag [#allocation4], %s3172_s25 }
 0x80e   : > { %1565 = vrot.lane.b32.xlu1 %v3220_v9, %s2868_s18  ;;  %s2770_s18 = scalar_lea.vmem %s3473_s22, 64 }
 0x80f   : > { %p2771_p7 = scmp.ne.s32.totalorder %s3473_s22, %s2770_s18 }
 0x811   : > { %p2772_p13 = pnand %p2771_p7, %p3595_p10 }
 0x813   : > { %p2773_p5 = pneg %p2772_p13 }
 0x886   : > { %v1360_v12 = vpop.xlane.xlu1 %1359 }
 0x887   : > { %v1361_v13 = vsub.f32 %v1357_v5, %v1360_v12  ;;  %v770_v12 = vld [vmem:[%s3521_s6 + $0xc] sm:$0xf] }
 0x889   : > { %v1362_v14 = vmul.f32 1.442695, %v1361_v13 }
 0x88a   : > { %v1371_v15 = vpop.permute.xlu1 %1370 }
 0x88b   : > { %2640 = vpow2.f32 %v1362_v14  ;;  %v1376_v16 = vsel %vm851_vm3, %v1371_v15, 0  ;;  %v1733_v15 = vsel %vm851_vm3, %v770_v12, 0 }
 0x88c   : > { %2449 = vmatpush3.bf16.msra.mxu0 %v1376_v16 }
 0x88d   : > { %2460 = vmatprep.subr.bf16.mxu0 %v2854_v0 }
 0x88e   : > { %v1566_v35 = vpop.permute.xlu1 %1565 }
 0x895   : > { %v2641_v17 = vpop.eup %2640 }
 0x896   : > { %v1364_v18 = vsel %vm779_vm2, %v2641_v17, 0.0 }
 0x897   : > { %1365 = vadd.xlane.f32.xlu0 %v1364_v18 }
 0x8ad   : > { %1567 = vrot.lane.b32.xlu0 %v3220_v9, %s2869_s27  ;;  %s3591_s27 = sld [smem:[#allocation29_spill]] }
 0x8b8   : > { %v1299_v20 = vpop.f32.mrb[20].mxu0 }
 0x8b9   : > { %v1305_v21 = vadd.f32 %v1299_v20, %v1257_v58  ;;  %v2440_v22 = vpop.f32.mrb[21].mxu0 }
 0x8ba   : > { %v1302_v23 = vpop.f32.mrb[22].mxu0 }
 0x8bb   : > { %v2441_v24 = vpop.f32.mrb[23].mxu0 }
 0x924   : > { %v1366_v25 = vpop.xlane.xlu0 %1365 }
 0x925   : > { %2642 = vrcp.f32 %v1366_v25 }
 0x928   : > { %v1568_v33 = vpop.permute.xlu0 %1567 }
 0x929   : > { %v1573_v34 = vsel %vm779_vm2, %v1568_v33, 0  ;;  %v2625_v33 = vld [vmem:[%s3524_s9 + $0x8] sm:$0xff]  }
 0x92f   : > { %v2643_v26 = vpop.eup %2642 }
 0x930   : > { %v1368_v28 = vmul.f32 %v2643_v26, %v2641_v17 }
 0x932   : > { %v1369_v29 = vpack.c.bf16 %v1368_v28, %v1368_v28 }
 0x934   : > { %2451 = vmatmul.mubr.msk.bf16.vlgmr.msra.gmra.mrb[24].mxu0 %vm779_vm2, %v1369_v29 }
 0x935   : > { %2461 = vmatpush3.bf16.msra.mxu0 %v1474_v30  ;;  %2462 = vmatprep.mubr.msk.bf16.mxu0 %vm2855_vm0, %v2854_v0 }
 0x936   : > { %2472 = vmatprep.subr.bf16.mxu0 %v2854_v0 }
 0x93c   : > { %2463 = vmatmul.mubr.msk.bf16.vlgmr.msra.gmra.mrb[28].mxu0 %vm779_vm2, %v1469_v32  ;;  %v2624_v32 = vld [vmem:[%s3524_s9] sm:$0xff]  }
 0x93d   : > { %2474 = vmatprep.mubr.msk.bf16.mxu0 %vm2855_vm0, %v2854_v0 }
 0x93e   : > { %2473 = vmatpush3.bf16.xpose.msra.mxu0 %v1573_v34 }
 0x93f   : > { %2484 = vmatprep.subr.bf16.mxu0 %v2854_v0 }
 0x945   : > { %2475 = vmatmul.mubr.msk.bf16.vlgmr.msra.gmra.mrb[32].mxu0 %vm779_vm2, %v1566_v35  ;;  %v2297_v35 = vld [vmem:[#allocation8] ss:$0 sm:$0xff] }
 0x946   : > { %2486 = vmatprep.mubr.msk.bf16.mxu0 %vm2855_vm0, %v2854_v0 }
 0xa07   : > { %v1412_v38 = vpop.f32.mrb[24].mxu0 }
 0xa08   : > { %v1517_v39 = vpack.c.bf16 %v1412_v38, %v1412_v38  ;;  %v2452_v40 = vpop.f32.mrb[25].mxu0 }
 0xa09   : > { %v1415_v41 = vpop.f32.mrb[26].mxu0 }
 0xa0a   : > { %v2453_v42 = vpop.f32.mrb[27].mxu0  ;;  %2469 = vmatmul.mubr.msk.bf16.vlgmr.msra.gmra.mrb[28].mxu1 %vm779_vm2, %v1517_v39 }
 0xa0b   : > { %2480 = vmatprep.mubr.msk.bf16.mxu1 %vm2855_vm0, %v2854_v0  ;;  %v2298_v42 = vld [vmem:[%s3525_s10] ss:$0 sm:$0xff] }
 0xa0f   : > { %v1510_v43 = vpop.f32.mrb[28].mxu0 }
 0xa10   : > { %v1516_v45 = vadd.f32 %v1510_v43, %v1305_v21  ;;  %v2464_v47 = vpop.f32.mrb[29].mxu0  ;;  %v1899_v43 = vunpack.c.l.bf16 %v3209_v3  ;;  %v2626_v3 = vld [vmem:[%s3528_s13] sm:$0xff]  }
 0xa11   : > { %v1513_v48 = vpop.f32.mrb[30].mxu0 }
 0xa12   : > { %v2465_v49 = vpop.f32.mrb[31].mxu0 }
 0xa18   : > { %v1609_v50 = vpop.f32.mrb[32].mxu0 }
 0xa19   : > { %v1615_v51 = vmul.f32 0.35355338, %v1609_v50  ;;  %v2476_v52 = vpop.f32.mrb[33].mxu0 }
 0xa1a   : > { %v1612_v53 = vpop.f32.mrb[34].mxu0 }
 0xa1b   : > { %v2477_v54 = vpop.f32.mrb[35].mxu0  ;;  %v1616_v55 = vadd.f32 %v1615_v51, %v3231_v19 }
 0xa1d   : > { %v1617_v56 = vsel %vm779_vm2, %v1616_v55, -inf }
 0xa1e   : > { %1618 = vmax.xlane.f32.xlu1 %v1617_v56 }
 0xa2f   : > { %1679 = vrot.lane.b32.xlu1 %v3258_v46, %s2870_s17  ;;  %s2317_s17 = sshll.u32 %s2994_s1, 6  ;;  %s2872_s1 = smov [#allocation10]  }
 0xa30   : > { %s2774_s5 = sshll.u32 %s2872_s1, 4  ;;  %s2775_s5 = int_to_ptr.vmem [resolvable:$false] %s2774_s5 }
 0xa31   : > { %p2777_p9 = scmp.lt.s32.totalorder %s3473_s22, %s2775_s5 }
 0xaab   : > { %v1619_v57 = vpop.xlane.xlu1 %1618 }
 0xaac   : > { %v1620_v58 = vsub.f32 %v1616_v55, %v1619_v57 }
 0xaae   : > { %v1621_v59 = vmul.f32 1.442695, %v1620_v58  ;;  %v2627_v58 = vld [vmem:[%s3528_s13 + $0x8] sm:$0xff]  }
 0xaaf   : > { %v1680_v60 = vpop.permute.xlu1 %1679 }
 0xab0   : > { %2644 = vpow2.f32 %v1621_v59  ;;  %v1685_v61 = vsel %vm851_vm3, %v1680_v60, 0 }
 0xab1   : > { %2485 = vmatpush3.bf16.msra.mxu0 %v1685_v61 }
 0xab2   : > { %2496 = vmatprep.subr.bf16.mxu0 %v2854_v0 }
 0xab4   : > { %2487 = vmatmul.mubr.msk.bf16.vlgmr.msra.gmra.mrb[36].mxu0 %vm779_vm2, %v2293_v62 }
 0xab5   : > { %2498 = vmatprep.mubr.msk.bf16.mxu0 %vm2855_vm0, %v2854_v0  ;;  %2497 = vmatpush3.bf16.msra.mxu0 %v1781_v7  ;;  %v2630_v7 = vld [vmem:[%s3530_s15 + $0x10] sm:$0xff]  }
 0xab6   : > { %2510 = vmatprep.subr.bf16.mxu0 %v2854_v0 }
 0xaba   : > { %v2645_v19 = vpop.eup %2644 }
 0xabb   : > { %v1623_v46 = vsel %vm779_vm2, %v2645_v19, 0.0 }
 0xabc   : > { %1624 = vadd.xlane.f32.xlu0 %v1623_v46 }
 0xad2   : > { %1629 = vrot.lane.b32.xlu0 %v3220_v9, %s2871_s3 }
 0xadd   : > { %v1558_v63 = vpop.f32.mrb[28].mxu1 }
 0xade   : > { %v1564_v1 = vadd.f32 %v1558_v63, %v1516_v45  ;;  %v2470_v2 = vpop.f32.mrb[29].mxu1  ;;  %v2303_v63 = vld [vmem:[%s3527_s12] ss:$0 sm:$0xff] }
 0xadf   : > { %v1561_v4 = vpop.f32.mrb[30].mxu1 }
 0xae0   : > { %v2471_v5 = vpop.f32.mrb[31].mxu1 }
 0xae1   : > { %v2628_v5 = vld [vmem:[%s3530_s15] sm:$0xff]  }
 0xb49   : > { %v1625_v8 = vpop.xlane.xlu0 %1624 }
 0xb4a   : > { %2646 = vrcp.f32 %v1625_v8  ;;  %v2631_v8 = vld [vmem:[%s3530_s15 + $0x18] sm:$0xff]  }
 0xb4d   : > { %v1630_v10 = vpop.permute.xlu0 %1629 }
 0xb4e   : > { %v1635_v11 = vsel %vm851_vm3, %v1630_v10, 0  ;;  %v2304_v10 = vld [vmem:[%s3529_s14] ss:$0 sm:$0xff] }
 0xb4f   : > { %2479 = vmatpush3.bf16.msra.mxu1 %v1635_v11 }
 0xb50   : > { %2490 = vmatprep.subr.bf16.mxu1 %v2854_v0 }
 0xb54   : > { %v2647_v9 = vpop.eup %2646 }
 0xb55   : > { %v1627_v13 = vmul.f32 %v2647_v9, %v2645_v19  ;;  %v2302_v19 = vld [vmem:[%s3526_s11] ss:$0 sm:$0xff] }
 0xb57   : > { %v1628_v14 = vpack.c.bf16 %v1627_v13, %v1627_v13 }
 0xb59   : > { %2481 = vmatmul.mubr.msk.bf16.vlgmr.msra.gmra.mrb[32].mxu1 %vm779_vm2, %v1628_v14 }
 0xb5a   : > { %2491 = vmatpush3.bf16.msra.mxu1 %v1733_v15  ;;  %2492 = vmatprep.mubr.msk.bf16.mxu1 %vm2855_vm0, %v2854_v0 }
 0xb5b   : > { %2502 = vmatprep.subr.bf16.mxu1 %v2854_v0 }
 0xb87   : > { %v1721_v16 = vpop.f32.mrb[36].mxu0 }
 0xb88   : > { %v1727_v17 = vmul.f32 %v1721_v16, %v3251_v44  ;;  %v2488_v18 = vpop.f32.mrb[37].mxu0 }
 0xb89   : > { %v1724_v20 = vpop.f32.mrb[38].mxu0 }
 0xb8a   : > { %v1728_v21 = vpack.c.bf16 %v1727_v17, %v1727_v17  ;;  %v2489_v22 = vpop.f32.mrb[39].mxu0 }
 0xb8c   : > { %2493 = vmatmul.mubr.msk.bf16.vlgmr.msra.gmra.mrb[36].mxu1 %vm779_vm2, %v1728_v21  ;;  %v2308_v21 = vld [vmem:[%s3590_s20] ss:$0 sm:$0xff]  ;;  %s3471_s20 = scalar_lea.hbm %s3594_s16, %s2317_s17 }
 0xb8d   : > { %2506 = vmatprep.mubr.msk.bf16.mxu1 %vm2855_vm0, %v2854_v0  ;;  %2503 = vmatpush3.bf16.msra.mxu1 %v2624_v32 }
 0xb8e   : > { %2504 = vmatprep.subr.bf16.mxu1 %v2854_v0 }
 0xb91   : > { %2505 = vmatpush3.bf16.msra.mxu1 %v2625_v33 }
 0xb92   : > { %2518 = vmatprep.subr.bf16.mxu1 %v2854_v0 }
 0xc2c   : > { %v1671_v23 = vpop.f32.mrb[32].mxu1 }
 0xc2d   : > { %v1776_v24 = vpack.c.bf16 %v1671_v23, %v1671_v23  ;;  %v2482_v25 = vpop.f32.mrb[33].mxu1 }
 0xc2e   : > { %v1674_v26 = vpop.f32.mrb[34].mxu1 }
 0xc2f   : > { %v2483_v27 = vpop.f32.mrb[35].mxu1  ;;  %2499 = vmatmul.mubr.msk.bf16.vlgmr.msra.gmra.mrb[40].mxu0 %vm779_vm2, %v1776_v24 }
 0xc30   : > { %2514 = vmatprep.mubr.msk.bf16.mxu0 %vm2855_vm0, %v2854_v0  ;;  %2511 = vmatpush3.bf16.msra.mxu0 %v2626_v3 }
 0xc31   : > { %2512 = vmatprep.subr.bf16.mxu0 %v2854_v0 }
 0xc34   : > { %2513 = vmatpush3.bf16.msra.mxu0 %v2627_v58 }
 0xc5f   : > { %v1769_v44 = vpop.f32.mrb[36].mxu1 }
 0xc60   : > { %v1775_v28 = vadd.f32 %v1769_v44, %v1564_v1  ;;  %v2494_v29 = vpop.f32.mrb[37].mxu1 }
 0xc61   : > { %v1772_v30 = vpop.f32.mrb[38].mxu1 }
 0xc62   : > { %v2495_v31 = vpop.f32.mrb[39].mxu1 }
 0xd02   : > { %v1817_v34 = vpop.f32.mrb[40].mxu0 }
 0xd03   : > { %v1823_v36 = vadd.f32 %v1817_v34, %v1775_v28  ;;  %v2500_v37 = vpop.f32.mrb[41].mxu0 }
 0xd04   : > { %v1820_v38 = vpop.f32.mrb[42].mxu0  ;;  %v2314_v37 = vld [vmem:[%s3591_s27] ss:$0 sm:$0xff]  ;;  %s2776_s27 = scalar_lea.vmem %s2775_s5, 128 }
 0xd05   : > { %v1831_v39 = vadd.f32 %v2297_v35, %v1823_v36  ;;  %v2501_v40 = vpop.f32.mrb[43].mxu0  ;;  %p2778_p1 = scmp.lt.s32.totalorder %s2776_s27, %s2770_s18 }
 0xd07   : > { %v1836_v41 = vpack.c.bf16 %v1831_v39, %v1831_v39  ;;  %v2315_v39 = vld [vmem:[%s3593_s28] ss:$0 sm:$0xff]  ;;  %p2779_p4 = por %p2778_p1, %p2777_p9 }
 0xd09   : > { %2507 = vmatmul.mubr.msk.bf16.vlgmr.msra.gmra.mrb[40].mxu1 %vm723_vm1, %v1836_v41  ;;  %p2780_p2 = pnand %p2779_p4, %p2773_p5 }
 0xd0a   : > { %2526 = vmatprep.mubr.msk.bf16.mxu1 %vm2855_vm0, %v2854_v0  ;;  %2519 = vmatpush3.bf16.msra.mxu1 %v2628_v5 }
 0xd0b   : > { %2520 = vmatprep.subr.bf16.mxu1 %v2854_v0 }
 0xd0e   : > { %2521 = vmatpush3.bf16.msra.mxu1 %v2629_v6 }
 0xd0f   : > { %2522 = vmatprep.subr.bf16.mxu1 %v2854_v0 }
 0xd12   : > { %2523 = vmatpush3.bf16.msra.mxu1 %v2630_v7 }
 0xd13   : > { %2524 = vmatprep.subr.bf16.mxu1 %v2854_v0 }
 0xd16   : > { %2525 = vmatpush3.bf16.msra.mxu1 %v2631_v8 }
 0xddc   : > { %v1893_v45 = vpop.f32.mrb[40].mxu1 }
 0xddd   : > { %v1894_v47 = vadd.f32 %v2298_v42, %v1893_v45  ;;  %v2508_v48 = vpop.f32.mrb[41].mxu1 }
 0xdde   : > { %v1896_v49 = vpop.f32.mrb[42].mxu1 }
 0xddf   : > { %v2509_v50 = vpop.f32.mrb[43].mxu1  ;;  %v1900_v51 = vadd.f32 %v1899_v43, %v1894_v47 }
 0xde1   : > { %v1903_v52 = vsel %vm723_vm1, %v1900_v51, 0.0 }
 0xde2   : > { %1904 = vadd.xlane.f32.xlu1 %v1903_v52 }
 0xe6f   : > { %v1905_v53 = vpop.xlane.xlu1 %1904 }
 0xe70   : > { %v1907_v54 = vmul.f32 0.03125, %v1905_v53 }
 0xe72   : > { %v1908_v55 = vsub.f32 %v1900_v51, %v1907_v54 }
 0xe74   : > { %v1909_v56 = vmul.f32 %v1908_v55, %v1908_v55 }
 0xe76   : > { %v1910_v57 = vsel %vm723_vm1, %v1909_v56, 0.0 }
 0xe77   : > { %1911 = vadd.xlane.f32.xlu0 %v1910_v57 }
 0xf04   : > { %v1912_v59 = vpop.xlane.xlu0 %1911 }
 0xf05   : > { %v1913_v60 = vmul.f32 0.03125, %v1912_v59 }
 0xf07   : > { %v1914_v61 = vadd.f32 1e-12, %v1913_v60 }
 0xf09   : > { %2648 = vrsqrt.f32 %v1914_v61 }
 0xf13   : > { %v2649_v62 = vpop.eup %2648 }
 0xf14   : > { %v1916_v46 = vmul.f32 %v2649_v62, %v1908_v55 }
 0xf16   : > { %v1923_v1 = vmul.f32 %v2302_v19, %v1916_v46 }
 0xf18   : > { %v1930_v2 = vadd.f32 %v2303_v63, %v1923_v1 }
 0xf1a   : > { %v1935_v4 = vpack.c.bf16 %v1930_v2, %v1930_v2 }
 0xf1c   : > { %2515 = vmatmul.mubr.msk.bf16.vlgmr.msra.gmra.mrb[44].mxu0 %vm723_vm1, %v1935_v4 }
 0xfef   : > { %v1992_v11 = vpop.f32.mrb[44].mxu0 }
 0xff0   : > { %v1993_v9 = vadd.f32 %v2304_v10, %v1992_v11  ;;  %v2516_v12 = vpop.f32.mrb[45].mxu0 }
 0xff1   : > { %v1995_v13 = vpop.f32.mrb[46].mxu0 }
 0xff2   : > { %v2000_v14 = vmul.f32 0.70710677, %v1993_v9  ;;  %v2517_v15 = vpop.f32.mrb[47].mxu0  ;;  %v1998_v17 = vmul.f32 0.5, %v1993_v9 }
 0xff4   : > { %2650 = verf.f32 %v2000_v14 }
 0xffe   : > { %v2651_v16 = vpop.eup %2650 }
 0xfff   : > { %v2002_v18 = vadd.f32 1.0, %v2651_v16 }
0x1001   : > { %v2003_v0 = vmul.f32 %v2002_v18, %v1998_v17 }
0x1003   : > { %v2012_v20 = vpack.c.bf16 %v2003_v0, %v2003_v0 }
0x1005   : > { %2527 = vmatmul.mubr.msk.bf16.vlgmr.msra.gmra.mrb[44].mxu1 %vm2044_vm4, %v2012_v20 }
0x10d8   : > { %v2082_v22 = vpop.f32.mrb[44].mxu1 }
0x10d9   : > { %v2083_v23 = vadd.f32 %v2308_v21, %v2082_v22  ;;  %v2528_v24 = vpop.f32.mrb[45].mxu1 }
0x10da   : > { %v2085_v25 = vpop.f32.mrb[46].mxu1 }
0x10db   : > { %v2529_v26 = vpop.f32.mrb[47].mxu1  ;;  %v2088_v27 = vadd.f32 %v2083_v23, %v1930_v2 }
0x10dd   : > { %v2091_v44 = vsel %vm723_vm1, %v2088_v27, 0.0 }
0x10de   : > { %2092 = vadd.xlane.f32.xlu1 %v2091_v44 }
0x116b   : > { %v2093_v28 = vpop.xlane.xlu1 %2092 }
0x116c   : > { %v2094_v29 = vmul.f32 0.03125, %v2093_v28 }
0x116e   : > { %v2095_v30 = vsub.f32 %v2088_v27, %v2094_v29 }
0x1170   : > { %v2096_v31 = vmul.f32 %v2095_v30, %v2095_v30 }
0x1172   : > { %v2097_v32 = vsel %vm723_vm1, %v2096_v31, 0.0 }
0x1173   : > { %2098 = vadd.xlane.f32.xlu0 %v2097_v32 }
0x1200   : > { %v2099_v33 = vpop.xlane.xlu0 %2098 }
0x1201   : > { %v2100_v34 = vmul.f32 0.03125, %v2099_v33 }
0x1203   : > { %v2101_v35 = vadd.f32 1e-12, %v2100_v34 }
0x1205   : > { %2652 = vrsqrt.f32 %v2101_v35 }
0x120f   : > { %v2653_v36 = vpop.eup %2652 }
0x1210   : > { %v2103_v38 = vmul.f32 %v2653_v36, %v2095_v30 }
0x1212   : > { %v2110_v40 = vmul.f32 %v2314_v37, %v2103_v38 }
0x1214   : > { %v2117_v41 = vadd.f32 %v2315_v39, %v2110_v40 }
0x1216   : > { %v2118_v42 = vpack.c.bf16 %v2117_v41, %v2117_v41 }
0x1218   : > { %2120 = vst.msk [vmem:[%s689_s2] sm:$0xf] %vm2119_vm5, %v2118_v42 }
0x1219   : > { %2783 = shalt.err (!%p2780_p2)
}
0x121a   : > { %s2784_s25 = scalar_lea.hbm %s3471_s20, 64  ;;  %s2788_s28 = scalar_lea.hbm %s3594_s16, 128 }
0x121b   : > { %p2785_p6 = scmp.ne.s32.totalorder %s3471_s20, %s2784_s25  ;;  %p2789_p8 = scmp.lt.u32.totalorder %s3471_s20, %s3594_s16 }
0x121c   : > { %p2790_p12 = scmp.lt.u32.totalorder %s2788_s28, %s2784_s25  ;;  %p2792_p7 = scmp.lt.u32.totalorder %s2784_s25, %s3471_s20 }
0x121d   : > { %p2786_p11 = pnand %p2785_p6, %p3595_p10 }
0x121e   : > { %p2791_p3 = por %p2790_p12, %p2789_p8 }
0x121f   : > { %p2787_p0 = pneg %p2786_p11 }
0x1220   : > { %p2793_p13 = por %p2792_p7, %p2791_p3 }
0x1222   : > { %p2794_p5 = pnand %p2793_p13, %p2787_p0 }
0x1224   : > { %2797 = shalt.err (!%p2794_p5)
}
0x1225   : > { %2542 = dma.vmem_to_hbm [thread:$0]  (%p3595_p10), %s3473_s22, 64, %s3471_s20, %s2122_s0  }
0x1226 PF: > { %s3596_s3 = sld [smem:[#allocation16_spill]]  ;;  %s3597_s19 = sld [smem:[#allocation18_spill]] }
0x1227   : > { %p3599_p1 = scmp.ge.s32.totalorder %s2848_s21, 2 }
0x122c   : > { %s2147_s18 = sand.u32 1, %s3596_s3   ;;  %p3598_p9 = scmp.ne.s32.totalorder %s3597_s19, 0 }
0x122d   : > { %s2148_s1 = scalar_lea.sflag [#allocation4], %s2147_s18 }
0x122e   : > { %p2559_p4 = pnand %p3599_p1, %p3598_p9 }
0x1230   : > { %2831 = dma.done.wait (!%p2559_p4), %s2148_s1, 64  }
0x1231   : > { %2833 = vsyncadd (!%p2559_p4), %s2148_s1, 4294967232  ;;  %s3600_s21 = sld [smem:[#allocation19_spill]]  ;;  %s3601_s5 = sld [smem:[#allocation17_spill]] }
0x1232   : > { %s3602_s20 = sld [smem:[#allocation20_spill]]  ;;  %s3603_s0 = smov %s2840_s30 }
0x1237   : > { %p36_p2 = scmp.ge.s32.totalorder %s3600_s21, 4   ;;  %s3604_s30 = smov %s3601_s5 }
0x1239   :  { %38 = sbr.rel (!%p36_p2) target bundleno = 19 (0x13), region = 168 }
0x1240   :  { %2153 = vsyncpa [#allocation3], 1 }
0x1241   :  { %2155 = vsyncpa [#allocation3 + $0x1], 1 }
0x1242   :  { %2156 = vsyncpa [#allocation6], 1 }
0x1243   :  { %2158 = vsyncpa [#allocation6 + $0x1], 1 }
0x1244   :  { %2159 = vsyncpa [#allocation9], 1 }
0x1245   :  { %2160 = vsyncpa [#allocation4], 1 }
0x1246   :  { %2162 = vsyncpa [#allocation4 + $0x1], 1 }

</bundles_post_ra>
